<compile_context>
chip_gen: v6e
topology: v6e:2x2x1
jax: 0.10.0
libtpu: 0.0.40
codegen_flags: <defaults>
</compile_context>

<pallas_src>
import functools
import math

import jax
import jax.numpy as jnp
from jax import lax
from jax.experimental import pallas as pl
from jax.experimental.pallas import tpu as pltpu

_DILATIONS = (1, 3, 5, 7)


# --------------------------------------------------------------------------
# Fused ADR kernel (per-batch grid step, everything VMEM resident)
# --------------------------------------------------------------------------
def _adr_kernel(x_ref, wbys_ref, bbys_ref, ws_ref, bs_ref, wp_ref, bp_ref,
                w1_ref, b1_ref, w2t_ref, wext_ref, wconv_ref,
                out_t_ref, value_ref, pad_ref, *, H, W, C):
    f32 = jnp.float32
    L = H * W
    Cq = C // 4
    dmax = max(_DILATIONS)

    # ---------------- BYS: bayesian 1x1 conv ----------------
    x = x_ref[...]                                                        # (C, L)
    out_t0 = jnp.dot(wbys_ref[...], x, preferred_element_type=f32) + bbys_ref[...]

    # ---------------- GloRe_Unit_2D (normalize=True) ----------------
    xs = jnp.dot(ws_ref[...], out_t0, preferred_element_type=f32) + bs_ref[...]   # (S, L)
    xp = jnp.dot(wp_ref[...], out_t0, preferred_element_type=f32) + bp_ref[...]   # (Nn, L)

    # coordinate -> interaction space; contraction over the lane (L) dim.
    xn = lax.dot_general(xs, xp, (((1,), (1,)), ((), ())),
                         preferred_element_type=f32) * (1.0 / L)                  # (S, Nn)

    # GCN: conv over node dim (+bias) + residual, ReLU, conv over state dim.
    h1 = jnp.dot(xn, w1_ref[...], preferred_element_type=f32) + b1_ref[...] + xn
    rh = jnp.maximum(h1, 0.0)                                                     # (S, Nn)
    x_n_rel = jnp.dot(w2t_ref[...], rh, preferred_element_type=f32)               # (S, Nn)

    # interaction -> coordinate space, conv_extend (blocker BN folded) + residual.
    x_state = jnp.dot(x_n_rel, xp, preferred_element_type=f32)                    # (S, L)
    t_gcn = out_t0 + jnp.dot(wext_ref[...], x_state, preferred_element_type=f32)  # (C, L)

    # ---------------- four dilated 3x3 conv + BN + ReLU branches ----------------
    # Zero-padded halo buffer in VMEM; 9 shifted-tap matmuls per branch.
    pad_ref[...] = jnp.zeros_like(pad_ref)
    pad_ref[dmax:dmax + H, dmax:dmax + W, :] = jnp.transpose(t_gcn).reshape(H, W, C)

    dn_cc = (((1,), (1,)), ((), ()))     # contract over the channel dim of both
    branch_out = []
    for b, d in enumerate(_DILATIONS):
        acc = jnp.zeros((Cq, L), f32)
        for kh in range(3):
            for kw in range(3):
                r0 = dmax + (kh - 1) * d
                c0 = dmax + (kw - 1) * d
                win = pad_ref[r0:r0 + H, c0:c0 + W, :].reshape(L, C)
                wt = wconv_ref[b * 9 + kh * 3 + kw]                    # (Cq, C) bf16
                acc = acc + lax.dot_general(wt, win.astype(jnp.bfloat16), dn_cc,
                                            preferred_element_type=f32)
        branch_out.append(jnp.maximum(acc, 0.0))          # BN (eps folded) + ReLU

    out_t = jnp.concatenate(branch_out, axis=0)           # (C, L), lane-dense
    out_t_ref[...] = out_t

    # ---------------- sigmoid + per-(n, c) spatial-sum normalization ----------------
    s = 0.5 * (jnp.tanh(0.5 * out_t) + 1.0)               # stable sigmoid (EUP tanh)
    denom = jnp.sum(s, axis=-1, keepdims=True)
    value_ref[...] = s * pl.reciprocal(denom, approx=True)


# --------------------------------------------------------------------------
# Wrapper: fold BN / layout transposes into weights, one pallas_call
# --------------------------------------------------------------------------
def adr_forward(params, t_nchw):
    N, C, H, W = t_nchw.shape
    L = H * W
    S, Nn, Cq = 2 * C, C, C // 4
    dmax = max(_DILATIONS)
    Hp, Wp = H + 2 * dmax, W + 2 * dmax
    f32 = jnp.float32

    # NCHW -> (N, C, L): pure reshape (no transpose); kernel is channels-major.
    x = t_nchw.reshape(N, C, L).astype(f32)

    # ---- BYS weight realization (mu + softplus(rho) * eps), PyTorch (out, in) ----
    w_bys = (params["bys_w_mu"]
             + jax.nn.softplus(params["bys_w_rho"]) * params["bys_w_eps"])[:, :, 0, 0]
    b_bys = (params["bys_b_mu"]
             + jax.nn.softplus(params["bys_b_rho"]) * params["bys_b_eps"]).reshape(C, 1)

    # ---- GloRe weights, pre-transposed to (out, in) and BN folded ----
    w_state = params["g_state_w"].T                       # (S, C)
    b_state = params["g_state_b"].reshape(S, 1)
    w_proj = params["g_proj_w"].T                         # (Nn, C)
    b_proj = params["g_proj_b"].reshape(Nn, 1)
    w1 = params["gcn_w1"]                                 # (Nn, Nn), acts on node dim
    b1 = params["gcn_b1"].reshape(1, Nn)
    w2t = params["gcn_w2"].T                              # (S, S)
    w_ext = params["g_ext_w"].T / jnp.sqrt(1.0 + 1e-4)    # (C, S), blocker BN folded

    # ---- dilated-conv tap weights: (branch*9, C//4, C), branch BN folded, bf16 ----
    def taps(w_pt):                                       # (Cout, C, 3, 3) -> (9, Cout, C)
        return jnp.transpose(w_pt, (2, 3, 0, 1)).reshape(9, Cq, C)
    w_conv = jnp.concatenate(
        [taps(params[k]) for k in ("cv1_w", "cv2_w", "cv3_w", "cv4_w")], axis=0)
    w_conv = (w_conv / jnp.sqrt(1.0 + 1e-5)).astype(jnp.bfloat16)

    weights = [w_bys.astype(f32), b_bys.astype(f32),
               w_state.astype(f32), b_state.astype(f32),
               w_proj.astype(f32), b_proj.astype(f32),
               w1.astype(f32), b1.astype(f32), w2t.astype(f32),
               w_ext.astype(f32), w_conv]

    def whole(arr):
        nd = arr.ndim
        return pl.BlockSpec(arr.shape, lambda n, _nd=nd: (0,) * _nd)

    out_t_ncl, value_ncl = pl.pallas_call(
        functools.partial(_adr_kernel, H=H, W=W, C=C),
        out_shape=(jax.ShapeDtypeStruct((N, C, L), f32),
                   jax.ShapeDtypeStruct((N, C, L), f32)),
        grid=(N,),
        in_specs=[pl.BlockSpec((None, C, L), lambda n: (n, 0, 0))]
                 + [whole(w) for w in weights],
        out_specs=(pl.BlockSpec((None, C, L), lambda n: (n, 0, 0)),
                   pl.BlockSpec((None, C, L), lambda n: (n, 0, 0))),
        scratch_shapes=[pltpu.VMEM((Hp, Wp, C), f32)],
        compiler_params=pltpu.CompilerParams(
            dimension_semantics=("parallel",)),
    )(x, *weights)

    return value_ncl.reshape(N, C, H, W), out_t_ncl.reshape(N, C, H, W)


# --------------------------------------------------------------------------
# Pure-JAX reference (no Pallas) of the same forward pass, for validation
# --------------------------------------------------------------------------
def adr_reference(params, t_nchw):
    N, C, H, W = t_nchw.shape
    L = H * W
    x = jnp.transpose(t_nchw, (0, 2, 3, 1)).astype(jnp.float32)       # NHWC

    w_bys = (params["bys_w_mu"]
             + jax.nn.softplus(params["bys_w_rho"]) * params["bys_w_eps"])[:, :, 0, 0]
    b_bys = (params["bys_b_mu"]
             + jax.nn.softplus(params["bys_b_rho"]) * params["bys_b_eps"])
    out_t0 = jnp.einsum("nhwc,oc->nhwo", x, w_bys) + b_bys

    xf = out_t0.reshape(N, L, C)
    xs = xf @ params["g_state_w"] + params["g_state_b"]               # (N, L, S)
    xp = xf @ params["g_proj_w"] + params["g_proj_b"]                 # (N, L, Nn)
    xn = jnp.einsum("nls,nlk->nsk", xs, xp) / L                       # (N, S, Nn)
    h1 = xn @ params["gcn_w1"] + params["gcn_b1"] + xn
    rh = jnp.maximum(h1, 0.0)
    h2 = jnp.einsum("nsk,st->nkt", rh, params["gcn_w2"])              # (N, Nn, S)
    xsf = jnp.einsum("nlk,nks->nls", xp, h2)                          # (N, L, S)
    ext = (xsf @ params["g_ext_w"]) / jnp.sqrt(1.0 + 1e-4)
    t_gcn = (xf + ext).reshape(N, H, W, C)

    outs = []
    for k, d in zip(("cv1_w", "cv2_w", "cv3_w", "cv4_w"), _DILATIONS):
        w_hwio = jnp.transpose(params[k], (2, 3, 1, 0))
        y = lax.conv_general_dilated(t_gcn, w_hwio, (1, 1), ((d, d), (d, d)),
                                     rhs_dilation=(d, d),
                                     dimension_numbers=("NHWC", "HWIO", "NHWC"))
        outs.append(jnp.maximum(y / jnp.sqrt(1.0 + 1e-5), 0.0))
    out_t = jnp.transpose(jnp.concatenate(outs, axis=-1), (0, 3, 1, 2))   # NCHW
    s = jax.nn.sigmoid(out_t)
    value = s / jnp.sum(s, axis=(2, 3), keepdims=True)
    return value, out_t


# --------------------------------------------------------------------------
# Parameters (deterministic, synthetic; shapes follow the PyTorch __init__)
# --------------------------------------------------------------------------
def init_params(key, C):
    S, Nn = 2 * C, C
    ks = jax.random.split(key, 18)
    u = lambda k, shape, lo, hi: jax.random.uniform(k, shape, jnp.float32, lo, hi)

    def conv_w(k, fan_in, shape):
        bound = 1.0 / math.sqrt(fan_in)
        return u(k, shape, -bound, bound)

    return {
        # BYS bayesian 1x1 conv, PyTorch layout (Cout, Cin, 1, 1)
        "bys_w_mu": u(ks[0], (C, C, 1, 1), -0.2, 0.2),
        "bys_w_rho": u(ks[1], (C, C, 1, 1), -5.0, -4.0),
        "bys_b_mu": u(ks[2], (C,), -0.2, 0.2),
        "bys_b_rho": u(ks[3], (C,), -5.0, -4.0),
        "bys_w_eps": jax.random.laplace(ks[4], (C, C, 1, 1), jnp.float32),
        "bys_b_eps": jax.random.laplace(ks[5], (C,), jnp.float32),
        # GloRe unit -- 1x1 conv weights stored in (Cin, Cout) matmul layout
        "g_state_w": conv_w(ks[6], C, (C, S)),
        "g_state_b": u(ks[7], (S,), -0.1, 0.1),
        "g_proj_w": conv_w(ks[8], C, (C, Nn)),
        "g_proj_b": u(ks[9], (Nn,), -0.1, 0.1),
        "gcn_w1": conv_w(ks[10], Nn, (Nn, Nn)),      # Conv1d(num_node, num_node)
        "gcn_b1": u(ks[11], (Nn,), -0.1, 0.1),
        "gcn_w2": conv_w(ks[12], S, (S, S)),         # Conv1d(num_state, num_state), no bias
        "g_ext_w": conv_w(ks[13], S, (S, C)),        # conv_extend, no bias
        # dilated 3x3 convs, PyTorch layout (Cout, Cin, 3, 3), bias=False
        "cv1_w": conv_w(ks[14], C * 9, (C // 4, C, 3, 3)),
        "cv2_w": conv_w(ks[15], C * 9, (C // 4, C, 3, 3)),
        "cv3_w": conv_w(ks[16], C * 9, (C // 4, C, 3, 3)),
        "cv4_w": conv_w(ks[17], C * 9, (C // 4, C, 3, 3)),
    }


# --------------------------------------------------------------------------
if __name__ == "__main__":
    key = jax.random.PRNGKey(0)
    kp, kx = jax.random.split(key)

    N, C, H, W = 2, 8, 16, 16            # in_plane1 = 8 (divisible by 4)
    params = init_params(kp, C)
    t = jax.random.normal(kx, (N, C, H, W), jnp.float32)

    value, out_t = jax.jit(adr_forward)(params, t)
    jax.block_until_ready((value, out_t))

    assert value.shape == (N, C, H, W) and out_t.shape == (N, C, H, W)
    # per-(n, c) spatial sums of `value` must be ~1 by construction
    sums = jnp.sum(value, axis=(2, 3))
    assert jnp.allclose(sums, jnp.ones_like(sums), atol=5e-3)

    # cross-check against a pure-JAX reference of the same module
    value_r, out_t_r = jax.jit(adr_reference)(params, t)
    assert jnp.allclose(out_t, out_t_r, atol=2e-2, rtol=2e-2), (
        float(jnp.max(jnp.abs(out_t - out_t_r))))
    assert jnp.allclose(value, value_r, atol=1e-3, rtol=2e-2)

    print("KERNEL_OK")
</pallas_src>

<mosaic_0001>
module attributes {stable_mosaic.version = 11 : i64} {
  func.func @_adr_kernel(%arg0: i32, %arg1: memref<1x8x256xf32, #tpu.memory_space<vmem>>, %arg2: memref<8x8xf32, #tpu.memory_space<vmem>>, %arg3: memref<8x1xf32, #tpu.memory_space<vmem>>, %arg4: memref<16x8xf32, #tpu.memory_space<vmem>>, %arg5: memref<16x1xf32, #tpu.memory_space<vmem>>, %arg6: memref<8x8xf32, #tpu.memory_space<vmem>>, %arg7: memref<8x1xf32, #tpu.memory_space<vmem>>, %arg8: memref<8x8xf32, #tpu.memory_space<vmem>>, %arg9: memref<1x8xf32, #tpu.memory_space<vmem>>, %arg10: memref<16x16xf32, #tpu.memory_space<vmem>>, %arg11: memref<8x16xf32, #tpu.memory_space<vmem>>, %arg12: memref<36x2x8xbf16, #tpu.memory_space<vmem>>, %arg13: memref<1x8x256xf32, #tpu.memory_space<vmem>>, %arg14: memref<1x8x256xf32, #tpu.memory_space<vmem>>, %arg15: memref<30x30x8xf32, #tpu.memory_space<vmem>>) attributes {dimension_semantics = [#tpu.dimension_semantics<parallel>], iteration_bounds = array<i64: 2>, scalar_prefetch = 0 : i64, scratch_operands = 1 : i64, tpu.core_type = #tpu.core_type<tc>, window_params = [{transform_indices = @transform_0, window_bounds = array<i64: 1, 8, 256>}, {pipeline_mode = #tpu.pipeline_mode<synchronous>, transform_indices = @transform_1, window_bounds = array<i64: 8, 8>}, {pipeline_mode = #tpu.pipeline_mode<synchronous>, transform_indices = @transform_2, window_bounds = array<i64: 8, 1>}, {pipeline_mode = #tpu.pipeline_mode<synchronous>, transform_indices = @transform_3, window_bounds = array<i64: 16, 8>}, {pipeline_mode = #tpu.pipeline_mode<synchronous>, transform_indices = @transform_4, window_bounds = array<i64: 16, 1>}, {pipeline_mode = #tpu.pipeline_mode<synchronous>, transform_indices = @transform_5, window_bounds = array<i64: 8, 8>}, {pipeline_mode = #tpu.pipeline_mode<synchronous>, transform_indices = @transform_6, window_bounds = array<i64: 8, 1>}, {pipeline_mode = #tpu.pipeline_mode<synchronous>, transform_indices = @transform_7, window_bounds = array<i64: 8, 8>}, {pipeline_mode = #tpu.pipeline_mode<synchronous>, transform_indices = @transform_8, window_bounds = array<i64: 1, 8>}, {pipeline_mode = #tpu.pipeline_mode<synchronous>, transform_indices = @transform_9, window_bounds = array<i64: 16, 16>}, {pipeline_mode = #tpu.pipeline_mode<synchronous>, transform_indices = @transform_10, window_bounds = array<i64: 8, 16>}, {pipeline_mode = #tpu.pipeline_mode<synchronous>, transform_indices = @transform_11, window_bounds = array<i64: 36, 2, 8>}, {transform_indices = @transform_12, window_bounds = array<i64: 1, 8, 256>}, {transform_indices = @transform_13, window_bounds = array<i64: 1, 8, 256>}]} {
    %c0 = arith.constant 0 : index
    %c0_0 = arith.constant 0 : index
    %c0_1 = arith.constant 0 : index
    %0 = vector.load %arg1[%c0, %c0_0, %c0_1] : memref<1x8x256xf32, #tpu.memory_space<vmem>>, vector<1x8x256xf32>
    %1 = vector.shape_cast %0 : vector<1x8x256xf32> to vector<8x256xf32>
    %c0_2 = arith.constant 0 : index
    %c0_3 = arith.constant 0 : index
    %2 = vector.load %arg2[%c0_2, %c0_3] : memref<8x8xf32, #tpu.memory_space<vmem>>, vector<8x8xf32>
    %cst = arith.constant dense<0.000000e+00> : vector<8x256xf32>
    %3 = tpu.matmul %2, %1, %cst {dimension_numbers = #tpu.dot_dimension_numbers<[1], [0], [0], [1], [0, 0, 1, 1], [], []>} : vector<8x8xf32>, vector<8x256xf32>, vector<8x256xf32> -> vector<8x256xf32>
    %c0_4 = arith.constant 0 : index
    %c0_5 = arith.constant 0 : index
    %4 = vector.load %arg3[%c0_4, %c0_5] : memref<8x1xf32, #tpu.memory_space<vmem>>, vector<8x1xf32>
    %5 = vector.broadcast %4 : vector<8x1xf32> to vector<8x256xf32>
    %6 = arith.addf %3, %5 : vector<8x256xf32>
    %c0_6 = arith.constant 0 : index
    %c0_7 = arith.constant 0 : index
    %7 = vector.load %arg4[%c0_6, %c0_7] : memref<16x8xf32, #tpu.memory_space<vmem>>, vector<16x8xf32>
    %cst_8 = arith.constant dense<0.000000e+00> : vector<16x256xf32>
    %8 = tpu.matmul %7, %6, %cst_8 {dimension_numbers = #tpu.dot_dimension_numbers<[1], [0], [0], [1], [0, 0, 1, 1], [], []>} : vector<16x8xf32>, vector<8x256xf32>, vector<16x256xf32> -> vector<16x256xf32>
    %c0_9 = arith.constant 0 : index
    %c0_10 = arith.constant 0 : index
    %9 = vector.load %arg5[%c0_9, %c0_10] : memref<16x1xf32, #tpu.memory_space<vmem>>, vector<16x1xf32>
    %10 = vector.broadcast %9 : vector<16x1xf32> to vector<16x256xf32>
    %11 = arith.addf %8, %10 : vector<16x256xf32>
    %c0_11 = arith.constant 0 : index
    %c0_12 = arith.constant 0 : index
    %12 = vector.load %arg6[%c0_11, %c0_12] : memref<8x8xf32, #tpu.memory_space<vmem>>, vector<8x8xf32>
    %cst_13 = arith.constant dense<0.000000e+00> : vector<8x256xf32>
    %13 = tpu.matmul %12, %6, %cst_13 {dimension_numbers = #tpu.dot_dimension_numbers<[1], [0], [0], [1], [0, 0, 1, 1], [], []>} : vector<8x8xf32>, vector<8x256xf32>, vector<8x256xf32> -> vector<8x256xf32>
    %c0_14 = arith.constant 0 : index
    %c0_15 = arith.constant 0 : index
    %14 = vector.load %arg7[%c0_14, %c0_15] : memref<8x1xf32, #tpu.memory_space<vmem>>, vector<8x1xf32>
    %15 = vector.broadcast %14 : vector<8x1xf32> to vector<8x256xf32>
    %16 = arith.addf %13, %15 : vector<8x256xf32>
    %cst_16 = arith.constant dense<0.000000e+00> : vector<16x8xf32>
    %17 = tpu.matmul %11, %16, %cst_16 {dimension_numbers = #tpu.dot_dimension_numbers<[1], [1], [0], [0], [0, 0, 1, 0], [], []>} : vector<16x256xf32>, vector<8x256xf32>, vector<16x8xf32> -> vector<16x8xf32>
    %cst_17 = arith.constant 3.906250e-03 : f32
    %18 = vector.broadcast %cst_17 : f32 to vector<16x8xf32>
    %19 = arith.mulf %17, %18 : vector<16x8xf32>
    %c0_18 = arith.constant 0 : index
    %c0_19 = arith.constant 0 : index
    %20 = vector.load %arg8[%c0_18, %c0_19] : memref<8x8xf32, #tpu.memory_space<vmem>>, vector<8x8xf32>
    %cst_20 = arith.constant dense<0.000000e+00> : vector<16x8xf32>
    %21 = tpu.matmul %19, %20, %cst_20 {dimension_numbers = #tpu.dot_dimension_numbers<[1], [0], [0], [1], [0, 0, 1, 1], [], []>} : vector<16x8xf32>, vector<8x8xf32>, vector<16x8xf32> -> vector<16x8xf32>
    %c0_21 = arith.constant 0 : index
    %c0_22 = arith.constant 0 : index
    %22 = vector.load %arg9[%c0_21, %c0_22] : memref<1x8xf32, #tpu.memory_space<vmem>>, vector<1x8xf32>
    %23 = vector.broadcast %22 : vector<1x8xf32> to vector<16x8xf32>
    %24 = arith.addf %21, %23 : vector<16x8xf32>
    %25 = arith.addf %24, %19 : vector<16x8xf32>
    %cst_23 = arith.constant 0.000000e+00 : f32
    %26 = vector.broadcast %cst_23 : f32 to vector<16x8xf32>
    %27 = arith.maximumf %25, %26 : vector<16x8xf32>
    %c0_24 = arith.constant 0 : index
    %c0_25 = arith.constant 0 : index
    %28 = vector.load %arg10[%c0_24, %c0_25] : memref<16x16xf32, #tpu.memory_space<vmem>>, vector<16x16xf32>
    %cst_26 = arith.constant dense<0.000000e+00> : vector<16x8xf32>
    %29 = tpu.matmul %28, %27, %cst_26 {dimension_numbers = #tpu.dot_dimension_numbers<[1], [0], [0], [1], [0, 0, 1, 1], [], []>} : vector<16x16xf32>, vector<16x8xf32>, vector<16x8xf32> -> vector<16x8xf32>
    %cst_27 = arith.constant dense<0.000000e+00> : vector<16x256xf32>
    %30 = tpu.matmul %29, %16, %cst_27 {dimension_numbers = #tpu.dot_dimension_numbers<[1], [0], [0], [1], [0, 0, 1, 1], [], []>} : vector<16x8xf32>, vector<8x256xf32>, vector<16x256xf32> -> vector<16x256xf32>
    %c0_28 = arith.constant 0 : index
    %c0_29 = arith.constant 0 : index
    %31 = vector.load %arg11[%c0_28, %c0_29] : memref<8x16xf32, #tpu.memory_space<vmem>>, vector<8x16xf32>
    %cst_30 = arith.constant dense<0.000000e+00> : vector<8x256xf32>
    %32 = tpu.matmul %31, %30, %cst_30 {dimension_numbers = #tpu.dot_dimension_numbers<[1], [0], [0], [1], [0, 0, 1, 1], [], []>} : vector<8x16xf32>, vector<16x256xf32>, vector<8x256xf32> -> vector<8x256xf32>
    %33 = arith.addf %6, %32 : vector<8x256xf32>
    %cst_31 = arith.constant 0.000000e+00 : f32
    %34 = vector.broadcast %cst_31 : f32 to vector<30x30x8xf32>
    %c0_32 = arith.constant 0 : index
    %c0_33 = arith.constant 0 : index
    %c0_34 = arith.constant 0 : index
    %35 = vector.load %arg15[%c0_32, %c0_33, %c0_34] : memref<30x30x8xf32, #tpu.memory_space<vmem>>, vector<30x30x8xf32>
    tpu.vector_store %arg15[%c0_32, %c0_33, %c0_34], %34 {strides = array<i32>} : memref<30x30x8xf32, #tpu.memory_space<vmem>>, vector<30x30x8xf32>,
    %36 = tpu.transpose %33, [1, 0] : vector<8x256xf32> -> vector<256x8xf32>
    %37 = vector.shape_cast %36 : vector<256x8xf32> to vector<16x16x8xf32>
    %c7 = arith.constant 7 : index
    %c7_35 = arith.constant 7 : index
    %c0_36 = arith.constant 0 : index
    %38 = vector.load %arg15[%c7, %c7_35, %c0_36] : memref<30x30x8xf32, #tpu.memory_space<vmem>>, vector<16x16x8xf32>
    tpu.vector_store %arg15[%c7, %c7_35, %c0_36], %37 {strides = array<i32>} : memref<30x30x8xf32, #tpu.memory_space<vmem>>, vector<16x16x8xf32>,
    %cst_37 = arith.constant 0.000000e+00 : f32
    %39 = vector.broadcast %cst_37 : f32 to vector<2x256xf32>
    %c6 = arith.constant 6 : index
    %c6_38 = arith.constant 6 : index
    %c0_39 = arith.constant 0 : index
    %40 = vector.load %arg15[%c6, %c6_38, %c0_39] : memref<30x30x8xf32, #tpu.memory_space<vmem>>, vector<16x16x8xf32>
    %41 = vector.shape_cast %40 : vector<16x16x8xf32> to vector<256x8xf32>
    %c0_40 = arith.constant 0 : index
    %c0_41 = arith.constant 0 : index
    %c0_42 = arith.constant 0 : index
    %42 = vector.load %arg12[%c0_40, %c0_41, %c0_42] : memref<36x2x8xbf16, #tpu.memory_space<vmem>>, vector<1x2x8xbf16>
    %43 = vector.shape_cast %42 : vector<1x2x8xbf16> to vector<2x8xbf16>
    %44 = arith.truncf %41 : vector<256x8xf32> to vector<256x8xbf16>
    %cst_43 = arith.constant dense<0.000000e+00> : vector<2x256xf32>
    %45 = tpu.matmul %43, %44, %cst_43 {dimension_numbers = #tpu.dot_dimension_numbers<[1], [1], [0], [0], [0, 0, 1, 0], [], []>} : vector<2x8xbf16>, vector<256x8xbf16>, vector<2x256xf32> -> vector<2x256xf32>
    %46 = arith.addf %39, %45 : vector<2x256xf32>
    %c6_44 = arith.constant 6 : index
    %c7_45 = arith.constant 7 : index
    %c0_46 = arith.constant 0 : index
    %47 = vector.load %arg15[%c6_44, %c7_45, %c0_46] : memref<30x30x8xf32, #tpu.memory_space<vmem>>, vector<16x16x8xf32>
    %48 = vector.shape_cast %47 : vector<16x16x8xf32> to vector<256x8xf32>
    %c1 = arith.constant 1 : index
    %c0_47 = arith.constant 0 : index
    %c0_48 = arith.constant 0 : index
    %49 = vector.load %arg12[%c1, %c0_47, %c0_48] : memref<36x2x8xbf16, #tpu.memory_space<vmem>>, vector<1x2x8xbf16>
    %50 = vector.shape_cast %49 : vector<1x2x8xbf16> to vector<2x8xbf16>
    %51 = arith.truncf %48 : vector<256x8xf32> to vector<256x8xbf16>
    %cst_49 = arith.constant dense<0.000000e+00> : vector<2x256xf32>
    %52 = tpu.matmul %50, %51, %cst_49 {dimension_numbers = #tpu.dot_dimension_numbers<[1], [1], [0], [0], [0, 0, 1, 0], [], []>} : vector<2x8xbf16>, vector<256x8xbf16>, vector<2x256xf32> -> vector<2x256xf32>
    %53 = arith.addf %46, %52 : vector<2x256xf32>
    %c6_50 = arith.constant 6 : index
    %c8 = arith.constant 8 : index
    %c0_51 = arith.constant 0 : index
    %54 = vector.load %arg15[%c6_50, %c8, %c0_51] : memref<30x30x8xf32, #tpu.memory_space<vmem>>, vector<16x16x8xf32>
    %55 = vector.shape_cast %54 : vector<16x16x8xf32> to vector<256x8xf32>
    %c2 = arith.constant 2 : index
    %c0_52 = arith.constant 0 : index
    %c0_53 = arith.constant 0 : index
    %56 = vector.load %arg12[%c2, %c0_52, %c0_53] : memref<36x2x8xbf16, #tpu.memory_space<vmem>>, vector<1x2x8xbf16>
    %57 = vector.shape_cast %56 : vector<1x2x8xbf16> to vector<2x8xbf16>
    %58 = arith.truncf %55 : vector<256x8xf32> to vector<256x8xbf16>
    %cst_54 = arith.constant dense<0.000000e+00> : vector<2x256xf32>
    %59 = tpu.matmul %57, %58, %cst_54 {dimension_numbers = #tpu.dot_dimension_numbers<[1], [1], [0], [0], [0, 0, 1, 0], [], []>} : vector<2x8xbf16>, vector<256x8xbf16>, vector<2x256xf32> -> vector<2x256xf32>
    %60 = arith.addf %53, %59 : vector<2x256xf32>
    %c7_55 = arith.constant 7 : index
    %c6_56 = arith.constant 6 : index
    %c0_57 = arith.constant 0 : index
    %61 = vector.load %arg15[%c7_55, %c6_56, %c0_57] : memref<30x30x8xf32, #tpu.memory_space<vmem>>, vector<16x16x8xf32>
    %62 = vector.shape_cast %61 : vector<16x16x8xf32> to vector<256x8xf32>
    %c3 = arith.constant 3 : index
    %c0_58 = arith.constant 0 : index
    %c0_59 = arith.constant 0 : index
    %63 = vector.load %arg12[%c3, %c0_58, %c0_59] : memref<36x2x8xbf16, #tpu.memory_space<vmem>>, vector<1x2x8xbf16>
    %64 = vector.shape_cast %63 : vector<1x2x8xbf16> to vector<2x8xbf16>
    %65 = arith.truncf %62 : vector<256x8xf32> to vector<256x8xbf16>
    %cst_60 = arith.constant dense<0.000000e+00> : vector<2x256xf32>
    %66 = tpu.matmul %64, %65, %cst_60 {dimension_numbers = #tpu.dot_dimension_numbers<[1], [1], [0], [0], [0, 0, 1, 0], [], []>} : vector<2x8xbf16>, vector<256x8xbf16>, vector<2x256xf32> -> vector<2x256xf32>
    %67 = arith.addf %60, %66 : vector<2x256xf32>
    %c7_61 = arith.constant 7 : index
    %c7_62 = arith.constant 7 : index
    %c0_63 = arith.constant 0 : index
    %68 = vector.load %arg15[%c7_61, %c7_62, %c0_63] : memref<30x30x8xf32, #tpu.memory_space<vmem>>, vector<16x16x8xf32>
    %69 = vector.shape_cast %68 : vector<16x16x8xf32> to vector<256x8xf32>
    %c4 = arith.constant 4 : index
    %c0_64 = arith.constant 0 : index
    %c0_65 = arith.constant 0 : index
    %70 = vector.load %arg12[%c4, %c0_64, %c0_65] : memref<36x2x8xbf16, #tpu.memory_space<vmem>>, vector<1x2x8xbf16>
    %71 = vector.shape_cast %70 : vector<1x2x8xbf16> to vector<2x8xbf16>
    %72 = arith.truncf %69 : vector<256x8xf32> to vector<256x8xbf16>
    %cst_66 = arith.constant dense<0.000000e+00> : vector<2x256xf32>
    %73 = tpu.matmul %71, %72, %cst_66 {dimension_numbers = #tpu.dot_dimension_numbers<[1], [1], [0], [0], [0, 0, 1, 0], [], []>} : vector<2x8xbf16>, vector<256x8xbf16>, vector<2x256xf32> -> vector<2x256xf32>
    %74 = arith.addf %67, %73 : vector<2x256xf32>
    %c7_67 = arith.constant 7 : index
    %c8_68 = arith.constant 8 : index
    %c0_69 = arith.constant 0 : index
    %75 = vector.load %arg15[%c7_67, %c8_68, %c0_69] : memref<30x30x8xf32, #tpu.memory_space<vmem>>, vector<16x16x8xf32>
    %76 = vector.shape_cast %75 : vector<16x16x8xf32> to vector<256x8xf32>
    %c5 = arith.constant 5 : index
    %c0_70 = arith.constant 0 : index
    %c0_71 = arith.constant 0 : index
    %77 = vector.load %arg12[%c5, %c0_70, %c0_71] : memref<36x2x8xbf16, #tpu.memory_space<vmem>>, vector<1x2x8xbf16>
    %78 = vector.shape_cast %77 : vector<1x2x8xbf16> to vector<2x8xbf16>
    %79 = arith.truncf %76 : vector<256x8xf32> to vector<256x8xbf16>
    %cst_72 = arith.constant dense<0.000000e+00> : vector<2x256xf32>
    %80 = tpu.matmul %78, %79, %cst_72 {dimension_numbers = #tpu.dot_dimension_numbers<[1], [1], [0], [0], [0, 0, 1, 0], [], []>} : vector<2x8xbf16>, vector<256x8xbf16>, vector<2x256xf32> -> vector<2x256xf32>
    %81 = arith.addf %74, %80 : vector<2x256xf32>
    %c8_73 = arith.constant 8 : index
    %c6_74 = arith.constant 6 : index
    %c0_75 = arith.constant 0 : index
    %82 = vector.load %arg15[%c8_73, %c6_74, %c0_75] : memref<30x30x8xf32, #tpu.memory_space<vmem>>, vector<16x16x8xf32>
    %83 = vector.shape_cast %82 : vector<16x16x8xf32> to vector<256x8xf32>
    %c6_76 = arith.constant 6 : index
    %c0_77 = arith.constant 0 : index
    %c0_78 = arith.constant 0 : index
    %84 = vector.load %arg12[%c6_76, %c0_77, %c0_78] : memref<36x2x8xbf16, #tpu.memory_space<vmem>>, vector<1x2x8xbf16>
    %85 = vector.shape_cast %84 : vector<1x2x8xbf16> to vector<2x8xbf16>
    %86 = arith.truncf %83 : vector<256x8xf32> to vector<256x8xbf16>
    %cst_79 = arith.constant dense<0.000000e+00> : vector<2x256xf32>
    %87 = tpu.matmul %85, %86, %cst_79 {dimension_numbers = #tpu.dot_dimension_numbers<[1], [1], [0], [0], [0, 0, 1, 0], [], []>} : vector<2x8xbf16>, vector<256x8xbf16>, vector<2x256xf32> -> vector<2x256xf32>
    %88 = arith.addf %81, %87 : vector<2x256xf32>
    %c8_80 = arith.constant 8 : index
    %c7_81 = arith.constant 7 : index
    %c0_82 = arith.constant 0 : index
    %89 = vector.load %arg15[%c8_80, %c7_81, %c0_82] : memref<30x30x8xf32, #tpu.memory_space<vmem>>, vector<16x16x8xf32>
    %90 = vector.shape_cast %89 : vector<16x16x8xf32> to vector<256x8xf32>
    %c7_83 = arith.constant 7 : index
    %c0_84 = arith.constant 0 : index
    %c0_85 = arith.constant 0 : index
    %91 = vector.load %arg12[%c7_83, %c0_84, %c0_85] : memref<36x2x8xbf16, #tpu.memory_space<vmem>>, vector<1x2x8xbf16>
    %92 = vector.shape_cast %91 : vector<1x2x8xbf16> to vector<2x8xbf16>
    %93 = arith.truncf %90 : vector<256x8xf32> to vector<256x8xbf16>
    %cst_86 = arith.constant dense<0.000000e+00> : vector<2x256xf32>
    %94 = tpu.matmul %92, %93, %cst_86 {dimension_numbers = #tpu.dot_dimension_numbers<[1], [1], [0], [0], [0, 0, 1, 0], [], []>} : vector<2x8xbf16>, vector<256x8xbf16>, vector<2x256xf32> -> vector<2x256xf32>
    %95 = arith.addf %88, %94 : vector<2x256xf32>
    %c8_87 = arith.constant 8 : index
    %c8_88 = arith.constant 8 : index
    %c0_89 = arith.constant 0 : index
    %96 = vector.load %arg15[%c8_87, %c8_88, %c0_89] : memref<30x30x8xf32, #tpu.memory_space<vmem>>, vector<16x16x8xf32>
    %97 = vector.shape_cast %96 : vector<16x16x8xf32> to vector<256x8xf32>
    %c8_90 = arith.constant 8 : index
    %c0_91 = arith.constant 0 : index
    %c0_92 = arith.constant 0 : index
    %98 = vector.load %arg12[%c8_90, %c0_91, %c0_92] : memref<36x2x8xbf16, #tpu.memory_space<vmem>>, vector<1x2x8xbf16>
    %99 = vector.shape_cast %98 : vector<1x2x8xbf16> to vector<2x8xbf16>
    %100 = arith.truncf %97 : vector<256x8xf32> to vector<256x8xbf16>
    %cst_93 = arith.constant dense<0.000000e+00> : vector<2x256xf32>
    %101 = tpu.matmul %99, %100, %cst_93 {dimension_numbers = #tpu.dot_dimension_numbers<[1], [1], [0], [0], [0, 0, 1, 0], [], []>} : vector<2x8xbf16>, vector<256x8xbf16>, vector<2x256xf32> -> vector<2x256xf32>
    %102 = arith.addf %95, %101 : vector<2x256xf32>
    %cst_94 = arith.constant 0.000000e+00 : f32
    %103 = vector.broadcast %cst_94 : f32 to vector<2x256xf32>
    %104 = arith.maximumf %102, %103 : vector<2x256xf32>
    %cst_95 = arith.constant 0.000000e+00 : f32
    %105 = vector.broadcast %cst_95 : f32 to vector<2x256xf32>
    %c4_96 = arith.constant 4 : index
    %c4_97 = arith.constant 4 : index
    %c0_98 = arith.constant 0 : index
    %106 = vector.load %arg15[%c4_96, %c4_97, %c0_98] : memref<30x30x8xf32, #tpu.memory_space<vmem>>, vector<16x16x8xf32>
    %107 = vector.shape_cast %106 : vector<16x16x8xf32> to vector<256x8xf32>
    %c9 = arith.constant 9 : index
    %c0_99 = arith.constant 0 : index
    %c0_100 = arith.constant 0 : index
    %108 = vector.load %arg12[%c9, %c0_99, %c0_100] : memref<36x2x8xbf16, #tpu.memory_space<vmem>>, vector<1x2x8xbf16>
    %109 = vector.shape_cast %108 : vector<1x2x8xbf16> to vector<2x8xbf16>
    %110 = arith.truncf %107 : vector<256x8xf32> to vector<256x8xbf16>
    %cst_101 = arith.constant dense<0.000000e+00> : vector<2x256xf32>
    %111 = tpu.matmul %109, %110, %cst_101 {dimension_numbers = #tpu.dot_dimension_numbers<[1], [1], [0], [0], [0, 0, 1, 0], [], []>} : vector<2x8xbf16>, vector<256x8xbf16>, vector<2x256xf32> -> vector<2x256xf32>
    %112 = arith.addf %105, %111 : vector<2x256xf32>
    %c4_102 = arith.constant 4 : index
    %c7_103 = arith.constant 7 : index
    %c0_104 = arith.constant 0 : index
    %113 = vector.load %arg15[%c4_102, %c7_103, %c0_104] : memref<30x30x8xf32, #tpu.memory_space<vmem>>, vector<16x16x8xf32>
    %114 = vector.shape_cast %113 : vector<16x16x8xf32> to vector<256x8xf32>
    %c10 = arith.constant 10 : index
    %c0_105 = arith.constant 0 : index
    %c0_106 = arith.constant 0 : index
    %115 = vector.load %arg12[%c10, %c0_105, %c0_106] : memref<36x2x8xbf16, #tpu.memory_space<vmem>>, vector<1x2x8xbf16>
    %116 = vector.shape_cast %115 : vector<1x2x8xbf16> to vector<2x8xbf16>
    %117 = arith.truncf %114 : vector<256x8xf32> to vector<256x8xbf16>
    %cst_107 = arith.constant dense<0.000000e+00> : vector<2x256xf32>
    %118 = tpu.matmul %116, %117, %cst_107 {dimension_numbers = #tpu.dot_dimension_numbers<[1], [1], [0], [0], [0, 0, 1, 0], [], []>} : vector<2x8xbf16>, vector<256x8xbf16>, vector<2x256xf32> -> vector<2x256xf32>
    %119 = arith.addf %112, %118 : vector<2x256xf32>
    %c4_108 = arith.constant 4 : index
    %c10_109 = arith.constant 10 : index
    %c0_110 = arith.constant 0 : index
    %120 = vector.load %arg15[%c4_108, %c10_109, %c0_110] : memref<30x30x8xf32, #tpu.memory_space<vmem>>, vector<16x16x8xf32>
    %121 = vector.shape_cast %120 : vector<16x16x8xf32> to vector<256x8xf32>
    %c11 = arith.constant 11 : index
    %c0_111 = arith.constant 0 : index
    %c0_112 = arith.constant 0 : index
    %122 = vector.load %arg12[%c11, %c0_111, %c0_112] : memref<36x2x8xbf16, #tpu.memory_space<vmem>>, vector<1x2x8xbf16>
    %123 = vector.shape_cast %122 : vector<1x2x8xbf16> to vector<2x8xbf16>
    %124 = arith.truncf %121 : vector<256x8xf32> to vector<256x8xbf16>
    %cst_113 = arith.constant dense<0.000000e+00> : vector<2x256xf32>
    %125 = tpu.matmul %123, %124, %cst_113 {dimension_numbers = #tpu.dot_dimension_numbers<[1], [1], [0], [0], [0, 0, 1, 0], [], []>} : vector<2x8xbf16>, vector<256x8xbf16>, vector<2x256xf32> -> vector<2x256xf32>
    %126 = arith.addf %119, %125 : vector<2x256xf32>
    %c7_114 = arith.constant 7 : index
    %c4_115 = arith.constant 4 : index
    %c0_116 = arith.constant 0 : index
    %127 = vector.load %arg15[%c7_114, %c4_115, %c0_116] : memref<30x30x8xf32, #tpu.memory_space<vmem>>, vector<16x16x8xf32>
    %128 = vector.shape_cast %127 : vector<16x16x8xf32> to vector<256x8xf32>
    %c12 = arith.constant 12 : index
    %c0_117 = arith.constant 0 : index
    %c0_118 = arith.constant 0 : index
    %129 = vector.load %arg12[%c12, %c0_117, %c0_118] : memref<36x2x8xbf16, #tpu.memory_space<vmem>>, vector<1x2x8xbf16>
    %130 = vector.shape_cast %129 : vector<1x2x8xbf16> to vector<2x8xbf16>
    %131 = arith.truncf %128 : vector<256x8xf32> to vector<256x8xbf16>
    %cst_119 = arith.constant dense<0.000000e+00> : vector<2x256xf32>
    %132 = tpu.matmul %130, %131, %cst_119 {dimension_numbers = #tpu.dot_dimension_numbers<[1], [1], [0], [0], [0, 0, 1, 0], [], []>} : vector<2x8xbf16>, vector<256x8xbf16>, vector<2x256xf32> -> vector<2x256xf32>
    %133 = arith.addf %126, %132 : vector<2x256xf32>
    %c7_120 = arith.constant 7 : index
    %c7_121 = arith.constant 7 : index
    %c0_122 = arith.constant 0 : index
    %134 = vector.load %arg15[%c7_120, %c7_121, %c0_122] : memref<30x30x8xf32, #tpu.memory_space<vmem>>, vector<16x16x8xf32>
    %135 = vector.shape_cast %134 : vector<16x16x8xf32> to vector<256x8xf32>
    %c13 = arith.constant 13 : index
    %c0_123 = arith.constant 0 : index
    %c0_124 = arith.constant 0 : index
    %136 = vector.load %arg12[%c13, %c0_123, %c0_124] : memref<36x2x8xbf16, #tpu.memory_space<vmem>>, vector<1x2x8xbf16>
    %137 = vector.shape_cast %136 : vector<1x2x8xbf16> to vector<2x8xbf16>
    %138 = arith.truncf %135 : vector<256x8xf32> to vector<256x8xbf16>
    %cst_125 = arith.constant dense<0.000000e+00> : vector<2x256xf32>
    %139 = tpu.matmul %137, %138, %cst_125 {dimension_numbers = #tpu.dot_dimension_numbers<[1], [1], [0], [0], [0, 0, 1, 0], [], []>} : vector<2x8xbf16>, vector<256x8xbf16>, vector<2x256xf32> -> vector<2x256xf32>
    %140 = arith.addf %133, %139 : vector<2x256xf32>
    %c7_126 = arith.constant 7 : index
    %c10_127 = arith.constant 10 : index
    %c0_128 = arith.constant 0 : index
    %141 = vector.load %arg15[%c7_126, %c10_127, %c0_128] : memref<30x30x8xf32, #tpu.memory_space<vmem>>, vector<16x16x8xf32>
    %142 = vector.shape_cast %141 : vector<16x16x8xf32> to vector<256x8xf32>
    %c14 = arith.constant 14 : index
    %c0_129 = arith.constant 0 : index
    %c0_130 = arith.constant 0 : index
    %143 = vector.load %arg12[%c14, %c0_129, %c0_130] : memref<36x2x8xbf16, #tpu.memory_space<vmem>>, vector<1x2x8xbf16>
    %144 = vector.shape_cast %143 : vector<1x2x8xbf16> to vector<2x8xbf16>
    %145 = arith.truncf %142 : vector<256x8xf32> to vector<256x8xbf16>
    %cst_131 = arith.constant dense<0.000000e+00> : vector<2x256xf32>
    %146 = tpu.matmul %144, %145, %cst_131 {dimension_numbers = #tpu.dot_dimension_numbers<[1], [1], [0], [0], [0, 0, 1, 0], [], []>} : vector<2x8xbf16>, vector<256x8xbf16>, vector<2x256xf32> -> vector<2x256xf32>
    %147 = arith.addf %140, %146 : vector<2x256xf32>
    %c10_132 = arith.constant 10 : index
    %c4_133 = arith.constant 4 : index
    %c0_134 = arith.constant 0 : index
    %148 = vector.load %arg15[%c10_132, %c4_133, %c0_134] : memref<30x30x8xf32, #tpu.memory_space<vmem>>, vector<16x16x8xf32>
    %149 = vector.shape_cast %148 : vector<16x16x8xf32> to vector<256x8xf32>
    %c15 = arith.constant 15 : index
    %c0_135 = arith.constant 0 : index
    %c0_136 = arith.constant 0 : index
    %150 = vector.load %arg12[%c15, %c0_135, %c0_136] : memref<36x2x8xbf16, #tpu.memory_space<vmem>>, vector<1x2x8xbf16>
    %151 = vector.shape_cast %150 : vector<1x2x8xbf16> to vector<2x8xbf16>
    %152 = arith.truncf %149 : vector<256x8xf32> to vector<256x8xbf16>
    %cst_137 = arith.constant dense<0.000000e+00> : vector<2x256xf32>
    %153 = tpu.matmul %151, %152, %cst_137 {dimension_numbers = #tpu.dot_dimension_numbers<[1], [1], [0], [0], [0, 0, 1, 0], [], []>} : vector<2x8xbf16>, vector<256x8xbf16>, vector<2x256xf32> -> vector<2x256xf32>
    %154 = arith.addf %147, %153 : vector<2x256xf32>
    %c10_138 = arith.constant 10 : index
    %c7_139 = arith.constant 7 : index
    %c0_140 = arith.constant 0 : index
    %155 = vector.load %arg15[%c10_138, %c7_139, %c0_140] : memref<30x30x8xf32, #tpu.memory_space<vmem>>, vector<16x16x8xf32>
    %156 = vector.shape_cast %155 : vector<16x16x8xf32> to vector<256x8xf32>
    %c16 = arith.constant 16 : index
    %c0_141 = arith.constant 0 : index
    %c0_142 = arith.constant 0 : index
    %157 = vector.load %arg12[%c16, %c0_141, %c0_142] : memref<36x2x8xbf16, #tpu.memory_space<vmem>>, vector<1x2x8xbf16>
    %158 = vector.shape_cast %157 : vector<1x2x8xbf16> to vector<2x8xbf16>
    %159 = arith.truncf %156 : vector<256x8xf32> to vector<256x8xbf16>
    %cst_143 = arith.constant dense<0.000000e+00> : vector<2x256xf32>
    %160 = tpu.matmul %158, %159, %cst_143 {dimension_numbers = #tpu.dot_dimension_numbers<[1], [1], [0], [0], [0, 0, 1, 0], [], []>} : vector<2x8xbf16>, vector<256x8xbf16>, vector<2x256xf32> -> vector<2x256xf32>
    %161 = arith.addf %154, %160 : vector<2x256xf32>
    %c10_144 = arith.constant 10 : index
    %c10_145 = arith.constant 10 : index
    %c0_146 = arith.constant 0 : index
    %162 = vector.load %arg15[%c10_144, %c10_145, %c0_146] : memref<30x30x8xf32, #tpu.memory_space<vmem>>, vector<16x16x8xf32>
    %163 = vector.shape_cast %162 : vector<16x16x8xf32> to vector<256x8xf32>
    %c17 = arith.constant 17 : index
    %c0_147 = arith.constant 0 : index
    %c0_148 = arith.constant 0 : index
    %164 = vector.load %arg12[%c17, %c0_147, %c0_148] : memref<36x2x8xbf16, #tpu.memory_space<vmem>>, vector<1x2x8xbf16>
    %165 = vector.shape_cast %164 : vector<1x2x8xbf16> to vector<2x8xbf16>
    %166 = arith.truncf %163 : vector<256x8xf32> to vector<256x8xbf16>
    %cst_149 = arith.constant dense<0.000000e+00> : vector<2x256xf32>
    %167 = tpu.matmul %165, %166, %cst_149 {dimension_numbers = #tpu.dot_dimension_numbers<[1], [1], [0], [0], [0, 0, 1, 0], [], []>} : vector<2x8xbf16>, vector<256x8xbf16>, vector<2x256xf32> -> vector<2x256xf32>
    %168 = arith.addf %161, %167 : vector<2x256xf32>
    %cst_150 = arith.constant 0.000000e+00 : f32
    %169 = vector.broadcast %cst_150 : f32 to vector<2x256xf32>
    %170 = arith.maximumf %168, %169 : vector<2x256xf32>
    %cst_151 = arith.constant 0.000000e+00 : f32
    %171 = vector.broadcast %cst_151 : f32 to vector<2x256xf32>
    %c2_152 = arith.constant 2 : index
    %c2_153 = arith.constant 2 : index
    %c0_154 = arith.constant 0 : index
    %172 = vector.load %arg15[%c2_152, %c2_153, %c0_154] : memref<30x30x8xf32, #tpu.memory_space<vmem>>, vector<16x16x8xf32>
    %173 = vector.shape_cast %172 : vector<16x16x8xf32> to vector<256x8xf32>
    %c18 = arith.constant 18 : index
    %c0_155 = arith.constant 0 : index
    %c0_156 = arith.constant 0 : index
    %174 = vector.load %arg12[%c18, %c0_155, %c0_156] : memref<36x2x8xbf16, #tpu.memory_space<vmem>>, vector<1x2x8xbf16>
    %175 = vector.shape_cast %174 : vector<1x2x8xbf16> to vector<2x8xbf16>
    %176 = arith.truncf %173 : vector<256x8xf32> to vector<256x8xbf16>
    %cst_157 = arith.constant dense<0.000000e+00> : vector<2x256xf32>
    %177 = tpu.matmul %175, %176, %cst_157 {dimension_numbers = #tpu.dot_dimension_numbers<[1], [1], [0], [0], [0, 0, 1, 0], [], []>} : vector<2x8xbf16>, vector<256x8xbf16>, vector<2x256xf32> -> vector<2x256xf32>
    %178 = arith.addf %171, %177 : vector<2x256xf32>
    %c2_158 = arith.constant 2 : index
    %c7_159 = arith.constant 7 : index
    %c0_160 = arith.constant 0 : index
    %179 = vector.load %arg15[%c2_158, %c7_159, %c0_160] : memref<30x30x8xf32, #tpu.memory_space<vmem>>, vector<16x16x8xf32>
    %180 = vector.shape_cast %179 : vector<16x16x8xf32> to vector<256x8xf32>
    %c19 = arith.constant 19 : index
    %c0_161 = arith.constant 0 : index
    %c0_162 = arith.constant 0 : index
    %181 = vector.load %arg12[%c19, %c0_161, %c0_162] : memref<36x2x8xbf16, #tpu.memory_space<vmem>>, vector<1x2x8xbf16>
    %182 = vector.shape_cast %181 : vector<1x2x8xbf16> to vector<2x8xbf16>
    %183 = arith.truncf %180 : vector<256x8xf32> to vector<256x8xbf16>
    %cst_163 = arith.constant dense<0.000000e+00> : vector<2x256xf32>
    %184 = tpu.matmul %182, %183, %cst_163 {dimension_numbers = #tpu.dot_dimension_numbers<[1], [1], [0], [0], [0, 0, 1, 0], [], []>} : vector<2x8xbf16>, vector<256x8xbf16>, vector<2x256xf32> -> vector<2x256xf32>
    %185 = arith.addf %178, %184 : vector<2x256xf32>
    %c2_164 = arith.constant 2 : index
    %c12_165 = arith.constant 12 : index
    %c0_166 = arith.constant 0 : index
    %186 = vector.load %arg15[%c2_164, %c12_165, %c0_166] : memref<30x30x8xf32, #tpu.memory_space<vmem>>, vector<16x16x8xf32>
    %187 = vector.shape_cast %186 : vector<16x16x8xf32> to vector<256x8xf32>
    %c20 = arith.constant 20 : index
    %c0_167 = arith.constant 0 : index
    %c0_168 = arith.constant 0 : index
    %188 = vector.load %arg12[%c20, %c0_167, %c0_168] : memref<36x2x8xbf16, #tpu.memory_space<vmem>>, vector<1x2x8xbf16>
    %189 = vector.shape_cast %188 : vector<1x2x8xbf16> to vector<2x8xbf16>
    %190 = arith.truncf %187 : vector<256x8xf32> to vector<256x8xbf16>
    %cst_169 = arith.constant dense<0.000000e+00> : vector<2x256xf32>
    %191 = tpu.matmul %189, %190, %cst_169 {dimension_numbers = #tpu.dot_dimension_numbers<[1], [1], [0], [0], [0, 0, 1, 0], [], []>} : vector<2x8xbf16>, vector<256x8xbf16>, vector<2x256xf32> -> vector<2x256xf32>
    %192 = arith.addf %185, %191 : vector<2x256xf32>
    %c7_170 = arith.constant 7 : index
    %c2_171 = arith.constant 2 : index
    %c0_172 = arith.constant 0 : index
    %193 = vector.load %arg15[%c7_170, %c2_171, %c0_172] : memref<30x30x8xf32, #tpu.memory_space<vmem>>, vector<16x16x8xf32>
    %194 = vector.shape_cast %193 : vector<16x16x8xf32> to vector<256x8xf32>
    %c21 = arith.constant 21 : index
    %c0_173 = arith.constant 0 : index
    %c0_174 = arith.constant 0 : index
    %195 = vector.load %arg12[%c21, %c0_173, %c0_174] : memref<36x2x8xbf16, #tpu.memory_space<vmem>>, vector<1x2x8xbf16>
    %196 = vector.shape_cast %195 : vector<1x2x8xbf16> to vector<2x8xbf16>
    %197 = arith.truncf %194 : vector<256x8xf32> to vector<256x8xbf16>
    %cst_175 = arith.constant dense<0.000000e+00> : vector<2x256xf32>
    %198 = tpu.matmul %196, %197, %cst_175 {dimension_numbers = #tpu.dot_dimension_numbers<[1], [1], [0], [0], [0, 0, 1, 0], [], []>} : vector<2x8xbf16>, vector<256x8xbf16>, vector<2x256xf32> -> vector<2x256xf32>
    %199 = arith.addf %192, %198 : vector<2x256xf32>
    %c7_176 = arith.constant 7 : index
    %c7_177 = arith.constant 7 : index
    %c0_178 = arith.constant 0 : index
    %200 = vector.load %arg15[%c7_176, %c7_177, %c0_178] : memref<30x30x8xf32, #tpu.memory_space<vmem>>, vector<16x16x8xf32>
    %201 = vector.shape_cast %200 : vector<16x16x8xf32> to vector<256x8xf32>
    %c22 = arith.constant 22 : index
    %c0_179 = arith.constant 0 : index
    %c0_180 = arith.constant 0 : index
    %202 = vector.load %arg12[%c22, %c0_179, %c0_180] : memref<36x2x8xbf16, #tpu.memory_space<vmem>>, vector<1x2x8xbf16>
    %203 = vector.shape_cast %202 : vector<1x2x8xbf16> to vector<2x8xbf16>
    %204 = arith.truncf %201 : vector<256x8xf32> to vector<256x8xbf16>
    %cst_181 = arith.constant dense<0.000000e+00> : vector<2x256xf32>
    %205 = tpu.matmul %203, %204, %cst_181 {dimension_numbers = #tpu.dot_dimension_numbers<[1], [1], [0], [0], [0, 0, 1, 0], [], []>} : vector<2x8xbf16>, vector<256x8xbf16>, vector<2x256xf32> -> vector<2x256xf32>
    %206 = arith.addf %199, %205 : vector<2x256xf32>
    %c7_182 = arith.constant 7 : index
    %c12_183 = arith.constant 12 : index
    %c0_184 = arith.constant 0 : index
    %207 = vector.load %arg15[%c7_182, %c12_183, %c0_184] : memref<30x30x8xf32, #tpu.memory_space<vmem>>, vector<16x16x8xf32>
    %208 = vector.shape_cast %207 : vector<16x16x8xf32> to vector<256x8xf32>
    %c23 = arith.constant 23 : index
    %c0_185 = arith.constant 0 : index
    %c0_186 = arith.constant 0 : index
    %209 = vector.load %arg12[%c23, %c0_185, %c0_186] : memref<36x2x8xbf16, #tpu.memory_space<vmem>>, vector<1x2x8xbf16>
    %210 = vector.shape_cast %209 : vector<1x2x8xbf16> to vector<2x8xbf16>
    %211 = arith.truncf %208 : vector<256x8xf32> to vector<256x8xbf16>
    %cst_187 = arith.constant dense<0.000000e+00> : vector<2x256xf32>
    %212 = tpu.matmul %210, %211, %cst_187 {dimension_numbers = #tpu.dot_dimension_numbers<[1], [1], [0], [0], [0, 0, 1, 0], [], []>} : vector<2x8xbf16>, vector<256x8xbf16>, vector<2x256xf32> -> vector<2x256xf32>
    %213 = arith.addf %206, %212 : vector<2x256xf32>
    %c12_188 = arith.constant 12 : index
    %c2_189 = arith.constant 2 : index
    %c0_190 = arith.constant 0 : index
    %214 = vector.load %arg15[%c12_188, %c2_189, %c0_190] : memref<30x30x8xf32, #tpu.memory_space<vmem>>, vector<16x16x8xf32>
    %215 = vector.shape_cast %214 : vector<16x16x8xf32> to vector<256x8xf32>
    %c24 = arith.constant 24 : index
    %c0_191 = arith.constant 0 : index
    %c0_192 = arith.constant 0 : index
    %216 = vector.load %arg12[%c24, %c0_191, %c0_192] : memref<36x2x8xbf16, #tpu.memory_space<vmem>>, vector<1x2x8xbf16>
    %217 = vector.shape_cast %216 : vector<1x2x8xbf16> to vector<2x8xbf16>
    %218 = arith.truncf %215 : vector<256x8xf32> to vector<256x8xbf16>
    %cst_193 = arith.constant dense<0.000000e+00> : vector<2x256xf32>
    %219 = tpu.matmul %217, %218, %cst_193 {dimension_numbers = #tpu.dot_dimension_numbers<[1], [1], [0], [0], [0, 0, 1, 0], [], []>} : vector<2x8xbf16>, vector<256x8xbf16>, vector<2x256xf32> -> vector<2x256xf32>
    %220 = arith.addf %213, %219 : vector<2x256xf32>
    %c12_194 = arith.constant 12 : index
    %c7_195 = arith.constant 7 : index
    %c0_196 = arith.constant 0 : index
    %221 = vector.load %arg15[%c12_194, %c7_195, %c0_196] : memref<30x30x8xf32, #tpu.memory_space<vmem>>, vector<16x16x8xf32>
    %222 = vector.shape_cast %221 : vector<16x16x8xf32> to vector<256x8xf32>
    %c25 = arith.constant 25 : index
    %c0_197 = arith.constant 0 : index
    %c0_198 = arith.constant 0 : index
    %223 = vector.load %arg12[%c25, %c0_197, %c0_198] : memref<36x2x8xbf16, #tpu.memory_space<vmem>>, vector<1x2x8xbf16>
    %224 = vector.shape_cast %223 : vector<1x2x8xbf16> to vector<2x8xbf16>
    %225 = arith.truncf %222 : vector<256x8xf32> to vector<256x8xbf16>
    %cst_199 = arith.constant dense<0.000000e+00> : vector<2x256xf32>
    %226 = tpu.matmul %224, %225, %cst_199 {dimension_numbers = #tpu.dot_dimension_numbers<[1], [1], [0], [0], [0, 0, 1, 0], [], []>} : vector<2x8xbf16>, vector<256x8xbf16>, vector<2x256xf32> -> vector<2x256xf32>
    %227 = arith.addf %220, %226 : vector<2x256xf32>
    %c12_200 = arith.constant 12 : index
    %c12_201 = arith.constant 12 : index
    %c0_202 = arith.constant 0 : index
    %228 = vector.load %arg15[%c12_200, %c12_201, %c0_202] : memref<30x30x8xf32, #tpu.memory_space<vmem>>, vector<16x16x8xf32>
    %229 = vector.shape_cast %228 : vector<16x16x8xf32> to vector<256x8xf32>
    %c26 = arith.constant 26 : index
    %c0_203 = arith.constant 0 : index
    %c0_204 = arith.constant 0 : index
    %230 = vector.load %arg12[%c26, %c0_203, %c0_204] : memref<36x2x8xbf16, #tpu.memory_space<vmem>>, vector<1x2x8xbf16>
    %231 = vector.shape_cast %230 : vector<1x2x8xbf16> to vector<2x8xbf16>
    %232 = arith.truncf %229 : vector<256x8xf32> to vector<256x8xbf16>
    %cst_205 = arith.constant dense<0.000000e+00> : vector<2x256xf32>
    %233 = tpu.matmul %231, %232, %cst_205 {dimension_numbers = #tpu.dot_dimension_numbers<[1], [1], [0], [0], [0, 0, 1, 0], [], []>} : vector<2x8xbf16>, vector<256x8xbf16>, vector<2x256xf32> -> vector<2x256xf32>
    %234 = arith.addf %227, %233 : vector<2x256xf32>
    %cst_206 = arith.constant 0.000000e+00 : f32
    %235 = vector.broadcast %cst_206 : f32 to vector<2x256xf32>
    %236 = arith.maximumf %234, %235 : vector<2x256xf32>
    %cst_207 = arith.constant 0.000000e+00 : f32
    %237 = vector.broadcast %cst_207 : f32 to vector<2x256xf32>
    %c0_208 = arith.constant 0 : index
    %c0_209 = arith.constant 0 : index
    %c0_210 = arith.constant 0 : index
    %238 = vector.load %arg15[%c0_208, %c0_209, %c0_210] : memref<30x30x8xf32, #tpu.memory_space<vmem>>, vector<16x16x8xf32>
    %239 = vector.shape_cast %238 : vector<16x16x8xf32> to vector<256x8xf32>
    %c27 = arith.constant 27 : index
    %c0_211 = arith.constant 0 : index
    %c0_212 = arith.constant 0 : index
    %240 = vector.load %arg12[%c27, %c0_211, %c0_212] : memref<36x2x8xbf16, #tpu.memory_space<vmem>>, vector<1x2x8xbf16>
    %241 = vector.shape_cast %240 : vector<1x2x8xbf16> to vector<2x8xbf16>
    %242 = arith.truncf %239 : vector<256x8xf32> to vector<256x8xbf16>
    %cst_213 = arith.constant dense<0.000000e+00> : vector<2x256xf32>
    %243 = tpu.matmul %241, %242, %cst_213 {dimension_numbers = #tpu.dot_dimension_numbers<[1], [1], [0], [0], [0, 0, 1, 0], [], []>} : vector<2x8xbf16>, vector<256x8xbf16>, vector<2x256xf32> -> vector<2x256xf32>
    %244 = arith.addf %237, %243 : vector<2x256xf32>
    %c0_214 = arith.constant 0 : index
    %c7_215 = arith.constant 7 : index
    %c0_216 = arith.constant 0 : index
    %245 = vector.load %arg15[%c0_214, %c7_215, %c0_216] : memref<30x30x8xf32, #tpu.memory_space<vmem>>, vector<16x16x8xf32>
    %246 = vector.shape_cast %245 : vector<16x16x8xf32> to vector<256x8xf32>
    %c28 = arith.constant 28 : index
    %c0_217 = arith.constant 0 : index
    %c0_218 = arith.constant 0 : index
    %247 = vector.load %arg12[%c28, %c0_217, %c0_218] : memref<36x2x8xbf16, #tpu.memory_space<vmem>>, vector<1x2x8xbf16>
    %248 = vector.shape_cast %247 : vector<1x2x8xbf16> to vector<2x8xbf16>
    %249 = arith.truncf %246 : vector<256x8xf32> to vector<256x8xbf16>
    %cst_219 = arith.constant dense<0.000000e+00> : vector<2x256xf32>
    %250 = tpu.matmul %248, %249, %cst_219 {dimension_numbers = #tpu.dot_dimension_numbers<[1], [1], [0], [0], [0, 0, 1, 0], [], []>} : vector<2x8xbf16>, vector<256x8xbf16>, vector<2x256xf32> -> vector<2x256xf32>
    %251 = arith.addf %244, %250 : vector<2x256xf32>
    %c0_220 = arith.constant 0 : index
    %c14_221 = arith.constant 14 : index
    %c0_222 = arith.constant 0 : index
    %252 = vector.load %arg15[%c0_220, %c14_221, %c0_222] : memref<30x30x8xf32, #tpu.memory_space<vmem>>, vector<16x16x8xf32>
    %253 = vector.shape_cast %252 : vector<16x16x8xf32> to vector<256x8xf32>
    %c29 = arith.constant 29 : index
    %c0_223 = arith.constant 0 : index
    %c0_224 = arith.constant 0 : index
    %254 = vector.load %arg12[%c29, %c0_223, %c0_224] : memref<36x2x8xbf16, #tpu.memory_space<vmem>>, vector<1x2x8xbf16>
    %255 = vector.shape_cast %254 : vector<1x2x8xbf16> to vector<2x8xbf16>
    %256 = arith.truncf %253 : vector<256x8xf32> to vector<256x8xbf16>
    %cst_225 = arith.constant dense<0.000000e+00> : vector<2x256xf32>
    %257 = tpu.matmul %255, %256, %cst_225 {dimension_numbers = #tpu.dot_dimension_numbers<[1], [1], [0], [0], [0, 0, 1, 0], [], []>} : vector<2x8xbf16>, vector<256x8xbf16>, vector<2x256xf32> -> vector<2x256xf32>
    %258 = arith.addf %251, %257 : vector<2x256xf32>
    %c7_226 = arith.constant 7 : index
    %c0_227 = arith.constant 0 : index
    %c0_228 = arith.constant 0 : index
    %259 = vector.load %arg15[%c7_226, %c0_227, %c0_228] : memref<30x30x8xf32, #tpu.memory_space<vmem>>, vector<16x16x8xf32>
    %260 = vector.shape_cast %259 : vector<16x16x8xf32> to vector<256x8xf32>
    %c30 = arith.constant 30 : index
    %c0_229 = arith.constant 0 : index
    %c0_230 = arith.constant 0 : index
    %261 = vector.load %arg12[%c30, %c0_229, %c0_230] : memref<36x2x8xbf16, #tpu.memory_space<vmem>>, vector<1x2x8xbf16>
    %262 = vector.shape_cast %261 : vector<1x2x8xbf16> to vector<2x8xbf16>
    %263 = arith.truncf %260 : vector<256x8xf32> to vector<256x8xbf16>
    %cst_231 = arith.constant dense<0.000000e+00> : vector<2x256xf32>
    %264 = tpu.matmul %262, %263, %cst_231 {dimension_numbers = #tpu.dot_dimension_numbers<[1], [1], [0], [0], [0, 0, 1, 0], [], []>} : vector<2x8xbf16>, vector<256x8xbf16>, vector<2x256xf32> -> vector<2x256xf32>
    %265 = arith.addf %258, %264 : vector<2x256xf32>
    %c7_232 = arith.constant 7 : index
    %c7_233 = arith.constant 7 : index
    %c0_234 = arith.constant 0 : index
    %266 = vector.load %arg15[%c7_232, %c7_233, %c0_234] : memref<30x30x8xf32, #tpu.memory_space<vmem>>, vector<16x16x8xf32>
    %267 = vector.shape_cast %266 : vector<16x16x8xf32> to vector<256x8xf32>
    %c31 = arith.constant 31 : index
    %c0_235 = arith.constant 0 : index
    %c0_236 = arith.constant 0 : index
    %268 = vector.load %arg12[%c31, %c0_235, %c0_236] : memref<36x2x8xbf16, #tpu.memory_space<vmem>>, vector<1x2x8xbf16>
    %269 = vector.shape_cast %268 : vector<1x2x8xbf16> to vector<2x8xbf16>
    %270 = arith.truncf %267 : vector<256x8xf32> to vector<256x8xbf16>
    %cst_237 = arith.constant dense<0.000000e+00> : vector<2x256xf32>
    %271 = tpu.matmul %269, %270, %cst_237 {dimension_numbers = #tpu.dot_dimension_numbers<[1], [1], [0], [0], [0, 0, 1, 0], [], []>} : vector<2x8xbf16>, vector<256x8xbf16>, vector<2x256xf32> -> vector<2x256xf32>
    %272 = arith.addf %265, %271 : vector<2x256xf32>
    %c7_238 = arith.constant 7 : index
    %c14_239 = arith.constant 14 : index
    %c0_240 = arith.constant 0 : index
    %273 = vector.load %arg15[%c7_238, %c14_239, %c0_240] : memref<30x30x8xf32, #tpu.memory_space<vmem>>, vector<16x16x8xf32>
    %274 = vector.shape_cast %273 : vector<16x16x8xf32> to vector<256x8xf32>
    %c32 = arith.constant 32 : index
    %c0_241 = arith.constant 0 : index
    %c0_242 = arith.constant 0 : index
    %275 = vector.load %arg12[%c32, %c0_241, %c0_242] : memref<36x2x8xbf16, #tpu.memory_space<vmem>>, vector<1x2x8xbf16>
    %276 = vector.shape_cast %275 : vector<1x2x8xbf16> to vector<2x8xbf16>
    %277 = arith.truncf %274 : vector<256x8xf32> to vector<256x8xbf16>
    %cst_243 = arith.constant dense<0.000000e+00> : vector<2x256xf32>
    %278 = tpu.matmul %276, %277, %cst_243 {dimension_numbers = #tpu.dot_dimension_numbers<[1], [1], [0], [0], [0, 0, 1, 0], [], []>} : vector<2x8xbf16>, vector<256x8xbf16>, vector<2x256xf32> -> vector<2x256xf32>
    %279 = arith.addf %272, %278 : vector<2x256xf32>
    %c14_244 = arith.constant 14 : index
    %c0_245 = arith.constant 0 : index
    %c0_246 = arith.constant 0 : index
    %280 = vector.load %arg15[%c14_244, %c0_245, %c0_246] : memref<30x30x8xf32, #tpu.memory_space<vmem>>, vector<16x16x8xf32>
    %281 = vector.shape_cast %280 : vector<16x16x8xf32> to vector<256x8xf32>
    %c33 = arith.constant 33 : index
    %c0_247 = arith.constant 0 : index
    %c0_248 = arith.constant 0 : index
    %282 = vector.load %arg12[%c33, %c0_247, %c0_248] : memref<36x2x8xbf16, #tpu.memory_space<vmem>>, vector<1x2x8xbf16>
    %283 = vector.shape_cast %282 : vector<1x2x8xbf16> to vector<2x8xbf16>
    %284 = arith.truncf %281 : vector<256x8xf32> to vector<256x8xbf16>
    %cst_249 = arith.constant dense<0.000000e+00> : vector<2x256xf32>
    %285 = tpu.matmul %283, %284, %cst_249 {dimension_numbers = #tpu.dot_dimension_numbers<[1], [1], [0], [0], [0, 0, 1, 0], [], []>} : vector<2x8xbf16>, vector<256x8xbf16>, vector<2x256xf32> -> vector<2x256xf32>
    %286 = arith.addf %279, %285 : vector<2x256xf32>
    %c14_250 = arith.constant 14 : index
    %c7_251 = arith.constant 7 : index
    %c0_252 = arith.constant 0 : index
    %287 = vector.load %arg15[%c14_250, %c7_251, %c0_252] : memref<30x30x8xf32, #tpu.memory_space<vmem>>, vector<16x16x8xf32>
    %288 = vector.shape_cast %287 : vector<16x16x8xf32> to vector<256x8xf32>
    %c34 = arith.constant 34 : index
    %c0_253 = arith.constant 0 : index
    %c0_254 = arith.constant 0 : index
    %289 = vector.load %arg12[%c34, %c0_253, %c0_254] : memref<36x2x8xbf16, #tpu.memory_space<vmem>>, vector<1x2x8xbf16>
    %290 = vector.shape_cast %289 : vector<1x2x8xbf16> to vector<2x8xbf16>
    %291 = arith.truncf %288 : vector<256x8xf32> to vector<256x8xbf16>
    %cst_255 = arith.constant dense<0.000000e+00> : vector<2x256xf32>
    %292 = tpu.matmul %290, %291, %cst_255 {dimension_numbers = #tpu.dot_dimension_numbers<[1], [1], [0], [0], [0, 0, 1, 0], [], []>} : vector<2x8xbf16>, vector<256x8xbf16>, vector<2x256xf32> -> vector<2x256xf32>
    %293 = arith.addf %286, %292 : vector<2x256xf32>
    %c14_256 = arith.constant 14 : index
    %c14_257 = arith.constant 14 : index
    %c0_258 = arith.constant 0 : index
    %294 = vector.load %arg15[%c14_256, %c14_257, %c0_258] : memref<30x30x8xf32, #tpu.memory_space<vmem>>, vector<16x16x8xf32>
    %295 = vector.shape_cast %294 : vector<16x16x8xf32> to vector<256x8xf32>
    %c35 = arith.constant 35 : index
    %c0_259 = arith.constant 0 : index
    %c0_260 = arith.constant 0 : index
    %296 = vector.load %arg12[%c35, %c0_259, %c0_260] : memref<36x2x8xbf16, #tpu.memory_space<vmem>>, vector<1x2x8xbf16>
    %297 = vector.shape_cast %296 : vector<1x2x8xbf16> to vector<2x8xbf16>
    %298 = arith.truncf %295 : vector<256x8xf32> to vector<256x8xbf16>
    %cst_261 = arith.constant dense<0.000000e+00> : vector<2x256xf32>
    %299 = tpu.matmul %297, %298, %cst_261 {dimension_numbers = #tpu.dot_dimension_numbers<[1], [1], [0], [0], [0, 0, 1, 0], [], []>} : vector<2x8xbf16>, vector<256x8xbf16>, vector<2x256xf32> -> vector<2x256xf32>
    %300 = arith.addf %293, %299 : vector<2x256xf32>
    %cst_262 = arith.constant 0.000000e+00 : f32
    %301 = vector.broadcast %cst_262 : f32 to vector<2x256xf32>
    %302 = arith.maximumf %300, %301 : vector<2x256xf32>
    %303 = tpu.concatenate %104, %170, %236, %302 in 0 : vector<2x256xf32>, vector<2x256xf32>, vector<2x256xf32>, vector<2x256xf32> -> vector<8x256xf32>
    %c0_263 = arith.constant 0 : index
    %c0_264 = arith.constant 0 : index
    %c0_265 = arith.constant 0 : index
    %304 = vector.load %arg13[%c0_263, %c0_264, %c0_265] : memref<1x8x256xf32, #tpu.memory_space<vmem>>, vector<1x8x256xf32>
    %305 = vector.shape_cast %304 : vector<1x8x256xf32> to vector<8x256xf32>
    %306 = vector.shape_cast %303 : vector<8x256xf32> to vector<1x8x256xf32>
    tpu.vector_store %arg13[%c0_263, %c0_264, %c0_265], %306 {strides = array<i32>} : memref<1x8x256xf32, #tpu.memory_space<vmem>>, vector<1x8x256xf32>,
    %cst_266 = arith.constant 5.000000e-01 : f32
    %307 = vector.broadcast %cst_266 : f32 to vector<8x256xf32>
    %308 = arith.mulf %307, %303 : vector<8x256xf32>
    %309 = math.tanh %308 : vector<8x256xf32>
    %cst_267 = arith.constant 1.000000e+00 : f32
    %310 = vector.broadcast %cst_267 : f32 to vector<8x256xf32>
    %311 = arith.addf %309, %310 : vector<8x256xf32>
    %cst_268 = arith.constant 5.000000e-01 : f32
    %312 = vector.broadcast %cst_268 : f32 to vector<8x256xf32>
    %313 = arith.mulf %312, %311 : vector<8x256xf32>
    %cst_269 = arith.constant dense<0.000000e+00> : vector<8xf32>
    %314 = vector.multi_reduction <add>, %313, %cst_269 [1] : vector<8x256xf32> to vector<8xf32>
    %315 = vector.shape_cast %314 : vector<8xf32> to vector<8x1xf32>
    %316 = tpu.reciprocal %315 {approx = true} : vector<8x1xf32> -> vector<8x1xf32>
    %317 = vector.broadcast %316 : vector<8x1xf32> to vector<8x256xf32>
    %318 = arith.mulf %313, %317 : vector<8x256xf32>
    %c0_270 = arith.constant 0 : index
    %c0_271 = arith.constant 0 : index
    %c0_272 = arith.constant 0 : index
    %319 = vector.load %arg14[%c0_270, %c0_271, %c0_272] : memref<1x8x256xf32, #tpu.memory_space<vmem>>, vector<1x8x256xf32>
    %320 = vector.shape_cast %319 : vector<1x8x256xf32> to vector<8x256xf32>
    %321 = vector.shape_cast %318 : vector<8x256xf32> to vector<1x8x256xf32>
    tpu.vector_store %arg14[%c0_270, %c0_271, %c0_272], %321 {strides = array<i32>} : memref<1x8x256xf32, #tpu.memory_space<vmem>>, vector<1x8x256xf32>,
    return
  }
  func.func @transform_0(%arg0: i32) -> (i32, i32, i32) {
    %c0_i32 = arith.constant 0 : i32
    %c0_i32_0 = arith.constant 0 : i32
    %c0_i32_1 = arith.constant 0 : i32
    return %arg0, %c0_i32, %c0_i32_0 : i32, i32, i32
  }
  func.func @transform_1(%arg0: i32) -> (i32, i32) {
    %c0_i32 = arith.constant 0 : i32
    %c0_i32_0 = arith.constant 0 : i32
    %c0_i32_1 = arith.constant 0 : i32
    return %c0_i32, %c0_i32_0 : i32, i32
  }
  func.func @transform_2(%arg0: i32) -> (i32, i32) {
    %c0_i32 = arith.constant 0 : i32
    %c0_i32_0 = arith.constant 0 : i32
    %c0_i32_1 = arith.constant 0 : i32
    return %c0_i32, %c0_i32_0 : i32, i32
  }
  func.func @transform_3(%arg0: i32) -> (i32, i32) {
    %c0_i32 = arith.constant 0 : i32
    %c0_i32_0 = arith.constant 0 : i32
    %c0_i32_1 = arith.constant 0 : i32
    return %c0_i32, %c0_i32_0 : i32, i32
  }
  func.func @transform_4(%arg0: i32) -> (i32, i32) {
    %c0_i32 = arith.constant 0 : i32
    %c0_i32_0 = arith.constant 0 : i32
    %c0_i32_1 = arith.constant 0 : i32
    return %c0_i32, %c0_i32_0 : i32, i32
  }
  func.func @transform_5(%arg0: i32) -> (i32, i32) {
    %c0_i32 = arith.constant 0 : i32
    %c0_i32_0 = arith.constant 0 : i32
    %c0_i32_1 = arith.constant 0 : i32
    return %c0_i32, %c0_i32_0 : i32, i32
  }
  func.func @transform_6(%arg0: i32) -> (i32, i32) {
    %c0_i32 = arith.constant 0 : i32
    %c0_i32_0 = arith.constant 0 : i32
    %c0_i32_1 = arith.constant 0 : i32
    return %c0_i32, %c0_i32_0 : i32, i32
  }
  func.func @transform_7(%arg0: i32) -> (i32, i32) {
    %c0_i32 = arith.constant 0 : i32
    %c0_i32_0 = arith.constant 0 : i32
    %c0_i32_1 = arith.constant 0 : i32
    return %c0_i32, %c0_i32_0 : i32, i32
  }
  func.func @transform_8(%arg0: i32) -> (i32, i32) {
    %c0_i32 = arith.constant 0 : i32
    %c0_i32_0 = arith.constant 0 : i32
    %c0_i32_1 = arith.constant 0 : i32
    return %c0_i32, %c0_i32_0 : i32, i32
  }
  func.func @transform_9(%arg0: i32) -> (i32, i32) {
    %c0_i32 = arith.constant 0 : i32
    %c0_i32_0 = arith.constant 0 : i32
    %c0_i32_1 = arith.constant 0 : i32
    return %c0_i32, %c0_i32_0 : i32, i32
  }
  func.func @transform_10(%arg0: i32) -> (i32, i32) {
    %c0_i32 = arith.constant 0 : i32
    %c0_i32_0 = arith.constant 0 : i32
    %c0_i32_1 = arith.constant 0 : i32
    return %c0_i32, %c0_i32_0 : i32, i32
  }
  func.func @transform_11(%arg0: i32) -> (i32, i32, i32) {
    %c0_i32 = arith.constant 0 : i32
    %c0_i32_0 = arith.constant 0 : i32
    %c0_i32_1 = arith.constant 0 : i32
    %c0_i32_2 = arith.constant 0 : i32
    return %c0_i32, %c0_i32_0, %c0_i32_1 : i32, i32, i32
  }
  func.func @transform_12(%arg0: i32) -> (i32, i32, i32) {
    %c0_i32 = arith.constant 0 : i32
    %c0_i32_0 = arith.constant 0 : i32
    %c0_i32_1 = arith.constant 0 : i32
    return %arg0, %c0_i32, %c0_i32_0 : i32, i32, i32
  }
  func.func @transform_13(%arg0: i32) -> (i32, i32, i32) {
    %c0_i32 = arith.constant 0 : i32
    %c0_i32_0 = arith.constant 0 : i32
    %c0_i32_1 = arith.constant 0 : i32
    return %arg0, %c0_i32, %c0_i32_0 : i32, i32, i32
  }
}

</mosaic_0001>

<bundles_post_ra>
// kernel: adr_forward.1
= control target key start
LH: loop header
LB: loop body
LE: loop exit
PB: predicated region body
PF: predicated region fallthrough
CT: control target
= control target key end

     0   :  { %s7528_s25 = smov 0   ;;  %s9577_s0 = inlined_call_operand.vmem [shape: f32[2,8,256], index: 0, kind: input, shape index: {}]   ;;  %s9578_s1 = inlined_call_operand.vmem [shape: f32[8,8], index: 1, kind: input, shape index: {}]   ;;  %s9579_s2 = inlined_call_operand.vmem [shape: f32[8,1], index: 2, kind: input, shape index: {}]   ;;  %s9580_s3 = inlined_call_operand.vmem [shape: f32[16,8], index: 3, kind: input, shape index: {}]   ;;  %s9581_s4 = inlined_call_operand.vmem [shape: f32[16,1], index: 4, kind: input, shape index: {}]   ;;  %s9582_s5 = inlined_call_operand.vmem [shape: f32[8,8], index: 5, kind: input, shape index: {}]   ;;  %s9583_s6 = inlined_call_operand.vmem [shape: f32[8,1], index: 6, kind: input, shape index: {}]   ;;  %s9584_s7 = inlined_call_operand.vmem [shape: f32[8,8], index: 7, kind: input, shape index: {}]   ;;  %s9585_s8 = inlined_call_operand.vmem [shape: f32[1,8], index: 8, kind: input, shape index: {}]   ;;  %s9586_s9 = inlined_call_operand.vmem [shape: f32[16,16], index: 9, kind: input, shape index: {}]   ;;  %s9587_s10 = inlined_call_operand.vmem [shape: f32[8,16], index: 10, kind: input, shape index: {}]   ;;  %s9588_s11 = inlined_call_operand.vmem [shape: bf16[36,2,8], index: 11, kind: input, shape index: {}]   ;;  %s9589_s12 = inlined_call_operand.vmem [shape: f32[2,8,256], index: 12, kind: output, shape index: {0}]   ;;  %s9590_s13 = inlined_call_operand.vmem [shape: f32[2,8,256], index: 13, kind: output, shape index: {1}]  }
   0x1 LB: > { %s6376_s26 = sadd.s32 4294967295, %s7454_s25   ;;  %p6380_p0 = scmp.ge.s32.totalorder %s7454_s25, 1  ;;  %s7454_s25 = sphi %s7528_s25, %s24_s25  }
   0x2   : > { %p390_p1 = scmp.lt.s32.totalorder %s7454_s25, 3 }
   0x4   : > { %p391_p2 = pnand %p6380_p0, %p390_p1 }
   0x5   : > { %p7538_p3 = scmp.lt.s32.totalorder (!%p391_p2), %s6376_s26, 1 }
   0x6   : > { %394 = sbr.rel (%p391_p2) target bundleno = 3134 (0xc3e), region = 68 }
   0xb   : > { %vm464_vm0 = vcmask 64512   ;;  %v7545_v0 = vld [vmem:[%s9579_s2] sm:$0xff]  ;;  %v7456_v1 = vmov 0.0   ;;  %v7457_v2 = vmov 0   ;;  %s9593_s26 = smov (!%p7538_p3, %s6376_s26), 1  ;;  %v542_v8 = vld [vmem:[%s9581_s4 + $0x8] sm:$0xff] }
   0xc   : > { %532 = vmatprep.mubr.f32.mxu0 %v7456_v1  ;;  %1131 = vst.msk [vmem:[#allocation2] sm:$0xff] %vm464_vm0, %v7456_v1  ;;  %1132 = vst.msk [vmem:[#allocation2 + $0x8] sm:$0xff] %vm464_vm0, %v7456_v1  ;;  %7440 = vset.pattern.permute.xlu0 %v7457_v2  ;;  %v637_v3 = vld [vmem:[%s9583_s6] sm:$0xff]  ;;  %s7737_s15 = sshll.u32 %s9593_s26, 4  ;;  %v540_v16 = vld [vmem:[%s9580_s3 + $0x8] sm:$0xff]  ;;  %vm889_vm1 = vcmask 130048  }
   0xd   : > { %1133 = vst.msk [vmem:[#allocation2 + $0x10] sm:$0xff] %vm464_vm0, %v7456_v1  ;;  %1136 = vst.msk [vmem:[#allocation2 + $0x20] sm:$0xff] %vm464_vm0, %v7456_v1  ;;  %461 = vperm.xlu0 %7440, %v7545_v0   ;;  %623 = vmatprep.mubr.f32.mxu1 %v7456_v1  ;;  %s443_s18 = scalar_lea.vmem %s9577_s0, %s7737_s15  ;;  %v457_v6 = vld [vmem:[%s9578_s1] sm:$0xff]  ;;  %v888_v49 = vld [vmem:[%s9586_s9 + $0x8] sm:$0xff]  ;;  %vm1134_vm2 = vcmask 62464   ;;  %vm6261_vm3 = vcmask 1041408   ;;  %s448_s26 = scalar_lea.vmem %s9589_s12, %s7737_s15 }
   0xe   : > { %1137 = vst.msk [vmem:[#allocation2 + $0x28] sm:$0xff] %vm464_vm0, %v7456_v1  ;;  %1138 = vst.msk [vmem:[#allocation2 + $0x30] sm:$0xff] %vm464_vm0, %v7456_v1  ;;  %7441 = vset.pattern.permute.xlu1 %v7457_v2  ;;  %v456_v4 = vld [vmem:[%s443_s18 + $0x8] sm:$0xff]  ;;  %v455_v5 = vld [vmem:[%s443_s18] sm:$0xff]  ;;  %vm6264_vm4 = vcmask 1043456   ;;  %vm6267_vm5 = vcmask 1045504   ;;  %s453_s29 = scalar_lea.vmem %s9590_s13, %s7737_s15 }
   0xf   : > { %1140 = vst.msk [vmem:[#allocation2 + $0x40] sm:$0xff] %vm464_vm0, %v7456_v1  ;;  %1141 = vst.msk [vmem:[#allocation2 + $0x48] sm:$0xff] %vm464_vm0, %v7456_v1  ;;  %498 = vmatprep.subr.mxu0 %v456_v4  ;;  %v541_v7 = vld [vmem:[%s9581_s4] sm:$0xff] }
  0x10   : > { %1142 = vst.msk [vmem:[#allocation2 + $0x50] sm:$0xff] %vm464_vm0, %v7456_v1  ;;  %1144 = vst.msk [vmem:[#allocation2 + $0x60] sm:$0xff] %vm464_vm0, %v7456_v1  ;;  %499 = vmatpush1.msra.mxu0 %v455_v5  ;;  %545 = vperm.xlu1 %7441, %v541_v7   ;;  %v636_v14 = vld [vmem:[%s9582_s5] sm:$0xff] }
  0x11   : > { %1145 = vst.msk [vmem:[#allocation2 + $0x68] sm:$0xff] %vm464_vm0, %v7456_v1  ;;  %1146 = vst.msk [vmem:[#allocation2 + $0x70] sm:$0xff] %vm464_vm0, %v7456_v1  ;;  %640 = vperm.xlu0 %7440, %v637_v3   ;;  %6387 = vmatmul.mubr.msk.f32.vlgmr.msra.gmra.mxu0 %vm464_vm0, %v457_v6  ;;  %v539_v15 = vld [vmem:[%s9580_s3] sm:$0xff] }
  0x12   : > { %1148 = vst.msk [vmem:[#allocation2 + $0x80] sm:$0xff] %vm464_vm0, %v7456_v1  ;;  %1149 = vst.msk [vmem:[#allocation2 + $0x88] sm:$0xff] %vm464_vm0, %v7456_v1  ;;  %710 = vmatprep.mubr.f32.mxu0 %v7456_v1  ;;  %v794_v32 = vld [vmem:[%s9584_s7] sm:$0xff] }
  0x13   : > { %1150 = vst.msk [vmem:[#allocation2 + $0x90] sm:$0xff] %vm464_vm0, %v7456_v1  ;;  %1152 = vst.msk [vmem:[#allocation2 + $0xa0] sm:$0xff] %vm464_vm0, %v7456_v1  ;;  %v887_v39 = vld [vmem:[%s9586_s9] sm:$0xff] }
  0x14   : > { %1153 = vst.msk [vmem:[#allocation2 + $0xa8] sm:$0xff] %vm464_vm0, %v7456_v1  ;;  %1154 = vst.msk [vmem:[#allocation2 + $0xb0] sm:$0xff] %vm464_vm0, %v7456_v1  ;;  %550 = vperm.xlu1 %7441, %v542_v8   ;;  %v6391_v40 = vld [vmem:[%s9585_s8] ss:$0 sm:$0xff]  ;;  %v7865_v61 = vld [vmem:[%s9588_s11 + $0x1] sm:$0x1] }
  0x15   : > { %1156 = vst.msk [vmem:[#allocation2 + $0xc0] sm:$0xff] %vm464_vm0, %v7456_v1  ;;  %1157 = vst.msk [vmem:[#allocation2 + $0xc8] sm:$0xff] %vm464_vm0, %v7456_v1  ;;  %v1054_v56 = vld [vmem:[%s9587_s10] sm:$0xff] }
  0x16   : > { %1158 = vst.msk [vmem:[#allocation2 + $0xd0] sm:$0xff] %vm464_vm0, %v7456_v1  ;;  %1160 = vst.msk [vmem:[#allocation2 + $0xe0] sm:$0xff] %vm464_vm0, %v7456_v1  ;;  %v7870_v62 = vld [vmem:[%s9588_s11] sm:$0x1] }
  0x17   : > { %1161 = vst.msk [vmem:[#allocation2 + $0xe8] sm:$0xff] %vm464_vm0, %v7456_v1  ;;  %1162 = vst.msk [vmem:[#allocation2 + $0xf0] sm:$0xff] %vm464_vm0, %v7456_v1 }
  0x18   : > { %1164 = vst.msk [vmem:[#allocation2 + $0x100] sm:$0xff] %vm464_vm0, %v7456_v1  ;;  %1165 = vst.msk [vmem:[#allocation2 + $0x108] sm:$0xff] %vm464_vm0, %v7456_v1 }
  0x19   : > { %1166 = vst.msk [vmem:[#allocation2 + $0x110] sm:$0xff] %vm464_vm0, %v7456_v1  ;;  %1168 = vst.msk [vmem:[#allocation2 + $0x120] sm:$0xff] %vm464_vm0, %v7456_v1 }
  0x1a   : > { %1169 = vst.msk [vmem:[#allocation2 + $0x128] sm:$0xff] %vm464_vm0, %v7456_v1  ;;  %1170 = vst.msk [vmem:[#allocation2 + $0x130] sm:$0xff] %vm464_vm0, %v7456_v1 }
  0x1b   : > { %1172 = vst.msk [vmem:[#allocation2 + $0x140] sm:$0xff] %vm464_vm0, %v7456_v1  ;;  %1173 = vst.msk [vmem:[#allocation2 + $0x148] sm:$0xff] %vm464_vm0, %v7456_v1 }
  0x1c   : > { %1174 = vst.msk [vmem:[#allocation2 + $0x150] sm:$0xff] %vm464_vm0, %v7456_v1  ;;  %1176 = vst.msk [vmem:[#allocation2 + $0x160] sm:$0xff] %vm464_vm0, %v7456_v1 }
  0x1d   : > { %1177 = vst.msk [vmem:[#allocation2 + $0x168] sm:$0xff] %vm464_vm0, %v7456_v1  ;;  %1178 = vst.msk [vmem:[#allocation2 + $0x170] sm:$0xff] %vm464_vm0, %v7456_v1 }
  0x1e   : > { %1180 = vst.msk [vmem:[#allocation2 + $0x180] sm:$0xff] %vm464_vm0, %v7456_v1  ;;  %1181 = vst.msk [vmem:[#allocation2 + $0x188] sm:$0xff] %vm464_vm0, %v7456_v1 }
  0x1f   : > { %1182 = vst.msk [vmem:[#allocation2 + $0x190] sm:$0xff] %vm464_vm0, %v7456_v1  ;;  %1184 = vst.msk [vmem:[#allocation2 + $0x1a0] sm:$0xff] %vm464_vm0, %v7456_v1 }
  0x20   : > { %1185 = vst.msk [vmem:[#allocation2 + $0x1a8] sm:$0xff] %vm464_vm0, %v7456_v1  ;;  %1186 = vst.msk [vmem:[#allocation2 + $0x1b0] sm:$0xff] %vm464_vm0, %v7456_v1 }
  0x21   : > { %1188 = vst.msk [vmem:[#allocation2 + $0x1c0] sm:$0xff] %vm464_vm0, %v7456_v1  ;;  %1189 = vst.msk [vmem:[#allocation2 + $0x1c8] sm:$0xff] %vm464_vm0, %v7456_v1 }
  0x22   : > { %1190 = vst.msk [vmem:[#allocation2 + $0x1d0] sm:$0xff] %vm464_vm0, %v7456_v1  ;;  %1192 = vst.msk [vmem:[#allocation2 + $0x1e0] sm:$0xff] %vm464_vm0, %v7456_v1 }
  0x23   : > { %1193 = vst.msk [vmem:[#allocation2 + $0x1e8] sm:$0xff] %vm464_vm0, %v7456_v1  ;;  %1194 = vst.msk [vmem:[#allocation2 + $0x1f0] sm:$0xff] %vm464_vm0, %v7456_v1 }
  0x24   : > { %1196 = vst.msk [vmem:[#allocation2 + $0x200] sm:$0xff] %vm464_vm0, %v7456_v1  ;;  %1197 = vst.msk [vmem:[#allocation2 + $0x208] sm:$0xff] %vm464_vm0, %v7456_v1 }
  0x25   : > { %1198 = vst.msk [vmem:[#allocation2 + $0x210] sm:$0xff] %vm464_vm0, %v7456_v1  ;;  %1200 = vst.msk [vmem:[#allocation2 + $0x220] sm:$0xff] %vm464_vm0, %v7456_v1 }
  0x26   : > { %1201 = vst.msk [vmem:[#allocation2 + $0x228] sm:$0xff] %vm464_vm0, %v7456_v1  ;;  %1202 = vst.msk [vmem:[#allocation2 + $0x230] sm:$0xff] %vm464_vm0, %v7456_v1 }
  0x27   : > { %1204 = vst.msk [vmem:[#allocation2 + $0x240] sm:$0xff] %vm464_vm0, %v7456_v1  ;;  %1205 = vst.msk [vmem:[#allocation2 + $0x248] sm:$0xff] %vm464_vm0, %v7456_v1 }
  0x28   : > { %1206 = vst.msk [vmem:[#allocation2 + $0x250] sm:$0xff] %vm464_vm0, %v7456_v1  ;;  %1208 = vst.msk [vmem:[#allocation2 + $0x260] sm:$0xff] %vm464_vm0, %v7456_v1 }
  0x29   : > { %1209 = vst.msk [vmem:[#allocation2 + $0x268] sm:$0xff] %vm464_vm0, %v7456_v1  ;;  %1210 = vst.msk [vmem:[#allocation2 + $0x270] sm:$0xff] %vm464_vm0, %v7456_v1 }
  0x2a   : > { %1212 = vst.msk [vmem:[#allocation2 + $0x280] sm:$0xff] %vm464_vm0, %v7456_v1  ;;  %1213 = vst.msk [vmem:[#allocation2 + $0x288] sm:$0xff] %vm464_vm0, %v7456_v1 }
  0x2b   : > { %1214 = vst.msk [vmem:[#allocation2 + $0x290] sm:$0xff] %vm464_vm0, %v7456_v1  ;;  %1216 = vst.msk [vmem:[#allocation2 + $0x2a0] sm:$0xff] %vm464_vm0, %v7456_v1 }
  0x2c   : > { %1217 = vst.msk [vmem:[#allocation2 + $0x2a8] sm:$0xff] %vm464_vm0, %v7456_v1  ;;  %1218 = vst.msk [vmem:[#allocation2 + $0x2b0] sm:$0xff] %vm464_vm0, %v7456_v1 }
  0x2d   : > { %1220 = vst.msk [vmem:[#allocation2 + $0x2c0] sm:$0xff] %vm464_vm0, %v7456_v1  ;;  %1221 = vst.msk [vmem:[#allocation2 + $0x2c8] sm:$0xff] %vm464_vm0, %v7456_v1 }
  0x2e   : > { %1222 = vst.msk [vmem:[#allocation2 + $0x2d0] sm:$0xff] %vm464_vm0, %v7456_v1  ;;  %1224 = vst.msk [vmem:[#allocation2 + $0x2e0] sm:$0xff] %vm464_vm0, %v7456_v1 }
  0x2f   : > { %1225 = vst.msk [vmem:[#allocation2 + $0x2e8] sm:$0xff] %vm464_vm0, %v7456_v1  ;;  %1226 = vst.msk [vmem:[#allocation2 + $0x2f0] sm:$0xff] %vm464_vm0, %v7456_v1 }
  0x30   : > { %1228 = vst.msk [vmem:[#allocation2 + $0x300] sm:$0xff] %vm464_vm0, %v7456_v1  ;;  %1229 = vst.msk [vmem:[#allocation2 + $0x308] sm:$0xff] %vm464_vm0, %v7456_v1 }
  0x31   : > { %1230 = vst.msk [vmem:[#allocation2 + $0x310] sm:$0xff] %vm464_vm0, %v7456_v1  ;;  %1232 = vst.msk [vmem:[#allocation2 + $0x320] sm:$0xff] %vm464_vm0, %v7456_v1 }
  0x32   : > { %1233 = vst.msk [vmem:[#allocation2 + $0x328] sm:$0xff] %vm464_vm0, %v7456_v1  ;;  %1234 = vst.msk [vmem:[#allocation2 + $0x330] sm:$0xff] %vm464_vm0, %v7456_v1 }
  0x33   : > { %1236 = vst.msk [vmem:[#allocation2 + $0x340] sm:$0xff] %vm464_vm0, %v7456_v1  ;;  %1237 = vst.msk [vmem:[#allocation2 + $0x348] sm:$0xff] %vm464_vm0, %v7456_v1 }
  0x34   : > { %1238 = vst.msk [vmem:[#allocation2 + $0x350] sm:$0xff] %vm464_vm0, %v7456_v1  ;;  %1240 = vst.msk [vmem:[#allocation2 + $0x360] sm:$0xff] %vm464_vm0, %v7456_v1 }
  0x35   : > { %1241 = vst.msk [vmem:[#allocation2 + $0x368] sm:$0xff] %vm464_vm0, %v7456_v1  ;;  %1242 = vst.msk [vmem:[#allocation2 + $0x370] sm:$0xff] %vm464_vm0, %v7456_v1 }
  0x36   : > { %1244 = vst.msk [vmem:[#allocation2 + $0x380] sm:$0xff] %vm464_vm0, %v7456_v1  ;;  %1245 = vst.msk [vmem:[#allocation2 + $0x388] sm:$0xff] %vm464_vm0, %v7456_v1 }
  0x37   : > { %1246 = vst.msk [vmem:[#allocation2 + $0x390] sm:$0xff] %vm464_vm0, %v7456_v1  ;;  %1248 = vst.msk [vmem:[#allocation2 + $0x3a0] sm:$0xff] %vm464_vm0, %v7456_v1 }
  0x38   : > { %1249 = vst.msk [vmem:[#allocation2 + $0x3a8] sm:$0xff] %vm464_vm0, %v7456_v1  ;;  %1250 = vst.msk [vmem:[#allocation2 + $0x3b0] sm:$0xff] %vm464_vm0, %v7456_v1 }
  0x39   : > { %1211 = vst.msk [vmem:[#allocation2 + $0x278] sm:$0x3f] %vm1134_vm2, %v7456_v1  ;;  %1135 = vst.msk [vmem:[#allocation2 + $0x18] sm:$0x3f] %vm1134_vm2, %v7456_v1 }
  0x3a   : > { %1139 = vst.msk [vmem:[#allocation2 + $0x38] sm:$0x3f] %vm1134_vm2, %v7456_v1  ;;  %1143 = vst.msk [vmem:[#allocation2 + $0x58] sm:$0x3f] %vm1134_vm2, %v7456_v1 }
  0x3b   : > { %1147 = vst.msk [vmem:[#allocation2 + $0x78] sm:$0x3f] %vm1134_vm2, %v7456_v1  ;;  %1151 = vst.msk [vmem:[#allocation2 + $0x98] sm:$0x3f] %vm1134_vm2, %v7456_v1 }
  0x3c   : > { %1155 = vst.msk [vmem:[#allocation2 + $0xb8] sm:$0x3f] %vm1134_vm2, %v7456_v1  ;;  %1159 = vst.msk [vmem:[#allocation2 + $0xd8] sm:$0x3f] %vm1134_vm2, %v7456_v1 }
  0x3d   : > { %1163 = vst.msk [vmem:[#allocation2 + $0xf8] sm:$0x3f] %vm1134_vm2, %v7456_v1  ;;  %1167 = vst.msk [vmem:[#allocation2 + $0x118] sm:$0x3f] %vm1134_vm2, %v7456_v1 }
  0x3e   : > { %1171 = vst.msk [vmem:[#allocation2 + $0x138] sm:$0x3f] %vm1134_vm2, %v7456_v1  ;;  %1175 = vst.msk [vmem:[#allocation2 + $0x158] sm:$0x3f] %vm1134_vm2, %v7456_v1 }
  0x3f   : > { %1179 = vst.msk [vmem:[#allocation2 + $0x178] sm:$0x3f] %vm1134_vm2, %v7456_v1  ;;  %1183 = vst.msk [vmem:[#allocation2 + $0x198] sm:$0x3f] %vm1134_vm2, %v7456_v1 }
  0x40   : > { %1187 = vst.msk [vmem:[#allocation2 + $0x1b8] sm:$0x3f] %vm1134_vm2, %v7456_v1  ;;  %1191 = vst.msk [vmem:[#allocation2 + $0x1d8] sm:$0x3f] %vm1134_vm2, %v7456_v1 }
  0x41   : > { %1195 = vst.msk [vmem:[#allocation2 + $0x1f8] sm:$0x3f] %vm1134_vm2, %v7456_v1  ;;  %1199 = vst.msk [vmem:[#allocation2 + $0x218] sm:$0x3f] %vm1134_vm2, %v7456_v1 }
  0x42   : > { %1203 = vst.msk [vmem:[#allocation2 + $0x238] sm:$0x3f] %vm1134_vm2, %v7456_v1  ;;  %1207 = vst.msk [vmem:[#allocation2 + $0x258] sm:$0x3f] %vm1134_vm2, %v7456_v1 }
  0x43   : > { %1215 = vst.msk [vmem:[#allocation2 + $0x298] sm:$0x3f] %vm1134_vm2, %v7456_v1  ;;  %1219 = vst.msk [vmem:[#allocation2 + $0x2b8] sm:$0x3f] %vm1134_vm2, %v7456_v1 }
  0x44   : > { %1223 = vst.msk [vmem:[#allocation2 + $0x2d8] sm:$0x3f] %vm1134_vm2, %v7456_v1  ;;  %1227 = vst.msk [vmem:[#allocation2 + $0x2f8] sm:$0x3f] %vm1134_vm2, %v7456_v1 }
  0x45   : > { %1231 = vst.msk [vmem:[#allocation2 + $0x318] sm:$0x3f] %vm1134_vm2, %v7456_v1  ;;  %1235 = vst.msk [vmem:[#allocation2 + $0x338] sm:$0x3f] %vm1134_vm2, %v7456_v1 }
  0x46   : > { %1239 = vst.msk [vmem:[#allocation2 + $0x358] sm:$0x3f] %vm1134_vm2, %v7456_v1  ;;  %1243 = vst.msk [vmem:[#allocation2 + $0x378] sm:$0x3f] %vm1134_vm2, %v7456_v1 }
  0x47   : > { %1247 = vst.msk [vmem:[#allocation2 + $0x398] sm:$0x3f] %vm1134_vm2, %v7456_v1  ;;  %1251 = vst.msk [vmem:[#allocation2 + $0x3b8] sm:$0x3f] %vm1134_vm2, %v7456_v1 }
  0x88   : > { %v462_v10 = vpop.permute.xlu0 %461 }
  0x8b   : > { %v546_v17 = vpop.permute.xlu1 %545 }
  0x8c   : > { %v641_v20 = vpop.permute.xlu0 %640 }
  0x8f   : > { %v551_v27 = vpop.permute.xlu1 %550 }
  0xd1   : > { %v534_v9 = vpop.f32.mrf.mxu0 }
  0xd2   : > { %v7756_v13 = vadd.f32 %v534_v9, %v462_v10 }
  0xd3   : > { %v536_v11 = vpop.f32.mrf.mxu0 }
  0xd4   : > { %v7754_v12 = vadd.f32 %v536_v11, %v462_v10 }
  0xd6   : > { %589 = vmatprep.subr.mxu1 %v7754_v12  ;;  %676 = vmatprep.subr.mxu0 %v7754_v12 }
  0xd7   : > { %590 = vmatpush1.msra.mxu1 %v7756_v13  ;;  %677 = vmatpush1.msra.mxu0 %v7756_v13 }
  0xd8   : > { %6390 = vmatmul.mubr.msk.f32.vlgmr.msra.gmra.mxu0 %vm464_vm0, %v636_v14  ;;  %6388 = vmatmul.mubr.msk.f32.vlgmr.msra.gmra.mxu1 %vm464_vm0, %v539_v15 }
  0xd9   : > { %629 = vmatprep.mubr.f32.mxu1 %v7456_v1  ;;  %7130 = vmatprep.subr.mxu1 %v794_v32 }
  0xda   : > { %7131 = vmatpush3.msra.mxu1 %v794_v32 }
  0xdc   : > { %6389 = vmatmul.mubr.msk.f32.gmra.mxu1 %vm464_vm0, %v540_v16 }
 0x198   : > { %v712_v18 = vpop.f32.mrf.mxu0  ;;  %v625_v19 = vpop.f32.mrf.mxu1 }
 0x199   : > { %v713_v25 = vadd.f32 %v712_v18, %v641_v20  ;;  %v626_v29 = vadd.f32 %v625_v19, %v546_v17 }
 0x19a   : > { %v714_v21 = vpop.f32.mrf.mxu0  ;;  %v627_v22 = vpop.f32.mrf.mxu1 }
 0x19b   : > { %v715_v23 = vadd.f32 %v714_v21, %v641_v20  ;;  %v628_v24 = vadd.f32 %v627_v22, %v546_v17 }
 0x19c   : > { %v631_v26 = vpop.f32.mrf.mxu1 }
 0x19d   : > { %747 = vmatprep.subr.mxu0 %v715_v23  ;;  %781 = vmatprep.mubr.f32.mxu0 %v628_v24  ;;  %v632_v31 = vadd.f32 %v631_v26, %v551_v27 }
 0x19e   : > { %748 = vmatpush1.xpose.msra.mxu0 %v713_v25  ;;  %v633_v28 = vpop.f32.mrf.mxu1 }
 0x19f   : > { %v634_v30 = vadd.f32 %v633_v28, %v551_v27  ;;  %1007 = vmatprep.subr.mxu0 %v715_v23 }
 0x1a1   : > { %782 = vmatmul.mubr.f32.vlgmr.msra.gmra.mxu0 %v626_v29 }
 0x1a2   : > { %786 = vmatprep.mubr.f32.mxu0 %v634_v30  ;;  %1008 = vmatpush1.msra.mxu0 %v713_v25 }
 0x1a5   : > { %787 = vmatmul.mubr.f32.gmra.mxu0 %v632_v31 }
 0x1a6   : > { %1041 = vmatprep.mubr.f32.mxu0 %v7456_v1 }
 0x261   : > { %v783_v33 = vpop.f32.mrf.mxu0 }
 0x262   : > { %v792_v34 = vmul.f32 0.00390625, %v783_v33 }
 0x263   : > { %v785_v35 = vpop.f32.mrf.mxu0 }
 0x264   : > { %7132 = vmatprep.mubr.msk.f32.mxu1 %vm464_vm0, %v792_v34 }
 0x265   : > { %v788_v36 = vpop.f32.mrf.mxu0 }
 0x266   : > { %v793_v37 = vmul.f32 0.00390625, %v788_v36 }
 0x267   : > { %v790_v38 = vpop.f32.mrf.mxu0 }
 0x268   : > { %7133 = vmatmul.mubr.msk.f32.vlgmr.msra.gmra.mxu1 %vm464_vm0, %v793_v37 }
 0x269   : > { %7139 = vmatprep.mubr.msk.f32.mxu1 %vm889_vm1, %v887_v39 }
 0x328   : > { %v7134_v41 = vpop.f32.mrf.mxu1 }
 0x329   : > { %v880_v42 = vadd.f32 %v7134_v41, %v6391_v40 }
 0x32a   : > { %v874_v43 = vpop.f32.mrf.mxu1 }
 0x32b   : > { %v884_v44 = vadd.f32 %v880_v42, %v793_v37  ;;  %v875_v45 = vadd.f32 %v6391_v40, %v874_v43 }
 0x32d   : > { %v886_v46 = vmax.f32 %v884_v44, 0.0  ;;  %v883_v47 = vadd.f32 %v875_v45, %v792_v34 }
 0x32f   : > { %v885_v48 = vmax.f32 %v883_v47, 0.0  ;;  %7135 = vmatprep.subr.mxu1 %v886_v46 }
 0x330   : > { %7136 = vmatpush3.msra.mxu1 %v886_v46 }
 0x331   : > { %7137 = vmatprep.subr.mxu1 %v885_v48 }
 0x332   : > { %7138 = vmatpush3.msra.mxu1 %v885_v48 }
 0x333   : > { %7140 = vmatmul.mubr.msk.f32.vlgmr.msra.gmra.mxu1 %vm889_vm1, %v888_v49 }
 0x334   : > { %1122 = vmatprep.mubr.f32.mxu1 %v7456_v1 }
 0x3f3   : > { %v7141_v50 = vpop.f32.mrf.mxu1 }
 0x3f5   : > { %v962_v51 = vpop.f32.mrf.mxu1 }
 0x3f6   : > { %6396 = vmatmul.mubr.msk.f32.vlgmr.msra.gmra.mxu0 %vm464_vm0, %v962_v51 }
 0x3f7   : > { %1047 = vmatprep.mubr.f32.mxu0 %v7456_v1 }
 0x3fa   : > { %6397 = vmatmul.mubr.msk.f32.gmra.mxu0 %vm464_vm0, %v7141_v50 }
 0x3fb   : > { %6498 = vmatprep.mubr.msk.bf16.mxu0 %vm464_vm0, %v7865_v61 }
 0x4b6   : > { %v1043_v52 = vpop.f32.mrf.mxu0 }
 0x4b8   : > { %v1045_v53 = vpop.f32.mrf.mxu0 }
 0x4ba   : > { %v1049_v54 = vpop.f32.mrf.mxu0 }
 0x4bc   : > { %v1051_v55 = vpop.f32.mrf.mxu0 }
 0x4bd   : > { %1086 = vmatprep.subr.mxu1 %v1051_v55 }
 0x4be   : > { %1087 = vmatpush1.msra.mxu1 %v1049_v54 }
 0x4bf   : > { %1088 = vmatprep.subr.mxu1 %v1045_v53 }
 0x4c0   : > { %1089 = vmatpush1.msra.mxu1 %v1043_v52 }
 0x4c1   : > { %6398 = vmatmul.mubr.msk.f32.vlgmr.msra.gmra.mxu1 %vm889_vm1, %v1054_v56 }
 0x4c2   : > { %6516 = vmatprep.mubr.msk.bf16.mxu1 %vm464_vm0, %v7870_v62 }
 0x581   : > { %v1124_v57 = vpop.f32.mrf.mxu1 }
 0x582   : > { %v1129_v58 = vadd.f32 %v1124_v57, %v7756_v13 }
 0x583   : > { %v1126_v59 = vpop.f32.mrf.mxu1 }
 0x584   : > { %v1130_v60 = vadd.f32 %v1126_v59, %v7754_v12  ;;  %1252 = vxpose.xlu0.b32.start.end [1/1] (short) %v1129_v58, 128 }
 0x586   : > { %1284 = vxpose.xlu1.b32.start.end [1/1] (short) %v1130_v60, 128 }
 0x600   : > { %v1268_v63 = vpop.trf.xlu0 }
 0x601   : > { %1317 = vst.msk [vmem:[#allocation2 + $0xe7] sm:$0xff] %vm464_vm0, %v1268_v63 }
 0x602   : > { %v1300_v0 = vpop.trf.xlu1 }
 0x603   : > { %1333 = vst.msk [vmem:[#allocation2 + $0x1e7] sm:$0xff] %vm464_vm0, %v1300_v0 }
 0x604   : > { %v1269_v1 = vpop.trf.xlu0 }
 0x605   : > { %1318 = vst.msk [vmem:[#allocation2 + $0xef] sm:$0xff] %vm464_vm0, %v1269_v1 }
 0x606   : > { %v1301_v2 = vpop.trf.xlu1 }
 0x607   : > { %1334 = vst.msk [vmem:[#allocation2 + $0x1ef] sm:$0xff] %vm464_vm0, %v1301_v2 }
 0x608   : > { %v1270_v3 = vpop.trf.xlu0 }
 0x609   : > { %1319 = vst.msk [vmem:[#allocation2 + $0x107] sm:$0xff] %vm464_vm0, %v1270_v3 }
 0x60a   : > { %v1302_v4 = vpop.trf.xlu1 }
 0x60b   : > { %1335 = vst.msk [vmem:[#allocation2 + $0x207] sm:$0xff] %vm464_vm0, %v1302_v4 }
 0x60c   : > { %v1271_v5 = vpop.trf.xlu0 }
 0x60d   : > { %1320 = vst.msk [vmem:[#allocation2 + $0x10f] sm:$0xff] %vm464_vm0, %v1271_v5 }
 0x60e   : > { %v1303_v6 = vpop.trf.xlu1 }
 0x60f   : > { %1336 = vst.msk [vmem:[#allocation2 + $0x20f] sm:$0xff] %vm464_vm0, %v1303_v6 }
 0x610   : > { %v1272_v7 = vpop.trf.xlu0 }
 0x611   : > { %1321 = vst.msk [vmem:[#allocation2 + $0x127] sm:$0xff] %vm464_vm0, %v1272_v7 }
 0x612   : > { %v1304_v8 = vpop.trf.xlu1 }
 0x613   : > { %1337 = vst.msk [vmem:[#allocation2 + $0x227] sm:$0xff] %vm464_vm0, %v1304_v8 }
 0x614   : > { %v1273_v9 = vpop.trf.xlu0 }
 0x615   : > { %1322 = vst.msk [vmem:[#allocation2 + $0x12f] sm:$0xff] %vm464_vm0, %v1273_v9 }
 0x616   : > { %v1305_v10 = vpop.trf.xlu1 }
 0x617   : > { %1338 = vst.msk [vmem:[#allocation2 + $0x22f] sm:$0xff] %vm464_vm0, %v1305_v10 }
 0x618   : > { %v1274_v11 = vpop.trf.xlu0 }
 0x619   : > { %1323 = vst.msk [vmem:[#allocation2 + $0x147] sm:$0xff] %vm464_vm0, %v1274_v11 }
 0x61a   : > { %v1306_v12 = vpop.trf.xlu1 }
 0x61b   : > { %1339 = vst.msk [vmem:[#allocation2 + $0x247] sm:$0xff] %vm464_vm0, %v1306_v12 }
 0x61c   : > { %v1275_v13 = vpop.trf.xlu0 }
 0x61d   : > { %1324 = vst.msk [vmem:[#allocation2 + $0x14f] sm:$0xff] %vm464_vm0, %v1275_v13 }
 0x61e   : > { %v1307_v14 = vpop.trf.xlu1 }
 0x61f   : > { %1340 = vst.msk [vmem:[#allocation2 + $0x24f] sm:$0xff] %vm464_vm0, %v1307_v14 }
 0x620   : > { %v1276_v15 = vpop.trf.xlu0 }
 0x621   : > { %1325 = vst.msk [vmem:[#allocation2 + $0x167] sm:$0xff] %vm464_vm0, %v1276_v15 }
 0x622   : > { %v1308_v16 = vpop.trf.xlu1  ;;  %v1423_v11 = vld [vmem:[#allocation2 + $0x247] sm:$0xff] }
 0x623   : > { %1341 = vst.msk [vmem:[#allocation2 + $0x267] sm:$0xff] %vm464_vm0, %v1308_v16  ;;  %v1374_v12 = vld [vmem:[#allocation2 + $0x246] sm:$0xff] }
 0x624   : > { %v1277_v17 = vpop.trf.xlu0 }
 0x625   : > { %1326 = vst.msk [vmem:[#allocation2 + $0x16f] sm:$0xff] %vm464_vm0, %v1277_v17  ;;  %v1408_v17 = vld [vmem:[#allocation2 + $0x14f] sm:$0xff] }
 0x626   : > { %v1309_v18 = vpop.trf.xlu1  ;;  %v1424_v9 = vld [vmem:[#allocation2 + $0x24f] sm:$0xff] }
 0x627   : > { %1342 = vst.msk [vmem:[#allocation2 + $0x26f] sm:$0xff] %vm464_vm0, %v1309_v18  ;;  %v1375_v10 = vld [vmem:[#allocation2 + $0x24e] sm:$0xff]  ;;  %v7954_v15 = vpack.c.bf16 %v1424_v9, %v1423_v11 }
 0x628   : > { %v1278_v19 = vpop.trf.xlu0  ;;  %v1409_v5 = vld [vmem:[#allocation2 + $0x167] sm:$0xff]  ;;  %v7956_v16 = vpack.c.bf16 %v1375_v10, %v1374_v12 }
 0x629   : > { %1327 = vst.msk [vmem:[#allocation2 + $0x187] sm:$0xff] %vm464_vm0, %v1278_v19  ;;  %v1360_v6 = vld [vmem:[#allocation2 + $0x166] sm:$0xff]  ;;  %v1359_v18 = vld [vmem:[#allocation2 + $0x14e] sm:$0xff] }
 0x62a   : > { %v1310_v20 = vpop.trf.xlu1  ;;  %v1425_v59 = vld [vmem:[#allocation2 + $0x267] sm:$0xff] }
 0x62b   : > { %1343 = vst.msk [vmem:[#allocation2 + $0x287] sm:$0xff] %vm464_vm0, %v1310_v20  ;;  %v1376_v60 = vld [vmem:[#allocation2 + $0x266] sm:$0xff] }
 0x62c   : > { %v1279_v21 = vpop.trf.xlu0  ;;  %v1410_v3 = vld [vmem:[#allocation2 + $0x16f] sm:$0xff]  ;;  %v1407_v19 = vld [vmem:[#allocation2 + $0x147] sm:$0xff] }
 0x62d   : > { %1328 = vst.msk [vmem:[#allocation2 + $0x18f] sm:$0xff] %vm464_vm0, %v1279_v21  ;;  %v1361_v4 = vld [vmem:[#allocation2 + $0x16e] sm:$0xff]  ;;  %v1438_v7 = vpack.c.bf16 %v1410_v3, %v1409_v5  ;;  %v1358_v20 = vld [vmem:[#allocation2 + $0x146] sm:$0xff]  ;;  %v1437_v21 = vpack.c.bf16 %v1408_v17, %v1407_v19 }
 0x62e   : > { %v1311_v22 = vpop.trf.xlu1  ;;  %v1426_v57 = vld [vmem:[#allocation2 + $0x26f] sm:$0xff]  ;;  %v1388_v8 = vpack.c.bf16 %v1361_v4, %v1360_v6  ;;  %v1401_v9 = vld [vmem:[#allocation2 + $0xe7] sm:$0xff] }
 0x62f   : > { %1344 = vst.msk [vmem:[#allocation2 + $0x28f] sm:$0xff] %vm464_vm0, %v1311_v22  ;;  %v1377_v58 = vld [vmem:[#allocation2 + $0x26e] sm:$0xff]  ;;  %v7938_v1 = vpack.c.bf16 %v1426_v57, %v1425_v59  ;;  %v7949_v13 = vsel %vm464_vm0, %v1438_v7, 0  ;;  %v1387_v22 = vpack.c.bf16 %v1359_v18, %v1358_v20  ;;  %v1352_v10 = vld [vmem:[#allocation2 + $0xe6] sm:$0xff] }
 0x630   : > { %v1280_v23 = vpop.trf.xlu0  ;;  %v1411_v53 = vld [vmem:[#allocation2 + $0x187] sm:$0xff]  ;;  %v7940_v2 = vpack.c.bf16 %v1377_v58, %v1376_v60  ;;  %v7952_v14 = vsel %vm464_vm0, %v1388_v8, 0  ;;  %v1418_v57 = vld [vmem:[#allocation2 + $0x1ef] sm:$0xff] }
 0x631   : > { %1329 = vst.msk [vmem:[#allocation2 + $0x1a7] sm:$0xff] %vm464_vm0, %v1280_v23  ;;  %v1362_v54 = vld [vmem:[#allocation2 + $0x186] sm:$0xff]  ;;  %v1422_v23 = vld [vmem:[#allocation2 + $0x22f] sm:$0xff] }
 0x632   : > { %v1312_v24 = vpop.trf.xlu1  ;;  %v1427_v45 = vld [vmem:[#allocation2 + $0x287] sm:$0xff]  ;;  %v1402_v7 = vld [vmem:[#allocation2 + $0xef] sm:$0xff] }
 0x633   : > { %1345 = vst.msk [vmem:[#allocation2 + $0x2a7] sm:$0xff] %vm464_vm0, %v1312_v24  ;;  %v1378_v46 = vld [vmem:[#allocation2 + $0x286] sm:$0xff]  ;;  %v1373_v24 = vld [vmem:[#allocation2 + $0x22e] sm:$0xff]  ;;  %v1434_v19 = vpack.c.bf16 %v1402_v7, %v1401_v9  ;;  %v8050_v7 = vld [vmem:[%s9588_s11 + $0x2] sm:$0x1] }
 0x634   : > { %v1281_v25 = vpop.trf.xlu0  ;;  %v1412_v51 = vld [vmem:[#allocation2 + $0x18f] sm:$0xff]  ;;  %v1417_v59 = vld [vmem:[#allocation2 + $0x1e7] sm:$0xff] }
 0x635   : > { %1330 = vst.msk [vmem:[#allocation2 + $0x1af] sm:$0xff] %vm464_vm0, %v1281_v25  ;;  %v1363_v52 = vld [vmem:[#allocation2 + $0x18e] sm:$0xff]  ;;  %v1439_v55 = vpack.c.bf16 %v1412_v51, %v1411_v53  ;;  %v1368_v60 = vld [vmem:[#allocation2 + $0x1e6] sm:$0xff]  ;;  %v8002_v5 = vpack.c.bf16 %v1418_v57, %v1417_v59 }
 0x636   : > { %v1313_v26 = vpop.trf.xlu1  ;;  %v1428_v37 = vld [vmem:[#allocation2 + $0x28f] sm:$0xff]  ;;  %v1389_v56 = vpack.c.bf16 %v1363_v52, %v1362_v54  ;;  %v1421_v25 = vld [vmem:[#allocation2 + $0x227] sm:$0xff] }
 0x637   : > { %1346 = vst.msk [vmem:[#allocation2 + $0x2af] sm:$0xff] %vm464_vm0, %v1313_v26  ;;  %v1379_v38 = vld [vmem:[#allocation2 + $0x28e] sm:$0xff]  ;;  %v7922_v49 = vpack.c.bf16 %v1428_v37, %v1427_v45  ;;  %v7933_v63 = vsel %vm464_vm0, %v1439_v55, 0  ;;  %v1372_v26 = vld [vmem:[#allocation2 + $0x226] sm:$0xff] }
 0x638   : > { %v1282_v27 = vpop.trf.xlu0  ;;  %v1413_v29 = vld [vmem:[#allocation2 + $0x1a7] sm:$0xff]  ;;  %v7924_v50 = vpack.c.bf16 %v1379_v38, %v1378_v46  ;;  %v7936_v0 = vsel %vm464_vm0, %v1389_v56, 0  ;;  %v1420_v37 = vld [vmem:[#allocation2 + $0x20f] sm:$0xff] }
 0x639   : > { %1331 = vst.msk [vmem:[#allocation2 + $0x1c7] sm:$0xff] %vm464_vm0, %v1282_v27  ;;  %v1364_v31 = vld [vmem:[#allocation2 + $0x1a6] sm:$0xff]  ;;  %v7965_v27 = vsel %vm464_vm0, %v1437_v21, 0  ;;  %v1371_v38 = vld [vmem:[#allocation2 + $0x20e] sm:$0xff] }
 0x63a   : > { %v1314_v28 = vpop.trf.xlu1  ;;  %v1429_v34 = vld [vmem:[#allocation2 + $0x2a7] sm:$0xff]  ;;  %v1404_v51 = vld [vmem:[#allocation2 + $0x10f] sm:$0xff] }
 0x63b   : > { %1347 = vst.msk [vmem:[#allocation2 + $0x2c7] sm:$0xff] %vm464_vm0, %v1314_v28  ;;  %v1380_v40 = vld [vmem:[#allocation2 + $0x2a6] sm:$0xff]  ;;  %v7968_v28 = vsel %vm464_vm0, %v1387_v22, 0  ;;  %v1355_v52 = vld [vmem:[#allocation2 + $0x10e] sm:$0xff] }
 0x63c   : > { %v1414_v30 = vld [vmem:[#allocation2 + $0x1af] sm:$0xff]  ;;  %v1283_v33 = vpop.trf.xlu0  ;;  %v1403_v53 = vld [vmem:[#allocation2 + $0x107] sm:$0xff] }
 0x63d   : > { %v1365_v32 = vld [vmem:[#allocation2 + $0x1ae] sm:$0xff]  ;;  %v1440_v35 = vpack.c.bf16 %v1414_v30, %v1413_v29  ;;  %1332 = vst.msk [vmem:[#allocation2 + $0x1cf] sm:$0xff] %vm464_vm0, %v1283_v33  ;;  %v7970_v29 = vpack.c.bf16 %v1422_v23, %v1421_v25  ;;  %v7972_v30 = vpack.c.bf16 %v1373_v24, %v1372_v26  ;;  %v1354_v54 = vld [vmem:[#allocation2 + $0x106] sm:$0xff]  ;;  %v1435_v55 = vpack.c.bf16 %v1404_v51, %v1403_v53 }
 0x63e   : > { %v1390_v36 = vpack.c.bf16 %v1365_v32, %v1364_v31  ;;  %v1430_v39 = vld [vmem:[#allocation2 + $0x2af] sm:$0xff]  ;;  %v1315_v42 = vpop.trf.xlu1  ;;  %v1405_v33 = vld [vmem:[#allocation2 + $0x127] sm:$0xff]  ;;  %v1385_v56 = vpack.c.bf16 %v1355_v52, %v1354_v54 }
 0x63f   : > { %v1381_v41 = vld [vmem:[#allocation2 + $0x2ae] sm:$0xff]  ;;  %v7907_v43 = vpack.c.bf16 %v1430_v39, %v1429_v34  ;;  %1348 = vst.msk [vmem:[#allocation2 + $0x2cf] sm:$0xff] %vm464_vm0, %v1315_v42  ;;  %v7917_v47 = vsel %vm464_vm0, %v1440_v35, 0  ;;  %v1356_v34 = vld [vmem:[#allocation2 + $0x126] sm:$0xff]  ;;  %v7997_v3 = vsel %vm464_vm0, %v1435_v55, 0 }
 0x640   : > { %v7909_v44 = vpack.c.bf16 %v1381_v41, %v1380_v40  ;;  %v7920_v48 = vsel %vm464_vm0, %v1390_v36, 0  ;;  %v1406_v31 = vld [vmem:[#allocation2 + $0x12f] sm:$0xff]  ;;  %v1419_v39 = vld [vmem:[#allocation2 + $0x207] sm:$0xff]  ;;  %v8000_v4 = vsel %vm464_vm0, %v1385_v56, 0 }
 0x641   : > { %7142 = vmatprep.subr.msk.bf16.mxu0 %vm464_vm0, %v7907_v43  ;;  %v1357_v32 = vld [vmem:[#allocation2 + $0x12e] sm:$0xff]  ;;  %v1436_v35 = vpack.c.bf16 %v1406_v31, %v1405_v33  ;;  %v1370_v40 = vld [vmem:[#allocation2 + $0x206] sm:$0xff]  ;;  %v7986_v45 = vpack.c.bf16 %v1420_v37, %v1419_v39  ;;  %v8015_v31 = vsel %vm464_vm0, %v1434_v19, 0 }
 0x642   : > { %7150 = vmatprep.subr.msk.bf16.mxu1 %vm464_vm0, %v7909_v44  ;;  %6483 = vmatpush3.bf16.xpose.msra.mxu0 %v7917_v47  ;;  %v1386_v36 = vpack.c.bf16 %v1357_v32, %v1356_v34  ;;  %v7988_v46 = vpack.c.bf16 %v1371_v38, %v1370_v40  ;;  %v1369_v58 = vld [vmem:[#allocation2 + $0x1ee] sm:$0xff]  ;;  %v1366_v17 = vld [vmem:[#allocation2 + $0x1c6] sm:$0xff] }
 0x643   : > { %6501 = vmatpush3.bf16.xpose.msra.mxu1 %v7920_v48  ;;  %7143 = vmatprep.subr.msk.bf16.mxu0 %vm464_vm0, %v7922_v49  ;;  %v7981_v41 = vsel %vm464_vm0, %v1436_v35, 0  ;;  %v8004_v6 = vpack.c.bf16 %v1369_v58, %v1368_v60  ;;  %v1353_v8 = vld [vmem:[#allocation2 + $0xee] sm:$0xff]  ;;  %v1350_v25 = vld [vmem:[#allocation2 + $0xc6] sm:$0xff] }
 0x644   : > { %7151 = vmatprep.subr.msk.bf16.mxu1 %vm464_vm0, %v7924_v50  ;;  %v7984_v42 = vsel %vm464_vm0, %v1386_v36, 0  ;;  %v1415_v11 = vld [vmem:[#allocation2 + $0x1c7] sm:$0xff]  ;;  %v1416_v12 = vld [vmem:[#allocation2 + $0x1cf] sm:$0xff]  ;;  %v1384_v20 = vpack.c.bf16 %v1353_v8, %v1352_v10 }
 0x645   : > { %v1367_v18 = vld [vmem:[#allocation2 + $0x1ce] sm:$0xff]  ;;  %v8012_v21 = vpack.c.bf16 %v1416_v12, %v1415_v11  ;;  %v1807_v35 = vld [vmem:[#allocation2 + $0x2c6] sm:$0xff] }
 0x646   : > { %v1391_v22 = vpack.c.bf16 %v1367_v18, %v1366_v17  ;;  %v1399_v23 = vld [vmem:[#allocation2 + $0xc7] sm:$0xff]  ;;  %v1400_v24 = vld [vmem:[#allocation2 + $0xcf] sm:$0xff]  ;;  %v8018_v32 = vsel %vm464_vm0, %v1384_v20, 0 }
 0x647   : > { %v1351_v26 = vld [vmem:[#allocation2 + $0xce] sm:$0xff]  ;;  %v1433_v33 = vpack.c.bf16 %v1400_v24, %v1399_v23 }
 0x648   : > { %v1383_v34 = vpack.c.bf16 %v1351_v26, %v1350_v25  ;;  %v1808_v36 = vld [vmem:[#allocation2 + $0x2ce] sm:$0xff]  ;;  %v8043_v59 = vsel %vm464_vm0, %v1391_v22, 0 }
 0x649   : > { %v1663_v37 = vld [vmem:[#allocation2 + $0x2a8] sm:$0xff]  ;;  %v1664_v38 = vld [vmem:[#allocation2 + $0x2b0] sm:$0xff]  ;;  %v1453_v39 = vsel %vm464_vm0, %v1433_v33, 0  ;;  %v8027_v51 = vpack.c.bf16 %v1808_v36, %v1807_v35 }
 0x64a   : > { %6485 = vmatpush3.bf16.xpose.msra.mxu0 %v7933_v63  ;;  %v1545_v40 = vsel %vm464_vm0, %v1383_v34, 0  ;;  %v8029_v52 = vpack.c.bf16 %v1664_v38, %v1663_v37  ;;  %v1647_v53 = vld [vmem:[#allocation2 + $0x1a8] sm:$0xff]  ;;  %v1648_v54 = vld [vmem:[#allocation2 + $0x1b0] sm:$0xff] }
 0x64b   : > { %6503 = vmatpush3.bf16.xpose.msra.mxu1 %v7936_v0  ;;  %7144 = vmatprep.subr.msk.bf16.mxu0 %vm464_vm0, %v7938_v1  ;;  %v1674_v55 = vpack.c.bf16 %v1648_v54, %v1647_v53  ;;  %v1661_v56 = vld [vmem:[#allocation2 + $0x288] sm:$0xff]  ;;  %v1662_v57 = vld [vmem:[#allocation2 + $0x290] sm:$0xff] }
 0x64c   : > { %7152 = vmatprep.subr.msk.bf16.mxu1 %vm464_vm0, %v7940_v2  ;;  %v8045_v60 = vpack.c.bf16 %v1662_v57, %v1661_v56  ;;  %v1646_v8 = vld [vmem:[#allocation2 + $0x190] sm:$0xff]  ;;  %v1659_v10 = vld [vmem:[#allocation2 + $0x268] sm:$0xff] }
 0x64d   : > { %v8040_v58 = vsel %vm464_vm0, %v1674_v55, 0  ;;  %v1660_v11 = vld [vmem:[#allocation2 + $0x270] sm:$0xff]  ;;  %v1643_v18 = vld [vmem:[#allocation2 + $0x168] sm:$0xff] }
 0x64e   : > { %v8070_v17 = vpack.c.bf16 %v1660_v11, %v1659_v10  ;;  %v1644_v19 = vld [vmem:[#allocation2 + $0x170] sm:$0xff]  ;;  %v1641_v26 = vld [vmem:[#allocation2 + $0x148] sm:$0xff] }
 0x64f   : > { %v1672_v20 = vpack.c.bf16 %v1644_v19, %v1643_v18  ;;  %v1658_v23 = vld [vmem:[#allocation2 + $0x250] sm:$0xff]  ;;  %v1655_v35 = vld [vmem:[#allocation2 + $0x228] sm:$0xff] }
 0x650   : > { %v1642_v33 = vld [vmem:[#allocation2 + $0x150] sm:$0xff]  ;;  %v1653_v54 = vld [vmem:[#allocation2 + $0x208] sm:$0xff] }
 0x651   : > { %v8079_v24 = vsel %vm464_vm0, %v1672_v20, 0  ;;  %v1671_v34 = vpack.c.bf16 %v1642_v33, %v1641_v26  ;;  %v1656_v36 = vld [vmem:[#allocation2 + $0x230] sm:$0xff]  ;;  %v1651_v10 = vld [vmem:[#allocation2 + $0x1e8] sm:$0xff] }
 0x652   : > { %6487 = vmatpush3.bf16.xpose.msra.mxu0 %v7949_v13  ;;  %v8092_v38 = vpack.c.bf16 %v1656_v36, %v1655_v35  ;;  %v1654_v55 = vld [vmem:[#allocation2 + $0x210] sm:$0xff]  ;;  %v1635_v20 = vld [vmem:[#allocation2 + $0xe8] sm:$0xff] }
 0x653   : > { %6505 = vmatpush3.bf16.xpose.msra.mxu1 %v7952_v14  ;;  %7145 = vmatprep.subr.msk.bf16.mxu0 %vm464_vm0, %v7954_v15  ;;  %v8090_v37 = vsel %vm464_vm0, %v1671_v34, 0  ;;  %v8103_v57 = vpack.c.bf16 %v1654_v55, %v1653_v54  ;;  %v1652_v11 = vld [vmem:[#allocation2 + $0x1f0] sm:$0xff]  ;;  %v1649_v26 = vld [vmem:[#allocation2 + $0x1c8] sm:$0xff] }
 0x654   : > { %7153 = vmatprep.subr.msk.bf16.mxu1 %vm464_vm0, %v7956_v16  ;;  %v8114_v19 = vpack.c.bf16 %v1652_v11, %v1651_v10  ;;  %v1650_v33 = vld [vmem:[#allocation2 + $0x1d0] sm:$0xff]  ;;  %v1633_v34 = vld [vmem:[#allocation2 + $0xc8] sm:$0xff]  ;;  %v8143_v11 = vsel %vm464_vm0, %v8012_v21, 0 }
 0x655   : > { %v1634_v35 = vld [vmem:[#allocation2 + $0xd0] sm:$0xff]  ;;  %v2095_v55 = vld [vmem:[#allocation2 + $0x2c8] sm:$0xff] }
 0x656   : > { %v1952_v54 = vld [vmem:[#allocation2 + $0x2cf] sm:$0xff] }
 0x65a   : > { %6489 = vmatpush3.bf16.xpose.msra.mxu0 %v7965_v27 }
 0x65b   : > { %6507 = vmatpush3.bf16.xpose.msra.mxu1 %v7968_v28  ;;  %7146 = vmatprep.subr.msk.bf16.mxu0 %vm464_vm0, %v7970_v29 }
 0x65c   : > { %7154 = vmatprep.subr.msk.bf16.mxu1 %vm464_vm0, %v7972_v30 }
 0x662   : > { %6491 = vmatpush3.bf16.xpose.msra.mxu0 %v7981_v41 }
 0x663   : > { %6509 = vmatpush3.bf16.xpose.msra.mxu1 %v7984_v42  ;;  %7147 = vmatprep.subr.msk.bf16.mxu0 %vm464_vm0, %v7986_v45 }
 0x664   : > { %7155 = vmatprep.subr.msk.bf16.mxu1 %vm464_vm0, %v7988_v46 }
 0x66a   : > { %6493 = vmatpush3.bf16.xpose.msra.mxu0 %v7997_v3 }
 0x66b   : > { %6511 = vmatpush3.bf16.xpose.msra.mxu1 %v8000_v4  ;;  %7148 = vmatprep.subr.msk.bf16.mxu0 %vm464_vm0, %v8002_v5 }
 0x66c   : > { %7156 = vmatprep.subr.msk.bf16.mxu1 %vm464_vm0, %v8004_v6 }
 0x672   : > { %6495 = vmatpush3.bf16.xpose.msra.mxu0 %v8015_v31 }
 0x673   : > { %6513 = vmatpush3.bf16.xpose.msra.mxu1 %v8018_v32  ;;  %7149 = vmatprep.subr.msk.bf16.mxu0 %vm464_vm0, %v8012_v21  ;;  %v2240_v21 = vld [vmem:[#allocation2 + $0x2e6] sm:$0xff] }
 0x674   : > { %7157 = vmatprep.subr.msk.bf16.mxu1 %vm464_vm0, %v1391_v22  ;;  %v1657_v22 = vld [vmem:[#allocation2 + $0x248] sm:$0xff] }
 0x675   : > { %v8081_v25 = vpack.c.bf16 %v1658_v23, %v1657_v22  ;;  %v1636_v22 = vld [vmem:[#allocation2 + $0xf0] sm:$0xff] }
 0x676   : > { %v1668_v23 = vpack.c.bf16 %v1636_v22, %v1635_v20  ;;  %v6408_v22 = vld [vmem:[%s9588_s11 + $0x5] sm:$0x1] }
 0x678   : > { %v1690_v36 = vsel %vm464_vm0, %v1668_v23, 0  ;;  %v2385_v23 = vld [vmem:[#allocation2 + $0x2ef] sm:$0xff] }
 0x67a   : > { %6497 = vmatpush3.bf16.xpose.msra.mxu0 %v1453_v39  ;;  %v1639_v39 = vld [vmem:[#allocation2 + $0x128] sm:$0xff] }
 0x67b   : > { %6515 = vmatpush3.bf16.xpose.msra.mxu1 %v1545_v40  ;;  %7158 = vmatprep.subr.msk.bf16.mxu0 %vm464_vm0, %v8029_v52  ;;  %v1640_v40 = vld [vmem:[#allocation2 + $0x130] sm:$0xff] }
 0x67c   : > { %7166 = vmatprep.subr.msk.bf16.mxu1 %vm464_vm0, %v8027_v51  ;;  %v1670_v53 = vpack.c.bf16 %v1640_v40, %v1639_v39  ;;  %v1675_v39 = vpack.c.bf16 %v1650_v33, %v1649_v26  ;;  %v1667_v40 = vpack.c.bf16 %v1634_v35, %v1633_v34  ;;  %v2285_v34 = vsel %vm464_vm0, %v8004_v6, 0 }
 0x67d   : > { %v2429_v35 = vsel %vm464_vm0, %v8002_v5, 0 }
 0x67e   : > { %v8101_v56 = vsel %vm464_vm0, %v1670_v53, 0  ;;  %v1951_v53 = vld [vmem:[#allocation2 + $0x2c7] sm:$0xff]  ;;  %v8146_v20 = vsel %vm464_vm0, %v1675_v39, 0 }
 0x681   : > { %6499 = vmatmul.mubr.msk.bf16.vlgmr.msra.gmra.mxu0 %vm464_vm0, %v7865_v61  ;;  %v8055_v61 = vld [vmem:[%s9588_s11 + $0x3] sm:$0x1] }
 0x682   : > { %6517 = vmatmul.mubr.msk.bf16.vlgmr.msra.gmra.mxu1 %vm464_vm0, %v7870_v62  ;;  %6519 = vmatpush3.bf16.xpose.msra.mxu0 %v8040_v58  ;;  %v1645_v62 = vld [vmem:[#allocation2 + $0x188] sm:$0xff] }
 0x683   : > { %6537 = vmatpush3.bf16.xpose.msra.mxu1 %v8043_v59  ;;  %7159 = vmatprep.subr.msk.bf16.mxu0 %vm464_vm0, %v8045_v60  ;;  %v1673_v9 = vpack.c.bf16 %v1646_v8, %v1645_v62  ;;  %v1637_v62 = vld [vmem:[#allocation2 + $0x108] sm:$0xff]  ;;  %v1638_v8 = vld [vmem:[#allocation2 + $0x110] sm:$0xff] }
 0x684   : > { %7167 = vmatprep.subr.msk.bf16.mxu1 %vm464_vm0, %v7909_v44  ;;  %6534 = vmatprep.mubr.msk.bf16.mxu0 %vm464_vm0, %v8050_v7 }
 0x685   : > { %6552 = vmatprep.mubr.msk.bf16.mxu1 %vm464_vm0, %v8055_v61  ;;  %v8068_v12 = vsel %vm464_vm0, %v1673_v9, 0  ;;  %v1669_v9 = vpack.c.bf16 %v1638_v8, %v1637_v62  ;;  %v2096_v62 = vld [vmem:[#allocation2 + $0x2d0] sm:$0xff]  ;;  %v1687_v8 = vsel %vm464_vm0, %v1667_v40, 0 }
 0x686   : > { %v8130_v10 = vpack.c.bf16 %v2096_v62, %v2095_v55  ;;  %v2708_v62 = vld [vmem:[#allocation2 + $0x14f] sm:$0xff] }
 0x687   : > { %v8112_v18 = vsel %vm464_vm0, %v1669_v9, 0  ;;  %v8128_v9 = vpack.c.bf16 %v1952_v54, %v1951_v53  ;;  %v8267_v53 = vld [vmem:[%s9588_s11 + $0x8] sm:$0x1]  ;;  %v8272_v54 = vld [vmem:[%s9588_s11 + $0xa] sm:$0x1] }
 0x68a   : > { %6521 = vmatpush3.bf16.xpose.msra.mxu0 %v8068_v12 }
 0x68b   : > { %6539 = vmatpush3.bf16.xpose.msra.mxu1 %v7920_v48  ;;  %7160 = vmatprep.subr.msk.bf16.mxu0 %vm464_vm0, %v8070_v17 }
 0x68c   : > { %7168 = vmatprep.subr.msk.bf16.mxu1 %vm464_vm0, %v7924_v50 }
 0x692   : > { %6523 = vmatpush3.bf16.xpose.msra.mxu0 %v8079_v24 }
 0x693   : > { %6541 = vmatpush3.bf16.xpose.msra.mxu1 %v7936_v0  ;;  %7161 = vmatprep.subr.msk.bf16.mxu0 %vm464_vm0, %v8081_v25 }
 0x694   : > { %7169 = vmatprep.subr.msk.bf16.mxu1 %vm464_vm0, %v7940_v2 }
 0x69a   : > { %6525 = vmatpush3.bf16.xpose.msra.mxu0 %v8090_v37 }
 0x69b   : > { %6543 = vmatpush3.bf16.xpose.msra.mxu1 %v7952_v14  ;;  %7162 = vmatprep.subr.msk.bf16.mxu0 %vm464_vm0, %v8092_v38 }
 0x69c   : > { %7170 = vmatprep.subr.msk.bf16.mxu1 %vm464_vm0, %v7956_v16 }
 0x6a2   : > { %6527 = vmatpush3.bf16.xpose.msra.mxu0 %v8101_v56 }
 0x6a3   : > { %6545 = vmatpush3.bf16.xpose.msra.mxu1 %v7968_v28  ;;  %7163 = vmatprep.subr.msk.bf16.mxu0 %vm464_vm0, %v8103_v57 }
 0x6a4   : > { %7171 = vmatprep.subr.msk.bf16.mxu1 %vm464_vm0, %v7972_v30 }
 0x6aa   : > { %6529 = vmatpush3.bf16.xpose.msra.mxu0 %v8112_v18 }
 0x6ab   : > { %6547 = vmatpush3.bf16.xpose.msra.mxu1 %v7984_v42  ;;  %7164 = vmatprep.subr.msk.bf16.mxu0 %vm464_vm0, %v8114_v19 }
 0x6ac   : > { %7172 = vmatprep.subr.msk.bf16.mxu1 %vm464_vm0, %v7988_v46 }
 0x6b2   : > { %6531 = vmatpush3.bf16.xpose.msra.mxu0 %v1690_v36 }
 0x6b3   : > { %6549 = vmatpush3.bf16.xpose.msra.mxu1 %v8000_v4  ;;  %7165 = vmatprep.subr.msk.bf16.mxu0 %vm464_vm0, %v1675_v39  ;;  %v6410_v39 = vld [vmem:[%s9588_s11 + $0x6] sm:$0x1] }
 0x6b4   : > { %7173 = vmatprep.subr.msk.bf16.mxu1 %vm464_vm0, %v8004_v6 }
 0x6ba   : > { %6533 = vmatpush3.bf16.xpose.msra.mxu0 %v1687_v8 }
 0x6bb   : > { %6551 = vmatpush3.bf16.xpose.msra.mxu1 %v8018_v32  ;;  %7174 = vmatprep.subr.msk.bf16.mxu0 %vm464_vm0, %v8128_v9  ;;  %v6406_v32 = vld [vmem:[%s9588_s11 + $0x4] sm:$0x1] }
 0x6bc   : > { %7182 = vmatprep.subr.msk.bf16.mxu1 %vm464_vm0, %v8130_v10 }
 0x6c1   : > { %6535 = vmatmul.mubr.msk.bf16.vlgmr.msra.gmra.mxu0 %vm464_vm0, %v8050_v7  ;;  %v2241_v7 = vld [vmem:[#allocation2 + $0x2ee] sm:$0xff] }
 0x6c2   : > { %6553 = vmatmul.mubr.msk.bf16.vlgmr.msra.gmra.mxu1 %vm464_vm0, %v8055_v61  ;;  %6555 = vmatpush3.bf16.xpose.msra.mxu0 %v8143_v11  ;;  %v2384_v61 = vld [vmem:[#allocation2 + $0x2e7] sm:$0xff]  ;;  %v2259_v26 = vpack.c.bf16 %v2241_v7, %v2240_v21 }
 0x6c3   : > { %6573 = vmatpush3.bf16.xpose.msra.mxu1 %v8146_v20  ;;  %7175 = vmatprep.subr.msk.bf16.mxu0 %vm464_vm0, %v7907_v43  ;;  %v2403_v33 = vpack.c.bf16 %v2385_v23, %v2384_v61  ;;  %v2722_v23 = vld [vmem:[#allocation2 + $0x22f] sm:$0xff] }
 0x6c4   : > { %7183 = vmatprep.subr.msk.bf16.mxu1 %vm464_vm0, %v8029_v52  ;;  %6570 = vmatprep.mubr.msk.bf16.mxu0 %vm464_vm0, %v6406_v32 }
 0x6c5   : > { %6588 = vmatprep.mubr.msk.bf16.mxu1 %vm464_vm0, %v6408_v22 }
 0x6ca   : > { %6557 = vmatpush3.bf16.xpose.msra.mxu0 %v7917_v47 }
 0x6cb   : > { %6575 = vmatpush3.bf16.xpose.msra.mxu1 %v8040_v58  ;;  %7176 = vmatprep.subr.msk.bf16.mxu0 %vm464_vm0, %v7922_v49 }
 0x6cc   : > { %7184 = vmatprep.subr.msk.bf16.mxu1 %vm464_vm0, %v8045_v60 }
 0x6d2   : > { %6559 = vmatpush3.bf16.xpose.msra.mxu0 %v7933_v63 }
 0x6d3   : > { %6577 = vmatpush3.bf16.xpose.msra.mxu1 %v8068_v12  ;;  %7177 = vmatprep.subr.msk.bf16.mxu0 %vm464_vm0, %v7938_v1 }
 0x6d4   : > { %7185 = vmatprep.subr.msk.bf16.mxu1 %vm464_vm0, %v8070_v17 }
 0x6da   : > { %6561 = vmatpush3.bf16.xpose.msra.mxu0 %v7949_v13 }
 0x6db   : > { %6579 = vmatpush3.bf16.xpose.msra.mxu1 %v8079_v24  ;;  %7178 = vmatprep.subr.msk.bf16.mxu0 %vm464_vm0, %v7954_v15 }
 0x6dc   : > { %7186 = vmatprep.subr.msk.bf16.mxu1 %vm464_vm0, %v8081_v25 }
 0x6e2   : > { %6563 = vmatpush3.bf16.xpose.msra.mxu0 %v7965_v27 }
 0x6e3   : > { %6581 = vmatpush3.bf16.xpose.msra.mxu1 %v8090_v37  ;;  %7179 = vmatprep.subr.msk.bf16.mxu0 %vm464_vm0, %v7970_v29 }
 0x6e4   : > { %7187 = vmatprep.subr.msk.bf16.mxu1 %vm464_vm0, %v8092_v38 }
 0x6ea   : > { %6565 = vmatpush3.bf16.xpose.msra.mxu0 %v7981_v41 }
 0x6eb   : > { %6583 = vmatpush3.bf16.xpose.msra.mxu1 %v8101_v56  ;;  %7180 = vmatprep.subr.msk.bf16.mxu0 %vm464_vm0, %v7986_v45 }
 0x6ec   : > { %7188 = vmatprep.subr.msk.bf16.mxu1 %vm464_vm0, %v8103_v57 }
 0x6f2   : > { %6567 = vmatpush3.bf16.xpose.msra.mxu0 %v7997_v3 }
 0x6f3   : > { %6585 = vmatpush3.bf16.xpose.msra.mxu1 %v8112_v18  ;;  %7181 = vmatprep.subr.msk.bf16.mxu0 %vm464_vm0, %v8002_v5 }
 0x6f4   : > { %7189 = vmatprep.subr.msk.bf16.mxu1 %vm464_vm0, %v8114_v19 }
 0x6fa   : > { %6569 = vmatpush3.bf16.xpose.msra.mxu0 %v8015_v31 }
 0x6fb   : > { %6587 = vmatpush3.bf16.xpose.msra.mxu1 %v1690_v36  ;;  %7190 = vmatprep.subr.msk.bf16.mxu0 %vm464_vm0, %v2259_v26  ;;  %v6412_v36 = vld [vmem:[%s9588_s11 + $0x7] sm:$0x1] }
 0x6fc   : > { %7198 = vmatprep.subr.msk.bf16.mxu1 %vm464_vm0, %v2403_v33 }
 0x701   : > { %6571 = vmatmul.mubr.msk.bf16.vlgmr.msra.gmra.mxu0 %vm464_vm0, %v6406_v32 }
 0x702   : > { %6589 = vmatmul.mubr.msk.bf16.vlgmr.msra.gmra.mxu1 %vm464_vm0, %v6408_v22  ;;  %6591 = vmatpush3.bf16.xpose.msra.mxu0 %v2285_v34  ;;  %v2707_v22 = vld [vmem:[#allocation2 + $0x147] sm:$0xff] }
 0x703   : > { %6609 = vmatpush3.bf16.xpose.msra.mxu1 %v2429_v35  ;;  %7191 = vmatprep.subr.msk.bf16.mxu0 %vm464_vm0, %v8027_v51  ;;  %v2735_v61 = vpack.c.bf16 %v2708_v62, %v2707_v22  ;;  %v2721_v34 = vld [vmem:[#allocation2 + $0x227] sm:$0xff] }
 0x704   : > { %7199 = vmatprep.subr.msk.bf16.mxu1 %vm464_vm0, %v8128_v9  ;;  %6606 = vmatprep.mubr.msk.bf16.mxu0 %vm464_vm0, %v6410_v39  ;;  %v2742_v35 = vpack.c.bf16 %v2722_v23, %v2721_v34  ;;  %v2697_v22 = vld [vmem:[#allocation2 + $0xa7] sm:$0xff] }
 0x705   : > { %6624 = vmatprep.mubr.msk.bf16.mxu1 %vm464_vm0, %v6412_v36  ;;  %v2711_v23 = vld [vmem:[#allocation2 + $0x187] sm:$0xff] }
 0x70a   : > { %6593 = vmatpush3.bf16.xpose.msra.mxu0 %v8043_v59 }
 0x70b   : > { %6611 = vmatpush3.bf16.xpose.msra.mxu1 %v8143_v11  ;;  %7192 = vmatprep.subr.msk.bf16.mxu0 %vm464_vm0, %v7909_v44  ;;  %v2528_v44 = vld [vmem:[#allocation2 + $0x2e8] sm:$0xff] }
 0x70c   : > { %7200 = vmatprep.subr.msk.bf16.mxu1 %vm464_vm0, %v7907_v43 }
 0x712   : > { %6595 = vmatpush3.bf16.xpose.msra.mxu0 %v7920_v48  ;;  %v2529_v48 = vld [vmem:[#allocation2 + $0x2f0] sm:$0xff] }
 0x713   : > { %6613 = vmatpush3.bf16.xpose.msra.mxu1 %v7917_v47  ;;  %7193 = vmatprep.subr.msk.bf16.mxu0 %vm464_vm0, %v7924_v50  ;;  %v2726_v50 = vld [vmem:[#allocation2 + $0x26f] sm:$0xff] }
 0x714   : > { %7201 = vmatprep.subr.msk.bf16.mxu1 %vm464_vm0, %v7922_v49 }
 0x71a   : > { %6597 = vmatpush3.bf16.xpose.msra.mxu0 %v7936_v0  ;;  %v2547_v0 = vpack.c.bf16 %v2529_v48, %v2528_v44  ;;  %v2720_v48 = vld [vmem:[#allocation2 + $0x20f] sm:$0xff] }
 0x71b   : > { %6615 = vmatpush3.bf16.xpose.msra.mxu1 %v7933_v63  ;;  %7194 = vmatprep.subr.msk.bf16.mxu0 %vm464_vm0, %v7940_v2  ;;  %v2725_v2 = vld [vmem:[#allocation2 + $0x267] sm:$0xff] }
 0x71c   : > { %7202 = vmatprep.subr.msk.bf16.mxu1 %vm464_vm0, %v7938_v1 }
 0x722   : > { %6599 = vmatpush3.bf16.xpose.msra.mxu0 %v7952_v14  ;;  %v2744_v14 = vpack.c.bf16 %v2726_v50, %v2725_v2  ;;  %v2719_v50 = vld [vmem:[#allocation2 + $0x207] sm:$0xff] }
 0x723   : > { %6617 = vmatpush3.bf16.xpose.msra.mxu1 %v7949_v13  ;;  %7195 = vmatprep.subr.msk.bf16.mxu0 %vm464_vm0, %v7956_v16  ;;  %v2710_v16 = vld [vmem:[#allocation2 + $0x16f] sm:$0xff]  ;;  %v2741_v2 = vpack.c.bf16 %v2720_v48, %v2719_v50 }
 0x724   : > { %7203 = vmatprep.subr.msk.bf16.mxu1 %vm464_vm0, %v7954_v15  ;;  %v2943_v50 = vld [vmem:[#allocation2 + $0x16a] sm:$0xff] }
 0x72a   : > { %6601 = vmatpush3.bf16.xpose.msra.mxu0 %v7968_v28  ;;  %v2709_v28 = vld [vmem:[#allocation2 + $0x167] sm:$0xff] }
 0x72b   : > { %6619 = vmatpush3.bf16.xpose.msra.mxu1 %v7965_v27  ;;  %7196 = vmatprep.subr.msk.bf16.mxu0 %vm464_vm0, %v7972_v30  ;;  %v2736_v30 = vpack.c.bf16 %v2710_v16, %v2709_v28  ;;  %v2718_v16 = vld [vmem:[#allocation2 + $0x1ef] sm:$0xff]  ;;  %v2717_v28 = vld [vmem:[#allocation2 + $0x1e7] sm:$0xff] }
 0x72c   : > { %7204 = vmatprep.subr.msk.bf16.mxu1 %vm464_vm0, %v7970_v29 }
 0x72d   : > { %v2770_v59 = vsel %vm464_vm0, %v2736_v30, 0 }
 0x732   : > { %6603 = vmatpush3.bf16.xpose.msra.mxu0 %v7984_v42  ;;  %v2724_v42 = vld [vmem:[#allocation2 + $0x24f] sm:$0xff] }
 0x733   : > { %6621 = vmatpush3.bf16.xpose.msra.mxu1 %v7981_v41  ;;  %7197 = vmatprep.subr.msk.bf16.mxu0 %vm464_vm0, %v7988_v46  ;;  %v2723_v46 = vld [vmem:[#allocation2 + $0x247] sm:$0xff] }
 0x734   : > { %7205 = vmatprep.subr.msk.bf16.mxu1 %vm464_vm0, %v7986_v45  ;;  %v2743_v40 = vpack.c.bf16 %v2724_v42, %v2723_v46  ;;  %v2740_v42 = vpack.c.bf16 %v2718_v16, %v2717_v28  ;;  %v2702_v46 = vld [vmem:[#allocation2 + $0xef] sm:$0xff]  ;;  %v2673_v28 = vld [vmem:[#allocation2 + $0x244] sm:$0xff] }
 0x735   : > { %v2958_v16 = vld [vmem:[#allocation2 + $0x252] sm:$0xff] }
 0x73a   : > { %6605 = vmatpush3.bf16.xpose.msra.mxu0 %v8000_v4  ;;  %v2573_v4 = vsel %vm464_vm0, %v8114_v19, 0 }
 0x73b   : > { %6623 = vmatpush3.bf16.xpose.msra.mxu1 %v7997_v3  ;;  %7206 = vmatprep.subr.msk.bf16.mxu0 %vm464_vm0, %v2547_v0 }
 0x73c   : > { %7214 = vmatprep.subr.msk.bf16.mxu1 %vm464_vm0, %v2744_v14  ;;  %v2704_v14 = vld [vmem:[#allocation2 + $0x10f] sm:$0xff] }
 0x741   : > { %v1534_v6 = vpop.f32.mrf.mxu0  ;;  %6607 = vmatmul.mubr.msk.bf16.vlgmr.msra.gmra.mxu0 %vm464_vm0, %v6410_v39  ;;  %v2706_v39 = vld [vmem:[#allocation2 + $0x12f] sm:$0xff] }
 0x742   : > { %v1626_v51 = vpop.f32.mrf.mxu1  ;;  %6625 = vmatmul.mubr.msk.bf16.vlgmr.msra.gmra.mxu1 %vm464_vm0, %v6412_v36  ;;  %6627 = vmatpush3.bf16.xpose.msra.mxu0 %v2573_v4  ;;  %v2705_v36 = vld [vmem:[#allocation2 + $0x127] sm:$0xff] }
 0x743   : > { %v8274_v55 = vadd.f32 %v1626_v51, %v1534_v6  ;;  %6645 = vmatpush3.bf16.xpose.msra.mxu1 %v2770_v59  ;;  %v1536_v8 = vpop.f32.mrf.mxu0  ;;  %7207 = vmatprep.subr.msk.bf16.mxu0 %vm464_vm0, %v8130_v10  ;;  %v2767_v10 = vsel %vm464_vm0, %v2735_v61, 0  ;;  %v2734_v44 = vpack.c.bf16 %v2706_v39, %v2705_v36  ;;  %v2715_v6 = vld [vmem:[#allocation2 + $0x1c7] sm:$0xff]  ;;  %v2716_v51 = vld [vmem:[#allocation2 + $0x1cf] sm:$0xff] }
 0x744   : > { %v1628_v19 = vpop.f32.mrf.mxu1  ;;  %7215 = vmatprep.subr.msk.bf16.mxu1 %vm464_vm0, %v2743_v40  ;;  %6642 = vmatprep.mubr.msk.bf16.mxu0 %vm464_vm0, %v8267_v53  ;;  %v2699_v4 = vld [vmem:[#allocation2 + $0xc7] sm:$0xff]  ;;  %v2700_v59 = vld [vmem:[#allocation2 + $0xcf] sm:$0xff]  ;;  %v2739_v62 = vpack.c.bf16 %v2716_v51, %v2715_v6 }
 0x745   : > { %v8279_v32 = vadd.f32 %v1628_v19, %v1536_v8  ;;  %6660 = vmatprep.mubr.msk.bf16.mxu1 %vm464_vm0, %v8272_v54  ;;  %v1538_v21 = vpop.f32.mrf.mxu0  ;;  %v2764_v0 = vsel %vm464_vm0, %v2734_v44, 0  ;;  %v2713_v19 = vld [vmem:[#allocation2 + $0x1a7] sm:$0xff] }
 0x746   : > { %v1630_v7 = vpop.f32.mrf.mxu1  ;;  %v2698_v21 = vld [vmem:[#allocation2 + $0xaf] sm:$0xff]  ;;  %v2675_v36 = vld [vmem:[#allocation2 + $0x264] sm:$0xff] }
 0x747   : > { %v1539_v26 = vpop.f32.mrf.mxu0  ;;  %v8342_v6 = vld [vmem:[%s9588_s11 + $0x9] sm:$0x1]  ;;  %v2658_v51 = vld [vmem:[#allocation2 + $0x14c] sm:$0xff] }
 0x748   : > { %v1631_v33 = vpop.f32.mrf.mxu1  ;;  %v2695_v26 = vld [vmem:[#allocation2 + $0x87] sm:$0xff] }
 0x749   : > { %v2696_v33 = vld [vmem:[#allocation2 + $0x8f] sm:$0xff] }
 0x74a   : > { %6629 = vmatpush3.bf16.xpose.msra.mxu0 %v8146_v20  ;;  %v2703_v20 = vld [vmem:[#allocation2 + $0x107] sm:$0xff] }
 0x74b   : > { %6647 = vmatpush3.bf16.xpose.msra.mxu1 %v2767_v10  ;;  %7208 = vmatprep.subr.msk.bf16.mxu0 %vm464_vm0, %v8029_v52  ;;  %v2733_v52 = vpack.c.bf16 %v2704_v14, %v2703_v20  ;;  %v2959_v10 = vld [vmem:[#allocation2 + $0x26a] sm:$0xff] }
 0x74c   : > { %7216 = vmatprep.subr.msk.bf16.mxu1 %vm464_vm0, %v2742_v35  ;;  %v2960_v35 = vld [vmem:[#allocation2 + $0x272] sm:$0xff] }
 0x74d   : > { %v2761_v30 = vsel %vm464_vm0, %v2733_v52, 0  ;;  %v8318_v48 = vpack.c.bf16 %v2960_v35, %v2959_v10  ;;  %v2674_v20 = vld [vmem:[#allocation2 + $0x24c] sm:$0xff] }
 0x74e   : > { %v2957_v52 = vld [vmem:[#allocation2 + $0x24a] sm:$0xff] }
 0x74f   : > { %v2656_v10 = vld [vmem:[#allocation2 + $0x12c] sm:$0xff] }
 0x750   : > { %v2939_v35 = vld [vmem:[#allocation2 + $0x12a] sm:$0xff] }
 0x752   : > { %6631 = vmatpush3.bf16.xpose.msra.mxu0 %v8040_v58  ;;  %v2701_v58 = vld [vmem:[#allocation2 + $0xe7] sm:$0xff] }
 0x753   : > { %6649 = vmatpush3.bf16.xpose.msra.mxu1 %v2764_v0  ;;  %7209 = vmatprep.subr.msk.bf16.mxu0 %vm464_vm0, %v8045_v60  ;;  %v2732_v60 = vpack.c.bf16 %v2702_v46, %v2701_v58  ;;  %v2944_v0 = vld [vmem:[#allocation2 + $0x172] sm:$0xff]  ;;  %v8335_v58 = vpack.c.bf16 %v2674_v20, %v2673_v28 }
 0x754   : > { %7217 = vmatprep.subr.msk.bf16.mxu1 %vm464_vm0, %v2741_v2  ;;  %v2970_v14 = vpack.c.bf16 %v2944_v0, %v2943_v50  ;;  %v2670_v0 = vld [vmem:[#allocation2 + $0x20c] sm:$0xff] }
 0x755   : > { %v2758_v40 = vsel %vm464_vm0, %v2732_v60, 0  ;;  %v8337_v60 = vpack.c.bf16 %v2958_v16, %v2957_v52 }
 0x756   : > { %v8333_v46 = vsel %vm464_vm0, %v2970_v14, 0  ;;  %v2669_v14 = vld [vmem:[#allocation2 + $0x204] sm:$0xff] }
 0x757   : > { %v8387_v16 = vpack.c.bf16 %v2670_v0, %v2669_v14  ;;  %v2933_v0 = vld [vmem:[#allocation2 + $0xca] sm:$0xff] }
 0x75a   : > { %6633 = vmatpush3.bf16.xpose.msra.mxu0 %v8068_v12  ;;  %v2731_v12 = vpack.c.bf16 %v2700_v59, %v2699_v4  ;;  %v2941_v4 = vld [vmem:[#allocation2 + $0x14a] sm:$0xff]  ;;  %v2942_v59 = vld [vmem:[#allocation2 + $0x152] sm:$0xff] }
 0x75b   : > { %6651 = vmatpush3.bf16.xpose.msra.mxu1 %v2761_v30  ;;  %7210 = vmatprep.subr.msk.bf16.mxu0 %vm464_vm0, %v8070_v17  ;;  %v2714_v17 = vld [vmem:[#allocation2 + $0x1af] sm:$0xff] }
 0x75c   : > { %7218 = vmatprep.subr.msk.bf16.mxu1 %vm464_vm0, %v2740_v42  ;;  %v2755_v8 = vsel %vm464_vm0, %v2731_v12, 0  ;;  %v2738_v7 = vpack.c.bf16 %v2714_v17, %v2713_v19 }
 0x762   : > { %6635 = vmatpush3.bf16.xpose.msra.mxu0 %v8079_v24  ;;  %v2730_v24 = vpack.c.bf16 %v2698_v21, %v2697_v22  ;;  %v2969_v21 = vpack.c.bf16 %v2942_v59, %v2941_v4 }
 0x763   : > { %6653 = vmatpush3.bf16.xpose.msra.mxu1 %v2758_v40  ;;  %7211 = vmatprep.subr.msk.bf16.mxu0 %vm464_vm0, %v8081_v25  ;;  %v2712_v25 = vld [vmem:[#allocation2 + $0x18f] sm:$0xff] }
 0x764   : > { %7219 = vmatprep.subr.msk.bf16.mxu1 %vm464_vm0, %v2739_v62  ;;  %v2752_v61 = vsel %vm464_vm0, %v2730_v24, 0  ;;  %v2737_v34 = vpack.c.bf16 %v2712_v25, %v2711_v23  ;;  %v2672_v24 = vld [vmem:[#allocation2 + $0x22c] sm:$0xff] }
 0x765   : > { %v2955_v25 = vld [vmem:[#allocation2 + $0x22a] sm:$0xff] }
 0x76a   : > { %6637 = vmatpush3.bf16.xpose.msra.mxu0 %v8090_v37  ;;  %v2729_v37 = vpack.c.bf16 %v2696_v33, %v2695_v26  ;;  %v2671_v33 = vld [vmem:[#allocation2 + $0x224] sm:$0xff] }
 0x76b   : > { %6655 = vmatpush3.bf16.xpose.msra.mxu1 %v2755_v8  ;;  %7212 = vmatprep.subr.msk.bf16.mxu0 %vm464_vm0, %v8092_v38  ;;  %v2676_v38 = vld [vmem:[#allocation2 + $0x26c] sm:$0xff] }
 0x76c   : > { %7220 = vmatprep.subr.msk.bf16.mxu1 %vm464_vm0, %v2738_v7  ;;  %v2749_v39 = vsel %vm464_vm0, %v2729_v37, 0  ;;  %v8316_v44 = vpack.c.bf16 %v2676_v38, %v2675_v36  ;;  %v8371_v37 = vpack.c.bf16 %v2672_v24, %v2671_v33  ;;  %v2655_v36 = vld [vmem:[#allocation2 + $0x124] sm:$0xff]  ;;  %v2652_v24 = vld [vmem:[#allocation2 + $0xec] sm:$0xff] }
 0x772   : > { %6639 = vmatpush3.bf16.xpose.msra.mxu0 %v8101_v56  ;;  %v2660_v56 = vld [vmem:[#allocation2 + $0x16c] sm:$0xff] }
 0x773   : > { %6657 = vmatpush3.bf16.xpose.msra.mxu1 %v2752_v61  ;;  %7213 = vmatprep.subr.msk.bf16.mxu0 %vm464_vm0, %v8103_v57  ;;  %v2659_v57 = vld [vmem:[#allocation2 + $0x164] sm:$0xff]  ;;  %v2956_v61 = vld [vmem:[#allocation2 + $0x232] sm:$0xff] }
 0x774   : > { %7221 = vmatprep.subr.msk.bf16.mxu1 %vm464_vm0, %v2737_v34  ;;  %v2686_v2 = vpack.c.bf16 %v2660_v56, %v2659_v57  ;;  %v8369_v34 = vsel %vm464_vm0, %v2969_v21, 0  ;;  %v8373_v38 = vpack.c.bf16 %v2956_v61, %v2955_v25  ;;  %v2684_v56 = vpack.c.bf16 %v2656_v10, %v2655_v36  ;;  %v2953_v57 = vld [vmem:[#allocation2 + $0x20a] sm:$0xff]  ;;  %v2936_v61 = vld [vmem:[#allocation2 + $0xf2] sm:$0xff] }
 0x775   : > { %v2935_v25 = vld [vmem:[#allocation2 + $0xea] sm:$0xff]  ;;  %v2950_v36 = vld [vmem:[#allocation2 + $0x1d2] sm:$0xff] }
 0x776   : > { %v8382_v20 = vsel %vm464_vm0, %v2684_v56, 0  ;;  %v2966_v33 = vpack.c.bf16 %v2936_v61, %v2935_v25  ;;  %v2665_v10 = vld [vmem:[#allocation2 + $0x1c4] sm:$0xff]  ;;  %v2648_v25 = vld [vmem:[#allocation2 + $0xac] sm:$0xff] }
 0x777   : > { %v2649_v56 = vld [vmem:[#allocation2 + $0xc4] sm:$0xff] }
 0x778   : > { %v8417_v14 = vsel %vm464_vm0, %v2966_v33, 0  ;;  %v2931_v61 = vld [vmem:[#allocation2 + $0xaa] sm:$0xff] }
 0x77a   : > { %6641 = vmatpush3.bf16.xpose.msra.mxu0 %v8112_v18  ;;  %v8330_v18 = vsel %vm464_vm0, %v2686_v2, 0  ;;  %v2954_v2 = vld [vmem:[#allocation2 + $0x212] sm:$0xff] }
 0x77b   : > { %6659 = vmatpush3.bf16.xpose.msra.mxu1 %v2749_v39  ;;  %7222 = vmatprep.subr.msk.bf16.mxu0 %vm464_vm0, %v8316_v44  ;;  %v2940_v39 = vld [vmem:[#allocation2 + $0x132] sm:$0xff]  ;;  %v8389_v28 = vpack.c.bf16 %v2954_v2, %v2953_v57 }
 0x77c   : > { %7230 = vmatprep.subr.msk.bf16.mxu1 %vm464_vm0, %v8318_v48  ;;  %v2968_v50 = vpack.c.bf16 %v2940_v39, %v2939_v35  ;;  %v2666_v35 = vld [vmem:[#allocation2 + $0x1cc] sm:$0xff] }
 0x77d   : > { %v2949_v39 = vld [vmem:[#allocation2 + $0x1ca] sm:$0xff]  ;;  %v2934_v57 = vld [vmem:[#allocation2 + $0xd2] sm:$0xff] }
 0x77e   : > { %v8385_v52 = vsel %vm464_vm0, %v2968_v50, 0  ;;  %v2650_v50 = vld [vmem:[#allocation2 + $0xcc] sm:$0xff] }
 0x781   : > { %v1768_v30 = vpop.f32.mrf.mxu0  ;;  %6643 = vmatmul.mubr.msk.bf16.vlgmr.msra.gmra.mxu0 %vm464_vm0, %v8267_v53  ;;  %v8347_v53 = vld [vmem:[%s9588_s11 + $0xb] sm:$0x1] }
 0x782   : > { %v1912_v42 = vpop.f32.mrf.mxu1  ;;  %6661 = vmatmul.mubr.msk.bf16.vlgmr.msra.gmra.mxu1 %vm464_vm0, %v8272_v54  ;;  %v1775_v54 = vadd.f32 %v1768_v30, %v8274_v55  ;;  %6663 = vmatpush3.bf16.xpose.msra.mxu0 %v8330_v18  ;;  %v2657_v55 = vld [vmem:[#allocation2 + $0x144] sm:$0xff]  ;;  %v2654_v30 = vld [vmem:[#allocation2 + $0x10c] sm:$0xff] }
 0x783   : > { %6681 = vmatpush3.bf16.xpose.msra.mxu1 %v8333_v46  ;;  %v1770_v40 = vpop.f32.mrf.mxu0  ;;  %7223 = vmatprep.subr.msk.bf16.mxu0 %vm464_vm0, %v8335_v58  ;;  %v2685_v22 = vpack.c.bf16 %v2658_v51, %v2657_v55  ;;  %v2653_v51 = vld [vmem:[#allocation2 + $0x104] sm:$0xff] }
 0x784   : > { %v1914_v62 = vpop.f32.mrf.mxu1  ;;  %7231 = vmatprep.subr.msk.bf16.mxu1 %vm464_vm0, %v8337_v60  ;;  %v8356_v12 = vadd.f32 %v1912_v42, %v1775_v54  ;;  %v1776_v17 = vadd.f32 %v1770_v40, %v8279_v32  ;;  %6678 = vmatprep.mubr.msk.bf16.mxu0 %vm464_vm0, %v8342_v6  ;;  %v2937_v42 = vld [vmem:[#allocation2 + $0x10a] sm:$0xff]  ;;  %v2938_v54 = vld [vmem:[#allocation2 + $0x112] sm:$0xff]  ;;  %v2683_v4 = vpack.c.bf16 %v2654_v30, %v2653_v51 }
 0x785   : > { %6696 = vmatprep.mubr.msk.bf16.mxu1 %vm464_vm0, %v8347_v53  ;;  %v1772_v8 = vpop.f32.mrf.mxu0  ;;  %v8366_v32 = vsel %vm464_vm0, %v2685_v22, 0  ;;  %v2967_v59 = vpack.c.bf16 %v2938_v54, %v2937_v42  ;;  %v2668_v40 = vld [vmem:[#allocation2 + $0x1ec] sm:$0xff]  ;;  %v2667_v55 = vld [vmem:[#allocation2 + $0x1e4] sm:$0xff]  ;;  %v2689_v30 = vpack.c.bf16 %v2666_v35, %v2665_v10  ;;  %v8419_v42 = vpack.c.bf16 %v2950_v36, %v2949_v39 }
 0x786   : > { %v1916_v19 = vpop.f32.mrf.mxu1  ;;  %v8363_v7 = vadd.f32 %v1914_v62, %v1776_v17  ;;  %v2951_v62 = vld [vmem:[#allocation2 + $0x1ea] sm:$0xff]  ;;  %v2952_v17 = vld [vmem:[#allocation2 + $0x1f2] sm:$0xff]  ;;  %v8398_v8 = vsel %vm464_vm0, %v2683_v4, 0  ;;  %v8403_v22 = vpack.c.bf16 %v2668_v40, %v2667_v55  ;;  %v2681_v54 = vpack.c.bf16 %v2650_v50, %v2649_v56 }
 0x787   : > { %v1773_v23 = vpop.f32.mrf.mxu0  ;;  %v8401_v19 = vsel %vm464_vm0, %v2967_v59, 0  ;;  %v8405_v21 = vpack.c.bf16 %v2952_v17, %v2951_v62  ;;  %v2965_v51 = vpack.c.bf16 %v2934_v57, %v2933_v0  ;;  %v2664_v4 = vld [vmem:[#allocation2 + $0x1ac] sm:$0xff]  ;;  %v2663_v55 = vld [vmem:[#allocation2 + $0x1a4] sm:$0xff] }
 0x788   : > { %v1917_v26 = vpop.f32.mrf.mxu1  ;;  %v2651_v23 = vld [vmem:[#allocation2 + $0xe4] sm:$0xff]  ;;  %v2948_v40 = vld [vmem:[#allocation2 + $0x1b2] sm:$0xff]  ;;  %v2847_v62 = vsel %vm464_vm0, %v2681_v54, 0 }
 0x789   : > { %v2682_v26 = vpack.c.bf16 %v2652_v24, %v2651_v23  ;;  %v2947_v59 = vld [vmem:[#allocation2 + $0x1aa] sm:$0xff]  ;;  %v2989_v17 = vsel %vm464_vm0, %v2965_v51, 0  ;;  %v2932_v23 = vld [vmem:[#allocation2 + $0xb2] sm:$0xff] }
 0x78a   : > { %6665 = vmatpush3.bf16.xpose.msra.mxu0 %v8366_v32  ;;  %v2647_v24 = vld [vmem:[#allocation2 + $0xa4] sm:$0xff]  ;;  %v8430_v33 = vpack.c.bf16 %v2948_v40, %v2947_v59  ;;  %v2964_v35 = vpack.c.bf16 %v2932_v23, %v2931_v61  ;;  %v2662_v39 = vld [vmem:[#allocation2 + $0x18c] sm:$0xff] }
 0x78b   : > { %6683 = vmatpush3.bf16.xpose.msra.mxu1 %v8369_v34  ;;  %7224 = vmatprep.subr.msk.bf16.mxu0 %vm464_vm0, %v8371_v37  ;;  %v8414_v2 = vsel %vm464_vm0, %v2682_v26, 0  ;;  %v8428_v26 = vpack.c.bf16 %v2664_v4, %v2663_v55  ;;  %v2680_v10 = vpack.c.bf16 %v2648_v25, %v2647_v24  ;;  %v2945_v36 = vld [vmem:[#allocation2 + $0x18a] sm:$0xff]  ;;  %v2946_v56 = vld [vmem:[#allocation2 + $0x192] sm:$0xff] }
 0x78c   : > { %7232 = vmatprep.subr.msk.bf16.mxu1 %vm464_vm0, %v8373_v38  ;;  %v2986_v0 = vsel %vm464_vm0, %v2964_v35, 0  ;;  %v2661_v57 = vld [vmem:[#allocation2 + $0x184] sm:$0xff]  ;;  %v2646_v51 = vld [vmem:[#allocation2 + $0x8c] sm:$0xff] }
 0x78d   : > { %v2844_v50 = vsel %vm464_vm0, %v2680_v10, 0  ;;  %v2645_v54 = vld [vmem:[#allocation2 + $0x84] sm:$0xff]  ;;  %v2930_v59 = vld [vmem:[#allocation2 + $0x92] sm:$0xff]  ;;  %v2687_v40 = vpack.c.bf16 %v2662_v39, %v2661_v57  ;;  %v8463_v57 = vld [vmem:[%s9588_s11 + $0xc] sm:$0x1] }
 0x78e   : > { %v2929_v4 = vld [vmem:[#allocation2 + $0x8a] sm:$0xff] }
 0x78f   : > { %v2963_v55 = vpack.c.bf16 %v2930_v59, %v2929_v4  ;;  %v3103_v24 = vld [vmem:[#allocation2 + $0x2c4] sm:$0xff]  ;;  %v3104_v25 = vld [vmem:[#allocation2 + $0x2cc] sm:$0xff] }
 0x790   : > { %v8445_v10 = vpack.c.bf16 %v3104_v25, %v3103_v24  ;;  %v3102_v35 = vld [vmem:[#allocation2 + $0x2ac] sm:$0xff]  ;;  %v3101_v39 = vld [vmem:[#allocation2 + $0x2a4] sm:$0xff] }
 0x791   : > { %v2983_v23 = vsel %vm464_vm0, %v2963_v55, 0  ;;  %v3100_v55 = vld [vmem:[#allocation2 + $0x28c] sm:$0xff] }
 0x792   : > { %6667 = vmatpush3.bf16.xpose.msra.mxu0 %v8382_v20 }
 0x793   : > { %6685 = vmatpush3.bf16.xpose.msra.mxu1 %v8385_v52  ;;  %7225 = vmatprep.subr.msk.bf16.mxu0 %vm464_vm0, %v8387_v16 }
 0x794   : > { %7233 = vmatprep.subr.msk.bf16.mxu1 %vm464_vm0, %v8389_v28 }
 0x79a   : > { %6669 = vmatpush3.bf16.xpose.msra.mxu0 %v8398_v8 }
 0x79b   : > { %6687 = vmatpush3.bf16.xpose.msra.mxu1 %v8401_v19  ;;  %7226 = vmatprep.subr.msk.bf16.mxu0 %vm464_vm0, %v8403_v22 }
 0x79c   : > { %7234 = vmatprep.subr.msk.bf16.mxu1 %vm464_vm0, %v8405_v21 }
 0x7a2   : > { %6671 = vmatpush3.bf16.xpose.msra.mxu0 %v8414_v2 }
 0x7a3   : > { %6689 = vmatpush3.bf16.xpose.msra.mxu1 %v8417_v14  ;;  %7227 = vmatprep.subr.msk.bf16.mxu0 %vm464_vm0, %v2689_v30 }
 0x7a4   : > { %7235 = vmatprep.subr.msk.bf16.mxu1 %vm464_vm0, %v8419_v42 }
 0x7aa   : > { %6673 = vmatpush3.bf16.xpose.msra.mxu0 %v2847_v62  ;;  %v8438_v62 = vpack.c.bf16 %v2946_v56, %v2945_v36 }
 0x7ab   : > { %6691 = vmatpush3.bf16.xpose.msra.mxu1 %v2989_v17  ;;  %7228 = vmatprep.subr.msk.bf16.mxu0 %vm464_vm0, %v8428_v26  ;;  %v2679_v17 = vpack.c.bf16 %v2646_v51, %v2645_v54  ;;  %v8468_v54 = vld [vmem:[%s9588_s11 + $0xd] sm:$0x1] }
 0x7ac   : > { %7236 = vmatprep.subr.msk.bf16.mxu1 %vm464_vm0, %v8430_v33 }
 0x7ad   : > { %v2841_v61 = vsel %vm464_vm0, %v2679_v17, 0 }
 0x7b2   : > { %6675 = vmatpush3.bf16.xpose.msra.mxu0 %v2844_v50  ;;  %v8456_v50 = vsel %vm464_vm0, %v2689_v30, 0 }
 0x7b3   : > { %6693 = vmatpush3.bf16.xpose.msra.mxu1 %v2986_v0  ;;  %7229 = vmatprep.subr.msk.bf16.mxu0 %vm464_vm0, %v2687_v40  ;;  %v8458_v0 = vpack.c.bf16 %v3102_v35, %v3101_v39  ;;  %v3296_v39 = vld [vmem:[#allocation2 + $0x2d2] sm:$0xff] }
 0x7b4   : > { %7237 = vmatprep.subr.msk.bf16.mxu1 %vm464_vm0, %v8438_v62 }
 0x7ba   : > { %6677 = vmatpush3.bf16.xpose.msra.mxu0 %v2841_v61  ;;  %v3099_v61 = vld [vmem:[#allocation2 + $0x284] sm:$0xff] }
 0x7bb   : > { %6695 = vmatpush3.bf16.xpose.msra.mxu1 %v2983_v23  ;;  %7238 = vmatprep.subr.msk.bf16.mxu0 %vm464_vm0, %v8445_v10  ;;  %v8486_v23 = vsel %vm464_vm0, %v8428_v26, 0  ;;  %v8488_v35 = vpack.c.bf16 %v3100_v55, %v3099_v61  ;;  %v3440_v26 = vld [vmem:[#allocation2 + $0x324] sm:$0xff]  ;;  %v3485_v55 = vsel %vm464_vm0, %v8371_v37, 0 }
 0x7bc   : > { %7246 = vmatprep.subr.msk.bf16.mxu1 %vm464_vm0, %v8128_v9 }
 0x7c1   : > { %v2056_v36 = vpop.f32.mrf.mxu0  ;;  %6679 = vmatmul.mubr.msk.bf16.vlgmr.msra.gmra.mxu0 %vm464_vm0, %v8342_v6 }
 0x7c2   : > { %v2200_v56 = vpop.f32.mrf.mxu1  ;;  %6697 = vmatmul.mubr.msk.bf16.vlgmr.msra.gmra.mxu1 %vm464_vm0, %v8347_v53  ;;  %v2063_v6 = vadd.f32 %v2056_v36, %v8356_v12  ;;  %6699 = vmatpush3.bf16.xpose.msra.mxu0 %v8456_v50 }
 0x7c3   : > { %6717 = vmatpush3.bf16.xpose.msra.mxu1 %v8143_v11  ;;  %v2058_v53 = vpop.f32.mrf.mxu0  ;;  %7239 = vmatprep.subr.msk.bf16.mxu0 %vm464_vm0, %v8458_v0 }
 0x7c4   : > { %v2202_v30 = vpop.f32.mrf.mxu1  ;;  %7247 = vmatprep.subr.msk.bf16.mxu1 %vm464_vm0, %v7907_v43  ;;  %v2207_v51 = vadd.f32 %v2200_v56, %v2063_v6  ;;  %v2064_v4 = vadd.f32 %v2058_v53, %v8363_v7  ;;  %6714 = vmatprep.mubr.msk.bf16.mxu0 %vm464_vm0, %v8463_v57  ;;  %v8497_v7 = vsel %vm464_vm0, %v2687_v40, 0  ;;  %v8529_v40 = vld [vmem:[#allocation2 + $0x2ca] sm:$0xff] }
 0x7c5   : > { %6732 = vmatprep.mubr.msk.bf16.mxu1 %vm464_vm0, %v8468_v54  ;;  %v2060_v12 = vpop.f32.mrf.mxu0  ;;  %v8532_v56 = vpack.c.bf16 %v3296_v39, %v8529_v40  ;;  %v3439_v6 = vld [vmem:[#allocation2 + $0x30c] sm:$0xff] }
 0x7c6   : > { %v2204_v59 = vpop.f32.mrf.mxu1  ;;  %v8482_v17 = vadd.f32 %v2202_v30, %v2064_v4  ;;  %v8539_v53 = vld [vmem:[#allocation2 + $0x2aa] sm:$0xff]  ;;  %v3294_v30 = vld [vmem:[#allocation2 + $0x2b2] sm:$0xff] }
 0x7c7   : > { %v2061_v24 = vpop.f32.mrf.mxu0  ;;  %v3437_v39 = vld [vmem:[#allocation2 + $0x2ec] sm:$0xff] }
 0x7c8   : > { %v2205_v25 = vpop.f32.mrf.mxu1  ;;  %v8552_v24 = vpack.c.bf16 %v3294_v30, %v8539_v53  ;;  %v3292_v30 = vld [vmem:[#allocation2 + $0x292] sm:$0xff] }
 0x7c9   : > { %v8557_v25 = vld [vmem:[%s9588_s11 + $0xe] sm:$0x1] }
 0x7ca   : > { %6701 = vmatpush3.bf16.xpose.msra.mxu0 %v8486_v23 }
 0x7cb   : > { %6719 = vmatpush3.bf16.xpose.msra.mxu1 %v7917_v47  ;;  %7240 = vmatprep.subr.msk.bf16.mxu0 %vm464_vm0, %v8488_v35 }
 0x7cc   : > { %7248 = vmatprep.subr.msk.bf16.mxu1 %vm464_vm0, %v7922_v49 }
 0x7d2   : > { %6703 = vmatpush3.bf16.xpose.msra.mxu0 %v8497_v7 }
 0x7d3   : > { %6721 = vmatpush3.bf16.xpose.msra.mxu1 %v7933_v63  ;;  %7241 = vmatprep.subr.msk.bf16.mxu0 %vm464_vm0, %v8316_v44 }
 0x7d4   : > { %7249 = vmatprep.subr.msk.bf16.mxu1 %vm464_vm0, %v7938_v1 }
 0x7da   : > { %6705 = vmatpush3.bf16.xpose.msra.mxu0 %v8330_v18 }
 0x7db   : > { %6723 = vmatpush3.bf16.xpose.msra.mxu1 %v7949_v13  ;;  %7242 = vmatprep.subr.msk.bf16.mxu0 %vm464_vm0, %v8335_v58 }
 0x7dc   : > { %7250 = vmatprep.subr.msk.bf16.mxu1 %vm464_vm0, %v7954_v15 }
 0x7e2   : > { %6707 = vmatpush3.bf16.xpose.msra.mxu0 %v8366_v32 }
 0x7e3   : > { %6725 = vmatpush3.bf16.xpose.msra.mxu1 %v7965_v27  ;;  %7243 = vmatprep.subr.msk.bf16.mxu0 %vm464_vm0, %v8371_v37 }
 0x7e4   : > { %7251 = vmatprep.subr.msk.bf16.mxu1 %vm464_vm0, %v7970_v29 }
 0x7ea   : > { %6709 = vmatpush3.bf16.xpose.msra.mxu0 %v8382_v20  ;;  %v3441_v20 = vld [vmem:[#allocation2 + $0x32c] sm:$0xff] }
 0x7eb   : > { %6727 = vmatpush3.bf16.xpose.msra.mxu1 %v7981_v41  ;;  %7244 = vmatprep.subr.msk.bf16.mxu0 %vm464_vm0, %v8387_v16  ;;  %v3459_v36 = vpack.c.bf16 %v3441_v20, %v3440_v26  ;;  %v3436_v20 = vld [vmem:[#allocation2 + $0x2e4] sm:$0xff] }
 0x7ec   : > { %7252 = vmatprep.subr.msk.bf16.mxu1 %vm464_vm0, %v7986_v45 }
 0x7f2   : > { %6711 = vmatpush3.bf16.xpose.msra.mxu0 %v8398_v8  ;;  %v3438_v8 = vld [vmem:[#allocation2 + $0x304] sm:$0xff] }
 0x7f3   : > { %6729 = vmatpush3.bf16.xpose.msra.mxu1 %v7997_v3  ;;  %7245 = vmatprep.subr.msk.bf16.mxu0 %vm464_vm0, %v8403_v22  ;;  %v3458_v4 = vpack.c.bf16 %v3439_v6, %v3438_v8  ;;  %v8577_v6 = vld [vmem:[#allocation2 + $0x28a] sm:$0xff] }
 0x7f4   : > { %7253 = vmatprep.subr.msk.bf16.mxu1 %vm464_vm0, %v8002_v5 }
 0x7fa   : > { %6713 = vmatpush3.bf16.xpose.msra.mxu0 %v8414_v2  ;;  %v8547_v2 = vsel %vm464_vm0, %v8419_v42, 0 }
 0x7fb   : > { %6731 = vmatpush3.bf16.xpose.msra.mxu1 %v8015_v31  ;;  %7254 = vmatprep.subr.msk.bf16.mxu0 %vm464_vm0, %v8532_v56 }
 0x7fc   : > { %7262 = vmatprep.subr.msk.bf16.mxu1 %vm464_vm0, %v3459_v36 }
 0x801   : > { %v2345_v12 = vpop.f32.mrf.mxu0  ;;  %6715 = vmatmul.mubr.msk.bf16.vlgmr.msra.gmra.mxu0 %vm464_vm0, %v8463_v57  ;;  %v8562_v57 = vld [vmem:[%s9588_s11 + $0xf] sm:$0x1] }
 0x802   : > { %v2489_v59 = vpop.f32.mrf.mxu1  ;;  %6733 = vmatmul.mubr.msk.bf16.vlgmr.msra.gmra.mxu1 %vm464_vm0, %v8468_v54  ;;  %v2352_v54 = vadd.f32 %v2345_v12, %v2207_v51  ;;  %6735 = vmatpush3.bf16.xpose.msra.mxu0 %v8547_v2 }
 0x803   : > { %6753 = vmatpush3.bf16.xpose.msra.mxu1 %v3485_v55  ;;  %v2347_v42 = vpop.f32.mrf.mxu0  ;;  %7255 = vmatprep.subr.msk.bf16.mxu0 %vm464_vm0, %v8552_v24  ;;  %v3482_v55 = vsel %vm464_vm0, %v8387_v16, 0 }
 0x804   : > { %v2491_v61 = vpop.f32.mrf.mxu1  ;;  %7263 = vmatprep.subr.msk.bf16.mxu1 %vm464_vm0, %v3458_v4  ;;  %v8568_v37 = vadd.f32 %v2489_v59, %v2352_v54  ;;  %v2353_v26 = vadd.f32 %v2347_v42, %v8482_v17  ;;  %6750 = vmatprep.mubr.msk.bf16.mxu0 %vm464_vm0, %v8557_v25  ;;  %v3457_v59 = vpack.c.bf16 %v3437_v39, %v3436_v20  ;;  %v8581_v17 = vsel %vm464_vm0, %v8430_v33, 0  ;;  %v3580_v39 = vld [vmem:[#allocation2 + $0x2e7] sm:$0xff] }
 0x805   : > { %6768 = vmatprep.mubr.msk.bf16.mxu1 %vm464_vm0, %v8562_v57  ;;  %v2349_v51 = vpop.f32.mrf.mxu0  ;;  %v8586_v54 = vpack.c.bf16 %v3292_v30, %v8577_v6  ;;  %v8594_v42 = vsel %vm464_vm0, %v8438_v62, 0  ;;  %v3479_v33 = vsel %vm464_vm0, %v8403_v22, 0  ;;  %v3583_v22 = vld [vmem:[#allocation2 + $0x30f] sm:$0xff] }
 0x806   : > { %v2493_v36 = vpop.f32.mrf.mxu1  ;;  %v8575_v8 = vadd.f32 %v2491_v61, %v2353_v26  ;;  %v3726_v62 = vld [vmem:[#allocation2 + $0x30a] sm:$0xff] }
 0x807   : > { %v2350_v4 = vpop.f32.mrf.mxu0  ;;  %v8651_v61 = vld [vmem:[%s9588_s11 + $0x11] sm:$0x1] }
 0x808   : > { %v2494_v12 = vpop.f32.mrf.mxu1  ;;  %v3581_v36 = vld [vmem:[#allocation2 + $0x2ef] sm:$0xff] }
 0x809   : > { %v3724_v30 = vld [vmem:[#allocation2 + $0x2ea] sm:$0xff]  ;;  %v3725_v4 = vld [vmem:[#allocation2 + $0x2f2] sm:$0xff] }
 0x80a   : > { %6737 = vmatpush3.bf16.xpose.msra.mxu0 %v8581_v17 }
 0x80b   : > { %6755 = vmatpush3.bf16.xpose.msra.mxu1 %v3482_v55  ;;  %7256 = vmatprep.subr.msk.bf16.mxu0 %vm464_vm0, %v8586_v54 }
 0x80c   : > { %7264 = vmatprep.subr.msk.bf16.mxu1 %vm464_vm0, %v3457_v59 }
 0x812   : > { %6739 = vmatpush3.bf16.xpose.msra.mxu0 %v8594_v42 }
 0x813   : > { %6757 = vmatpush3.bf16.xpose.msra.mxu1 %v3479_v33  ;;  %7257 = vmatprep.subr.msk.bf16.mxu0 %vm464_vm0, %v8318_v48  ;;  %v3584_v48 = vld [vmem:[#allocation2 + $0x327] sm:$0xff] }
 0x814   : > { %7265 = vmatprep.subr.msk.bf16.mxu1 %vm464_vm0, %v8445_v10 }
 0x81a   : > { %6741 = vmatpush3.bf16.xpose.msra.mxu0 %v8333_v46  ;;  %v3585_v46 = vld [vmem:[#allocation2 + $0x32f] sm:$0xff] }
 0x81b   : > { %6759 = vmatpush3.bf16.xpose.msra.mxu1 %v8456_v50  ;;  %7258 = vmatprep.subr.msk.bf16.mxu0 %vm464_vm0, %v8337_v60  ;;  %v3728_v60 = vld [vmem:[#allocation2 + $0x32a] sm:$0xff] }
 0x81c   : > { %7266 = vmatprep.subr.msk.bf16.mxu1 %vm464_vm0, %v8458_v0 }
 0x822   : > { %6743 = vmatpush3.bf16.xpose.msra.mxu0 %v8369_v34  ;;  %v3729_v34 = vld [vmem:[#allocation2 + $0x332] sm:$0xff] }
 0x823   : > { %6761 = vmatpush3.bf16.xpose.msra.mxu1 %v8486_v23  ;;  %7259 = vmatprep.subr.msk.bf16.mxu0 %vm464_vm0, %v8373_v38  ;;  %v3747_v16 = vpack.c.bf16 %v3729_v34, %v3728_v60  ;;  %v3770_v60 = vsel %vm464_vm0, %v8389_v28, 0  ;;  %v3565_v34 = vld [vmem:[#allocation2 + $0x1ef] sm:$0xff] }
 0x824   : > { %7267 = vmatprep.subr.msk.bf16.mxu1 %vm464_vm0, %v8488_v35 }
 0x82a   : > { %6745 = vmatpush3.bf16.xpose.msra.mxu0 %v8385_v52  ;;  %v3603_v52 = vpack.c.bf16 %v3585_v46, %v3584_v48  ;;  %v3601_v48 = vpack.c.bf16 %v3581_v36, %v3580_v39  ;;  %v3745_v46 = vpack.c.bf16 %v3725_v4, %v3724_v30  ;;  %v3559_v30 = vld [vmem:[#allocation2 + $0x18f] sm:$0xff] }
 0x82b   : > { %6763 = vmatpush3.bf16.xpose.msra.mxu1 %v8497_v7  ;;  %7260 = vmatprep.subr.msk.bf16.mxu0 %vm464_vm0, %v8389_v28  ;;  %v8646_v7 = vld [vmem:[%s9588_s11 + $0x10] sm:$0x1]  ;;  %v3562_v28 = vld [vmem:[#allocation2 + $0x1c7] sm:$0xff] }
 0x82c   : > { %7268 = vmatprep.subr.msk.bf16.mxu1 %vm464_vm0, %v8316_v44  ;;  %v3569_v44 = vld [vmem:[#allocation2 + $0x22f] sm:$0xff] }
 0x82d   : > { %v3573_v4 = vld [vmem:[#allocation2 + $0x26f] sm:$0xff] }
 0x832   : > { %6747 = vmatpush3.bf16.xpose.msra.mxu0 %v8401_v19  ;;  %v3582_v19 = vld [vmem:[#allocation2 + $0x307] sm:$0xff] }
 0x833   : > { %6765 = vmatpush3.bf16.xpose.msra.mxu1 %v8330_v18  ;;  %7261 = vmatprep.subr.msk.bf16.mxu0 %vm464_vm0, %v8405_v21  ;;  %v3568_v18 = vld [vmem:[#allocation2 + $0x227] sm:$0xff]  ;;  %v3602_v50 = vpack.c.bf16 %v3583_v22, %v3582_v19  ;;  %v3767_v22 = vsel %vm464_vm0, %v8405_v21, 0  ;;  %v3561_v21 = vld [vmem:[#allocation2 + $0x1af] sm:$0xff] }
 0x834   : > { %7269 = vmatprep.subr.msk.bf16.mxu1 %vm464_vm0, %v8335_v58  ;;  %v3727_v58 = vld [vmem:[#allocation2 + $0x312] sm:$0xff]  ;;  %v8631_v10 = vpack.c.bf16 %v3569_v44, %v3568_v18  ;;  %v3578_v44 = vld [vmem:[#allocation2 + $0x2c7] sm:$0xff] }
 0x835   : > { %v3746_v0 = vpack.c.bf16 %v3727_v58, %v3726_v62  ;;  %v3579_v18 = vld [vmem:[#allocation2 + $0x2cf] sm:$0xff] }
 0x836   : > { %v3600_v62 = vpack.c.bf16 %v3579_v18, %v3578_v44  ;;  %v3563_v58 = vld [vmem:[#allocation2 + $0x1cf] sm:$0xff] }
 0x837   : > { %v3571_v44 = vld [vmem:[#allocation2 + $0x24f] sm:$0xff] }
 0x838   : > { %v8718_v18 = vld [vmem:[#allocation2 + $0x24a] sm:$0xff] }
 0x83a   : > { %6749 = vmatpush3.bf16.xpose.msra.mxu0 %v8417_v14  ;;  %v3773_v14 = vsel %vm464_vm0, %v8373_v38, 0  ;;  %v3566_v38 = vld [vmem:[#allocation2 + $0x207] sm:$0xff] }
 0x83b   : > { %6767 = vmatpush3.bf16.xpose.msra.mxu1 %v8366_v32  ;;  %7270 = vmatprep.subr.msk.bf16.mxu0 %vm464_vm0, %v3603_v52  ;;  %v3629_v32 = vsel %vm464_vm0, %v8631_v10, 0  ;;  %v3564_v52 = vld [vmem:[#allocation2 + $0x1e7] sm:$0xff] }
 0x83c   : > { %7278 = vmatprep.subr.msk.bf16.mxu1 %vm464_vm0, %v3747_v16  ;;  %v8675_v16 = vpack.c.bf16 %v3565_v34, %v3564_v52 }
 0x83e   : > { %v3623_v19 = vsel %vm464_vm0, %v8675_v16, 0 }
 0x841   : > { %v2633_v23 = vpop.f32.mrf.mxu0  ;;  %6751 = vmatmul.mubr.msk.bf16.vlgmr.msra.gmra.mxu0 %vm464_vm0, %v8557_v25 }
 0x842   : > { %v8633_v35 = vpop.f32.mrf.mxu1  ;;  %6769 = vmatmul.mubr.msk.bf16.vlgmr.msra.gmra.mxu1 %vm464_vm0, %v8562_v57  ;;  %v8654_v25 = vadd.f32 %v2633_v23, %v8568_v37  ;;  %6771 = vmatpush3.bf16.xpose.msra.mxu0 %v3629_v32  ;;  %v3567_v57 = vld [vmem:[#allocation2 + $0x20f] sm:$0xff]  ;;  %v3576_v23 = vld [vmem:[#allocation2 + $0x2a7] sm:$0xff] }
 0x843   : > { %6789 = vmatpush3.bf16.xpose.msra.mxu1 %v3773_v14  ;;  %v2635_v26 = vpop.f32.mrf.mxu0  ;;  %7271 = vmatprep.subr.msk.bf16.mxu0 %vm464_vm0, %v3602_v50  ;;  %v8667_v59 = vpack.c.bf16 %v3567_v57, %v3566_v38  ;;  %v8684_v50 = vpack.c.bf16 %v3563_v58, %v3562_v28  ;;  %v3560_v57 = vld [vmem:[#allocation2 + $0x1a7] sm:$0xff] }
 0x844   : > { %v8656_v20 = vpop.f32.mrf.mxu1  ;;  %7279 = vmatprep.subr.msk.bf16.mxu1 %vm464_vm0, %v3746_v0  ;;  %v8661_v51 = vadd.f32 %v2635_v26, %v8575_v8  ;;  %6786 = vmatprep.mubr.msk.bf16.mxu0 %vm464_vm0, %v8646_v7  ;;  %v3577_v0 = vld [vmem:[#allocation2 + $0x2af] sm:$0xff]  ;;  %v8692_v26 = vpack.c.bf16 %v3561_v21, %v3560_v57  ;;  %v3574_v38 = vld [vmem:[#allocation2 + $0x287] sm:$0xff] }
 0x845   : > { %6804 = vmatprep.mubr.msk.bf16.mxu1 %vm464_vm0, %v8651_v61  ;;  %v2637_v37 = vpop.f32.mrf.mxu0  ;;  %v3626_v8 = vsel %vm464_vm0, %v8667_v59, 0  ;;  %v3620_v32 = vsel %vm464_vm0, %v8684_v50, 0  ;;  %v3599_v14 = vpack.c.bf16 %v3577_v0, %v3576_v23  ;;  %v3555_v0 = vld [vmem:[#allocation2 + $0x14f] sm:$0xff] }
 0x846   : > { %v2834_v12 = vpop.f32.mrf.mxu1  ;;  %v3617_v39 = vsel %vm464_vm0, %v8692_v26, 0  ;;  %v8702_v37 = vld [vmem:[#allocation2 + $0x26a] sm:$0xff] }
 0x847   : > { %v2638_v55 = vpop.f32.mrf.mxu0  ;;  %v3717_v12 = vld [vmem:[#allocation2 + $0x272] sm:$0xff]  ;;  %v8726_v23 = vld [vmem:[#allocation2 + $0x14a] sm:$0xff] }
 0x848   : > { %v2835_v33 = vpop.f32.mrf.mxu1  ;;  %v3572_v55 = vld [vmem:[#allocation2 + $0x267] sm:$0xff] }
 0x84a   : > { %6773 = vmatpush3.bf16.xpose.msra.mxu0 %v3626_v8  ;;  %v3701_v8 = vld [vmem:[#allocation2 + $0x172] sm:$0xff] }
 0x84b   : > { %6791 = vmatpush3.bf16.xpose.msra.mxu1 %v3770_v60  ;;  %7272 = vmatprep.subr.msk.bf16.mxu0 %vm464_vm0, %v3601_v48  ;;  %v8706_v48 = vpack.c.bf16 %v3573_v4, %v3572_v55  ;;  %v3556_v60 = vld [vmem:[#allocation2 + $0x167] sm:$0xff] }
 0x84c   : > { %7280 = vmatprep.subr.msk.bf16.mxu1 %vm464_vm0, %v3745_v46  ;;  %v3557_v46 = vld [vmem:[#allocation2 + $0x16f] sm:$0xff]  ;;  %v3859_v55 = vld [vmem:[#allocation2 + $0x122] sm:$0xff] }
 0x84d   : > { %v8715_v34 = vpack.c.bf16 %v3557_v46, %v3556_v60  ;;  %v3860_v4 = vld [vmem:[#allocation2 + $0x12a] sm:$0xff] }
 0x84e   : > { %v3874_v46 = vld [vmem:[#allocation2 + $0x20a] sm:$0xff] }
 0x852   : > { %6775 = vmatpush3.bf16.xpose.msra.mxu0 %v3623_v19  ;;  %v3715_v19 = vld [vmem:[#allocation2 + $0x252] sm:$0xff] }
 0x853   : > { %6793 = vmatpush3.bf16.xpose.msra.mxu1 %v3767_v22  ;;  %7273 = vmatprep.subr.msk.bf16.mxu0 %vm464_vm0, %v3600_v62  ;;  %v3570_v22 = vld [vmem:[#allocation2 + $0x247] sm:$0xff]  ;;  %v3740_v58 = vpack.c.bf16 %v3715_v19, %v8718_v18 }
 0x854   : > { %7281 = vmatprep.subr.msk.bf16.mxu1 %vm464_vm0, %v8532_v56  ;;  %v3575_v56 = vld [vmem:[#allocation2 + $0x28f] sm:$0xff]  ;;  %v8723_v28 = vpack.c.bf16 %v3571_v44, %v3570_v22 }
 0x855   : > { %v3598_v36 = vpack.c.bf16 %v3575_v56, %v3574_v38  ;;  %v3876_v56 = vld [vmem:[#allocation2 + $0x22a] sm:$0xff]  ;;  %v3875_v38 = vld [vmem:[#allocation2 + $0x222] sm:$0xff]  ;;  %v8756_v22 = vld [vmem:[%s9588_s11 + $0x13] sm:$0x1] }
 0x85a   : > { %6777 = vmatpush3.bf16.xpose.msra.mxu0 %v3620_v32  ;;  %v3699_v32 = vld [vmem:[#allocation2 + $0x152] sm:$0xff] }
 0x85b   : > { %6795 = vmatpush3.bf16.xpose.msra.mxu1 %v8547_v2  ;;  %7274 = vmatprep.subr.msk.bf16.mxu0 %vm464_vm0, %v3599_v14  ;;  %v3558_v2 = vld [vmem:[#allocation2 + $0x187] sm:$0xff]  ;;  %v3732_v57 = vpack.c.bf16 %v3699_v32, %v8726_v23 }
 0x85c   : > { %7282 = vmatprep.subr.msk.bf16.mxu1 %vm464_vm0, %v8552_v24  ;;  %v8700_v24 = vpack.c.bf16 %v3559_v30, %v3558_v2  ;;  %v3554_v14 = vld [vmem:[#allocation2 + $0x147] sm:$0xff]  ;;  %v8737_v30 = vpack.c.bf16 %v3876_v56, %v3875_v38  ;;  %v3910_v2 = vld [vmem:[#allocation2 + $0x12f] sm:$0xff] }
 0x85d   : > { %v8731_v21 = vpack.c.bf16 %v3555_v0, %v3554_v14  ;;  %v3857_v56 = vld [vmem:[#allocation2 + $0x102] sm:$0xff] }
 0x85e   : > { %v3614_v33 = vsel %vm464_vm0, %v8700_v24, 0 }
 0x862   : > { %6779 = vmatpush3.bf16.xpose.msra.mxu0 %v3617_v39  ;;  %v3608_v39 = vsel %vm464_vm0, %v8731_v21, 0 }
 0x863   : > { %6797 = vmatpush3.bf16.xpose.msra.mxu1 %v8581_v17  ;;  %7275 = vmatprep.subr.msk.bf16.mxu0 %vm464_vm0, %v3598_v36  ;;  %v3741_v17 = vpack.c.bf16 %v3717_v12, %v8702_v37  ;;  %v3752_v36 = vsel %vm464_vm0, %v3732_v57, 0  ;;  %v3909_v12 = vld [vmem:[#allocation2 + $0x127] sm:$0xff] }
 0x864   : > { %7283 = vmatprep.subr.msk.bf16.mxu1 %vm464_vm0, %v8586_v54  ;;  %v8710_v54 = vld [vmem:[#allocation2 + $0x16a] sm:$0xff] }
 0x865   : > { %v3733_v52 = vpack.c.bf16 %v3701_v8, %v8710_v54  ;;  %v3873_v8 = vld [vmem:[#allocation2 + $0x202] sm:$0xff] }
 0x866   : > { %v8751_v19 = vpack.c.bf16 %v3874_v46, %v3873_v8  ;;  %v3907_v57 = vld [vmem:[#allocation2 + $0x107] sm:$0xff]  ;;  %v3906_v46 = vld [vmem:[#allocation2 + $0xef] sm:$0xff] }
 0x867   : > { %v3755_v62 = vsel %vm464_vm0, %v3733_v52, 0  ;;  %v3856_v8 = vld [vmem:[#allocation2 + $0xea] sm:$0xff] }
 0x86a   : > { %6781 = vmatpush3.bf16.xpose.msra.mxu0 %v3614_v33  ;;  %v3936_v33 = vpack.c.bf16 %v3910_v2, %v3909_v12  ;;  %v3872_v2 = vld [vmem:[#allocation2 + $0x1ea] sm:$0xff] }
 0x86b   : > { %6799 = vmatpush3.bf16.xpose.msra.mxu1 %v8594_v42  ;;  %7276 = vmatprep.subr.msk.bf16.mxu0 %vm464_vm0, %v8706_v48  ;;  %v3611_v42 = vsel %vm464_vm0, %v8715_v34, 0 }
 0x86c   : > { %7284 = vmatprep.subr.msk.bf16.mxu1 %vm464_vm0, %v3741_v17  ;;  %v3886_v17 = vpack.c.bf16 %v3860_v4, %v3859_v55  ;;  %v3970_v44 = vsel %vm464_vm0, %v3936_v33, 0  ;;  %v3871_v55 = vld [vmem:[#allocation2 + $0x1e2] sm:$0xff] }
 0x872   : > { %6783 = vmatpush3.bf16.xpose.msra.mxu0 %v3611_v42  ;;  %v8761_v42 = vld [vmem:[%s9588_s11 + $0x12] sm:$0x1] }
 0x873   : > { %6801 = vmatpush3.bf16.xpose.msra.mxu1 %v3755_v62  ;;  %7277 = vmatprep.subr.msk.bf16.mxu0 %vm464_vm0, %v8723_v28  ;;  %v3858_v62 = vld [vmem:[#allocation2 + $0x10a] sm:$0xff] }
 0x874   : > { %7285 = vmatprep.subr.msk.bf16.mxu1 %vm464_vm0, %v3740_v58 }
 0x87a   : > { %6785 = vmatpush3.bf16.xpose.msra.mxu0 %v3608_v39 }
 0x87b   : > { %6803 = vmatpush3.bf16.xpose.msra.mxu1 %v3752_v36  ;;  %7286 = vmatprep.subr.msk.bf16.mxu0 %vm464_vm0, %v8631_v10  ;;  %v8749_v10 = vsel %vm464_vm0, %v3886_v17, 0  ;;  %v3885_v36 = vpack.c.bf16 %v3858_v62, %v3857_v56  ;;  %v8782_v17 = vpack.c.bf16 %v3872_v2, %v3871_v55  ;;  %v3870_v62 = vld [vmem:[#allocation2 + $0x1ca] sm:$0xff] }
 0x87c   : > { %7294 = vmatprep.subr.msk.bf16.mxu1 %vm464_vm0, %v8737_v30  ;;  %v3901_v55 = vld [vmem:[#allocation2 + $0xa7] sm:$0xff] }
 0x87d   : > { %v8780_v33 = vsel %vm464_vm0, %v3885_v36, 0  ;;  %v3868_v36 = vld [vmem:[#allocation2 + $0x1aa] sm:$0xff] }
 0x881   : > { %v2922_v60 = vpop.f32.mrf.mxu0  ;;  %6787 = vmatmul.mubr.msk.bf16.vlgmr.msra.gmra.mxu0 %vm464_vm0, %v8646_v7 }
 0x882   : > { %v3064_v52 = vpop.f32.mrf.mxu1  ;;  %6805 = vmatmul.mubr.msk.bf16.vlgmr.msra.gmra.mxu1 %vm464_vm0, %v8651_v61  ;;  %v2923_v7 = vadd.f32 %v2922_v60, %v8633_v35  ;;  %6807 = vmatpush3.bf16.xpose.msra.mxu0 %v3970_v44  ;;  %v3908_v61 = vld [vmem:[#allocation2 + $0x10f] sm:$0xff]  ;;  %v3905_v60 = vld [vmem:[#allocation2 + $0xe7] sm:$0xff] }
 0x883   : > { %6825 = vmatpush3.bf16.xpose.msra.mxu1 %v8749_v10  ;;  %v2924_v58 = vpop.f32.mrf.mxu0  ;;  %7287 = vmatprep.subr.msk.bf16.mxu0 %vm464_vm0, %v8667_v59  ;;  %v3935_v39 = vpack.c.bf16 %v3908_v61, %v3907_v57  ;;  %v3934_v44 = vpack.c.bf16 %v3906_v46, %v3905_v60  ;;  %v3869_v61 = vld [vmem:[#allocation2 + $0x1c2] sm:$0xff]  ;;  %v3854_v57 = vld [vmem:[#allocation2 + $0xca] sm:$0xff] }
 0x884   : > { %v3066_v0 = vpop.f32.mrf.mxu1  ;;  %7295 = vmatprep.subr.msk.bf16.mxu1 %vm464_vm0, %v8751_v19  ;;  %v8769_v32 = vadd.f32 %v3064_v52, %v2923_v7  ;;  %v2925_v14 = vadd.f32 %v2924_v58, %v8656_v20  ;;  %6822 = vmatprep.mubr.msk.bf16.mxu0 %vm464_vm0, %v8756_v22  ;;  %v3855_v52 = vld [vmem:[#allocation2 + $0xe2] sm:$0xff] }
 0x885   : > { %6840 = vmatprep.mubr.msk.bf16.mxu1 %vm464_vm0, %v8761_v42  ;;  %v2926_v35 = vpop.f32.mrf.mxu0  ;;  %v3967_v20 = vsel %vm464_vm0, %v3935_v39, 0  ;;  %v3884_v7 = vpack.c.bf16 %v3856_v8, %v3855_v52  ;;  %v3903_v58 = vld [vmem:[#allocation2 + $0xc7] sm:$0xff]  ;;  %v3964_v56 = vsel %vm464_vm0, %v3934_v44, 0 }
 0x886   : > { %v3068_v38 = vpop.f32.mrf.mxu1  ;;  %v8776_v59 = vadd.f32 %v3066_v0, %v2925_v14  ;;  %v3904_v0 = vld [vmem:[#allocation2 + $0xcf] sm:$0xff]  ;;  %v3853_v14 = vld [vmem:[#allocation2 + $0xc2] sm:$0xff] }
 0x887   : > { %v2927_v4 = vpop.f32.mrf.mxu0  ;;  %v8791_v35 = vsel %vm464_vm0, %v3884_v7, 0  ;;  %v8793_v38 = vpack.c.bf16 %v3870_v62, %v3869_v61  ;;  %v3883_v39 = vpack.c.bf16 %v3854_v57, %v3853_v14  ;;  %v3851_v46 = vld [vmem:[#allocation2 + $0xa2] sm:$0xff]  ;;  %v3852_v8 = vld [vmem:[#allocation2 + $0xaa] sm:$0xff] }
 0x888   : > { %v3069_v12 = vpop.f32.mrf.mxu1  ;;  %v3882_v52 = vpack.c.bf16 %v3852_v8, %v3851_v46  ;;  %v3866_v44 = vld [vmem:[#allocation2 + $0x18a] sm:$0xff]  ;;  %v3865_v62 = vld [vmem:[#allocation2 + $0x182] sm:$0xff] }
 0x889   : > { %v4053_v4 = vsel %vm464_vm0, %v3883_v39, 0  ;;  %v3867_v12 = vld [vmem:[#allocation2 + $0x1a2] sm:$0xff]  ;;  %v3850_v57 = vld [vmem:[#allocation2 + $0x8a] sm:$0xff] }
 0x88a   : > { %6809 = vmatpush3.bf16.xpose.msra.mxu0 %v3967_v20  ;;  %v3902_v20 = vld [vmem:[#allocation2 + $0xaf] sm:$0xff]  ;;  %v8802_v60 = vpack.c.bf16 %v3868_v36, %v3867_v12  ;;  %v4050_v61 = vsel %vm464_vm0, %v3882_v52, 0  ;;  %v3849_v14 = vld [vmem:[#allocation2 + $0x82] sm:$0xff] }
 0x88b   : > { %6827 = vmatpush3.bf16.xpose.msra.mxu1 %v8780_v33  ;;  %7288 = vmatprep.subr.msk.bf16.mxu0 %vm464_vm0, %v8675_v16  ;;  %v3933_v16 = vpack.c.bf16 %v3904_v0, %v3903_v58  ;;  %v3899_v58 = vld [vmem:[#allocation2 + $0x87] sm:$0xff]  ;;  %v3900_v0 = vld [vmem:[#allocation2 + $0x8f] sm:$0xff] }
 0x88c   : > { %7296 = vmatprep.subr.msk.bf16.mxu1 %vm464_vm0, %v8782_v17  ;;  %v3898_v12 = vld [vmem:[#allocation2 + $0x6f] sm:$0xff] }
 0x88d   : > { %v3961_v2 = vsel %vm464_vm0, %v3933_v16, 0  ;;  %v3881_v16 = vpack.c.bf16 %v3850_v57, %v3849_v14  ;;  %v4159_v14 = vld [vmem:[#allocation2 + $0x22c] sm:$0xff]  ;;  %v4160_v57 = vld [vmem:[#allocation2 + $0x234] sm:$0xff] }
 0x88f   : > { %v4047_v36 = vsel %vm464_vm0, %v3881_v16, 0 }
 0x892   : > { %6811 = vmatpush3.bf16.xpose.msra.mxu0 %v3964_v56  ;;  %v8810_v56 = vpack.c.bf16 %v3866_v44, %v3865_v62  ;;  %v3861_v44 = vld [vmem:[#allocation2 + $0x142] sm:$0xff] }
 0x893   : > { %6829 = vmatpush3.bf16.xpose.msra.mxu1 %v8791_v35  ;;  %7289 = vmatprep.subr.msk.bf16.mxu0 %vm464_vm0, %v8684_v50  ;;  %v3932_v50 = vpack.c.bf16 %v3902_v20, %v3901_v55  ;;  %v3847_v55 = vld [vmem:[#allocation2 + $0x62] sm:$0xff]  ;;  %v3848_v20 = vld [vmem:[#allocation2 + $0x6a] sm:$0xff] }
 0x894   : > { %7297 = vmatprep.subr.msk.bf16.mxu1 %vm464_vm0, %v8793_v38  ;;  %v3880_v8 = vpack.c.bf16 %v3848_v20, %v3847_v55  ;;  %v3845_v62 = vld [vmem:[#allocation2 + $0x42] sm:$0xff]  ;;  %v4158_v55 = vld [vmem:[#allocation2 + $0x214] sm:$0xff] }
 0x895   : > { %v3958_v7 = vsel %vm464_vm0, %v3932_v50, 0  ;;  %v8845_v20 = vld [vmem:[#allocation2 + $0x2a2] sm:$0xff] }
 0x896   : > { %v4044_v52 = vsel %vm464_vm0, %v3880_v8, 0 }
 0x89a   : > { %6813 = vmatpush3.bf16.xpose.msra.mxu0 %v3961_v2  ;;  %v3863_v2 = vld [vmem:[#allocation2 + $0x162] sm:$0xff] }
 0x89b   : > { %6831 = vmatpush3.bf16.xpose.msra.mxu1 %v4053_v4  ;;  %7290 = vmatprep.subr.msk.bf16.mxu0 %vm464_vm0, %v8692_v26  ;;  %v3931_v26 = vpack.c.bf16 %v3900_v0, %v3899_v58  ;;  %v3897_v4 = vld [vmem:[#allocation2 + $0x67] sm:$0xff]  ;;  %v8819_v46 = vpack.c.bf16 %v8710_v54, %v3863_v2  ;;  %v8828_v58 = vpack.c.bf16 %v8726_v23, %v3861_v44  ;;  %v4144_v2 = vld [vmem:[#allocation2 + $0x134] sm:$0xff] }
 0x89c   : > { %7298 = vmatprep.subr.msk.bf16.mxu1 %vm464_vm0, %v8802_v60  ;;  %v3846_v54 = vld [vmem:[#allocation2 + $0x4a] sm:$0xff]  ;;  %v8838_v23 = vpack.c.bf16 %v4160_v57, %v4159_v14  ;;  %v4321_v44 = vpack.c.bf16 %v8539_v53, %v8845_v20 }
 0x89d   : > { %v3955_v39 = vsel %vm464_vm0, %v3931_v26, 0  ;;  %v3879_v0 = vpack.c.bf16 %v3846_v54, %v3845_v62  ;;  %v8834_v26 = vld [vmem:[#allocation2 + $0x2c2] sm:$0xff] }
 0x8a2   : > { %6815 = vmatpush3.bf16.xpose.msra.mxu0 %v3958_v7  ;;  %v3895_v7 = vld [vmem:[#allocation2 + $0x47] sm:$0xff] }
 0x8a3   : > { %6833 = vmatpush3.bf16.xpose.msra.mxu1 %v4050_v61  ;;  %7291 = vmatprep.subr.msk.bf16.mxu0 %vm464_vm0, %v8700_v24  ;;  %v3930_v24 = vpack.c.bf16 %v3898_v12, %v3897_v4  ;;  %v3896_v61 = vld [vmem:[#allocation2 + $0x4f] sm:$0xff] }
 0x8a4   : > { %7299 = vmatprep.subr.msk.bf16.mxu1 %vm464_vm0, %v8810_v56  ;;  %v4157_v12 = vld [vmem:[#allocation2 + $0x20c] sm:$0xff] }
 0x8a5   : > { %v3952_v50 = vsel %vm464_vm0, %v3930_v24, 0 }
 0x8aa   : > { %6817 = vmatpush3.bf16.xpose.msra.mxu0 %v3955_v39  ;;  %v4041_v39 = vsel %vm464_vm0, %v3879_v0, 0 }
 0x8ab   : > { %6835 = vmatpush3.bf16.xpose.msra.mxu1 %v4047_v36  ;;  %7292 = vmatprep.subr.msk.bf16.mxu0 %vm464_vm0, %v8715_v34  ;;  %v3929_v34 = vpack.c.bf16 %v3896_v61, %v3895_v7  ;;  %v4322_v36 = vpack.c.bf16 %v8529_v40, %v8834_v26  ;;  %v8865_v7 = vld [vmem:[%s9588_s11 + $0x14] sm:$0x1] }
 0x8ac   : > { %7300 = vmatprep.subr.msk.bf16.mxu1 %vm464_vm0, %v8819_v46  ;;  %v4142_v61 = vld [vmem:[#allocation2 + $0x114] sm:$0xff] }
 0x8ad   : > { %v3949_v16 = vsel %vm464_vm0, %v3929_v34, 0 }
 0x8b2   : > { %6819 = vmatpush3.bf16.xpose.msra.mxu0 %v3952_v50  ;;  %v8856_v50 = vsel %vm464_vm0, %v8793_v38, 0  ;;  %v4141_v38 = vld [vmem:[#allocation2 + $0x10c] sm:$0xff] }
 0x8b3   : > { %6837 = vmatpush3.bf16.xpose.msra.mxu1 %v4044_v52  ;;  %7293 = vmatprep.subr.msk.bf16.mxu0 %vm464_vm0, %v8731_v21  ;;  %v4143_v21 = vld [vmem:[#allocation2 + $0x12c] sm:$0xff]  ;;  %v8858_v52 = vpack.c.bf16 %v4158_v55, %v4157_v12  ;;  %v4169_v14 = vpack.c.bf16 %v4142_v61, %v4141_v38  ;;  %v4297_v38 = vld [vmem:[#allocation2 + $0x262] sm:$0xff] }
 0x8b4   : > { %7301 = vmatprep.subr.msk.bf16.mxu1 %vm464_vm0, %v8828_v58  ;;  %v4170_v4 = vpack.c.bf16 %v4144_v2, %v4143_v21  ;;  %v8887_v2 = vld [vmem:[#allocation2 + $0x282] sm:$0xff]  ;;  %v4137_v61 = vld [vmem:[#allocation2 + $0xcc] sm:$0xff] }
 0x8b5   : > { %v4320_v55 = vpack.c.bf16 %v8577_v6, %v8887_v2  ;;  %v8910_v6 = vsel %vm464_vm0, %v8810_v56, 0 }
 0x8b6   : > { %v8852_v40 = vsel %vm464_vm0, %v4170_v4, 0  ;;  %v8890_v4 = vsel %vm464_vm0, %v4169_v14, 0  ;;  %v4151_v14 = vld [vmem:[#allocation2 + $0x1ac] sm:$0xff] }
 0x8ba   : > { %6821 = vmatpush3.bf16.xpose.msra.mxu0 %v3949_v16  ;;  %v4155_v16 = vld [vmem:[#allocation2 + $0x1ec] sm:$0xff] }
 0x8bb   : > { %6839 = vmatpush3.bf16.xpose.msra.mxu1 %v4041_v39  ;;  %7302 = vmatprep.subr.msk.bf16.mxu0 %vm464_vm0, %v8838_v23  ;;  %v4156_v39 = vld [vmem:[#allocation2 + $0x1f4] sm:$0xff] }
 0x8bc   : > { %7310 = vmatprep.subr.msk.bf16.mxu1 %vm464_vm0, %v4322_v36  ;;  %v8896_v12 = vpack.c.bf16 %v4156_v39, %v4155_v16  ;;  %v4152_v16 = vld [vmem:[#allocation2 + $0x1b4] sm:$0xff]  ;;  %v4295_v39 = vld [vmem:[#allocation2 + $0x242] sm:$0xff] }
 0x8c1   : > { %v3208_v24 = vpop.f32.mrf.mxu0  ;;  %6823 = vmatmul.mubr.msk.bf16.vlgmr.msra.gmra.mxu0 %vm464_vm0, %v8756_v22  ;;  %v8870_v22 = vld [vmem:[%s9588_s11 + $0x15] sm:$0x1] }
 0x8c2   : > { %v3256_v8 = vpop.f32.mrf.mxu1  ;;  %6841 = vmatmul.mubr.msk.bf16.vlgmr.msra.gmra.mxu1 %vm464_vm0, %v8761_v42  ;;  %v3215_v42 = vadd.f32 %v3208_v24, %v8769_v32  ;;  %6843 = vmatpush3.bf16.xpose.msra.mxu0 %v8852_v40  ;;  %v4139_v24 = vld [vmem:[#allocation2 + $0xec] sm:$0xff] }
 0x8c3   : > { %6861 = vmatpush3.bf16.xpose.msra.mxu1 %v8856_v50  ;;  %v3210_v62 = vpop.f32.mrf.mxu0  ;;  %7303 = vmatprep.subr.msk.bf16.mxu0 %vm464_vm0, %v8858_v52 }
 0x8c4   : > { %v3258_v53 = vpop.f32.mrf.mxu1  ;;  %7311 = vmatprep.subr.msk.bf16.mxu1 %vm464_vm0, %v4321_v44  ;;  %v8878_v54 = vadd.f32 %v3256_v8, %v3215_v42  ;;  %v3216_v34 = vadd.f32 %v3210_v62, %v8776_v59  ;;  %6858 = vmatprep.mubr.msk.bf16.mxu0 %vm464_vm0, %v8865_v7  ;;  %v8894_v59 = vsel %vm464_vm0, %v8802_v60, 0  ;;  %v4140_v8 = vld [vmem:[#allocation2 + $0xf4] sm:$0xff]  ;;  %v4153_v42 = vld [vmem:[#allocation2 + $0x1cc] sm:$0xff] }
 0x8c5   : > { %6876 = vmatprep.mubr.msk.bf16.mxu1 %vm464_vm0, %v8870_v22  ;;  %v3212_v32 = vpop.f32.mrf.mxu0  ;;  %v4168_v44 = vpack.c.bf16 %v4140_v8, %v4139_v24  ;;  %v4154_v60 = vld [vmem:[#allocation2 + $0x1d4] sm:$0xff]  ;;  %v8929_v24 = vpack.c.bf16 %v8718_v18, %v4295_v39 }
 0x8c6   : > { %v3260_v0 = vpop.f32.mrf.mxu1  ;;  %v8885_v57 = vadd.f32 %v3258_v53, %v3216_v34  ;;  %v4138_v62 = vld [vmem:[#allocation2 + $0xd4] sm:$0xff]  ;;  %v8912_v34 = vpack.c.bf16 %v4154_v60, %v4153_v42  ;;  %v8915_v32 = vpack.c.bf16 %v8702_v37, %v4297_v38  ;;  %v4339_v37 = vsel %vm464_vm0, %v8819_v46, 0  ;;  %v4133_v38 = vld [vmem:[#allocation2 + $0x8c] sm:$0xff] }
 0x8c7   : > { %v3213_v36 = vpop.f32.mrf.mxu0  ;;  %v8906_v53 = vsel %vm464_vm0, %v4168_v44, 0  ;;  %v4167_v0 = vpack.c.bf16 %v4138_v62, %v4137_v61  ;;  %v4149_v44 = vld [vmem:[#allocation2 + $0x18c] sm:$0xff]  ;;  %v4150_v42 = vld [vmem:[#allocation2 + $0x194] sm:$0xff]  ;;  %v4336_v61 = vsel %vm464_vm0, %v8828_v58, 0 }
 0x8c8   : > { %v3261_v21 = vpop.f32.mrf.mxu1  ;;  %v4135_v36 = vld [vmem:[#allocation2 + $0xac] sm:$0xff]  ;;  %v4134_v46 = vld [vmem:[#allocation2 + $0x94] sm:$0xff]  ;;  %v8938_v18 = vpack.c.bf16 %v4150_v42, %v4149_v44 }
 0x8c9   : > { %v4195_v56 = vsel %vm464_vm0, %v4167_v0, 0  ;;  %v4136_v21 = vld [vmem:[#allocation2 + $0xb4] sm:$0xff]  ;;  %v4165_v62 = vpack.c.bf16 %v4134_v46, %v4133_v38  ;;  %v4147_v0 = vld [vmem:[#allocation2 + $0x16c] sm:$0xff] }
 0x8ca   : > { %6845 = vmatpush3.bf16.xpose.msra.mxu0 %v8890_v4  ;;  %v4166_v8 = vpack.c.bf16 %v4136_v21, %v4135_v36  ;;  %v4132_v39 = vld [vmem:[#allocation2 + $0x74] sm:$0xff]  ;;  %v4145_v21 = vld [vmem:[#allocation2 + $0x14c] sm:$0xff] }
 0x8cb   : > { %6863 = vmatpush3.bf16.xpose.msra.mxu1 %v8894_v59  ;;  %7304 = vmatprep.subr.msk.bf16.mxu0 %vm464_vm0, %v8896_v12  ;;  %v4129_v44 = vld [vmem:[#allocation2 + $0x4c] sm:$0xff]  ;;  %v4130_v42 = vld [vmem:[#allocation2 + $0x54] sm:$0xff] }
 0x8cc   : > { %7312 = vmatprep.subr.msk.bf16.mxu1 %vm464_vm0, %v4320_v55  ;;  %v8926_v55 = vpack.c.bf16 %v4152_v16, %v4151_v14  ;;  %v4192_v60 = vsel %vm464_vm0, %v4166_v8, 0  ;;  %v4148_v14 = vld [vmem:[#allocation2 + $0x174] sm:$0xff]  ;;  %v4189_v16 = vsel %vm464_vm0, %v4165_v62, 0  ;;  %v4495_v38 = vld [vmem:[#allocation2 + $0x2cc] sm:$0xff] }
 0x8cd   : > { %v8945_v36 = vpack.c.bf16 %v4148_v14, %v4147_v0  ;;  %v4496_v46 = vld [vmem:[#allocation2 + $0x2d4] sm:$0xff] }
 0x8ce   : > { %v8961_v62 = vpack.c.bf16 %v4496_v46, %v4495_v38  ;;  %v4494_v0 = vld [vmem:[#allocation2 + $0x2b4] sm:$0xff] }
 0x8d2   : > { %6847 = vmatpush3.bf16.xpose.msra.mxu0 %v8906_v53 }
 0x8d3   : > { %6865 = vmatpush3.bf16.xpose.msra.mxu1 %v8910_v6  ;;  %7305 = vmatprep.subr.msk.bf16.mxu0 %vm464_vm0, %v8912_v34 }
 0x8d4   : > { %7313 = vmatprep.subr.msk.bf16.mxu1 %vm464_vm0, %v8915_v32 }
 0x8da   : > { %6849 = vmatpush3.bf16.xpose.msra.mxu0 %v4195_v56  ;;  %v4131_v56 = vld [vmem:[#allocation2 + $0x6c] sm:$0xff] }
 0x8db   : > { %6867 = vmatpush3.bf16.xpose.msra.mxu1 %v4339_v37  ;;  %7306 = vmatprep.subr.msk.bf16.mxu0 %vm464_vm0, %v8926_v55  ;;  %v4164_v58 = vpack.c.bf16 %v4132_v39, %v4131_v56  ;;  %v4146_v37 = vld [vmem:[#allocation2 + $0x154] sm:$0xff]  ;;  %v8974_v56 = vsel %vm464_vm0, %v8912_v34, 0 }
 0x8dc   : > { %7314 = vmatprep.subr.msk.bf16.mxu1 %vm464_vm0, %v8929_v24  ;;  %v8981_v39 = vld [vmem:[%s9588_s11 + $0x16] sm:$0x1] }
 0x8dd   : > { %v4186_v8 = vsel %vm464_vm0, %v4164_v58, 0  ;;  %v8986_v58 = vld [vmem:[%s9588_s11 + $0x17] sm:$0x1] }
 0x8e2   : > { %6851 = vmatpush3.bf16.xpose.msra.mxu0 %v4192_v60  ;;  %v8953_v60 = vpack.c.bf16 %v4146_v37, %v4145_v21 }
 0x8e3   : > { %6869 = vmatpush3.bf16.xpose.msra.mxu1 %v4336_v61  ;;  %7307 = vmatprep.subr.msk.bf16.mxu0 %vm464_vm0, %v8938_v18 }
 0x8e4   : > { %7315 = vmatprep.subr.msk.bf16.mxu1 %vm464_vm0, %v8737_v30 }
 0x8ea   : > { %6853 = vmatpush3.bf16.xpose.msra.mxu0 %v4189_v16 }
 0x8eb   : > { %6871 = vmatpush3.bf16.xpose.msra.mxu1 %v8749_v10  ;;  %7308 = vmatprep.subr.msk.bf16.mxu0 %vm464_vm0, %v8945_v36  ;;  %v4163_v10 = vpack.c.bf16 %v4130_v42, %v4129_v44  ;;  %v4491_v42 = vld [vmem:[#allocation2 + $0x28c] sm:$0xff] }
 0x8ec   : > { %7316 = vmatprep.subr.msk.bf16.mxu1 %vm464_vm0, %v8751_v19 }
 0x8ed   : > { %v4183_v61 = vsel %vm464_vm0, %v4163_v10, 0  ;;  %v4492_v10 = vld [vmem:[#allocation2 + $0x294] sm:$0xff] }
 0x8f2   : > { %6855 = vmatpush3.bf16.xpose.msra.mxu0 %v4186_v8 }
 0x8f3   : > { %6873 = vmatpush3.bf16.xpose.msra.mxu1 %v8780_v33  ;;  %7309 = vmatprep.subr.msk.bf16.mxu0 %vm464_vm0, %v8953_v60  ;;  %v4493_v33 = vld [vmem:[#allocation2 + $0x2ac] sm:$0xff] }
 0x8f4   : > { %7317 = vmatprep.subr.msk.bf16.mxu1 %vm464_vm0, %v8782_v17 }
 0x8fa   : > { %6857 = vmatpush3.bf16.xpose.msra.mxu0 %v4183_v61  ;;  %v9006_v61 = vsel %vm464_vm0, %v8926_v55, 0 }
 0x8fb   : > { %6875 = vmatpush3.bf16.xpose.msra.mxu1 %v8791_v35  ;;  %7318 = vmatprep.subr.msk.bf16.mxu0 %vm464_vm0, %v8128_v9  ;;  %v8976_v35 = vpack.c.bf16 %v4494_v0, %v4493_v33  ;;  %v9008_v33 = vpack.c.bf16 %v4492_v10, %v4491_v42  ;;  %v4490_v0 = vld [vmem:[#allocation2 + $0x274] sm:$0xff]  ;;  %v4639_v42 = vld [vmem:[#allocation2 + $0x34a] sm:$0xff] }
 0x8fc   : > { %7326 = vmatprep.subr.msk.bf16.mxu1 %vm464_vm0, %v8961_v62  ;;  %v4782_v10 = vld [vmem:[#allocation2 + $0x347] sm:$0xff] }
 0x901   : > { %v3400_v14 = vpop.f32.mrf.mxu0  ;;  %6859 = vmatmul.mubr.msk.bf16.vlgmr.msra.gmra.mxu0 %vm464_vm0, %v8865_v7 }
 0x902   : > { %v3545_v16 = vpop.f32.mrf.mxu1  ;;  %6877 = vmatmul.mubr.msk.bf16.vlgmr.msra.gmra.mxu1 %vm464_vm0, %v8870_v22  ;;  %v3407_v7 = vadd.f32 %v3400_v14, %v8878_v54  ;;  %6879 = vmatpush3.bf16.xpose.msra.mxu0 %v8143_v11  ;;  %v9018_v14 = vsel %vm464_vm0, %v8938_v18, 0  ;;  %v4528_v18 = vsel %vm464_vm0, %v8953_v60, 0  ;;  %v4641_v60 = vld [vmem:[#allocation2 + $0x36a] sm:$0xff] }
 0x903   : > { %6897 = vmatpush3.bf16.xpose.msra.mxu1 %v8974_v56  ;;  %v3402_v22 = vpop.f32.mrf.mxu0  ;;  %7319 = vmatprep.subr.msk.bf16.mxu0 %vm464_vm0, %v7907_v43 }
 0x904   : > { %v3547_v34 = vpop.f32.mrf.mxu1  ;;  %7327 = vmatprep.subr.msk.bf16.mxu1 %vm464_vm0, %v8976_v35  ;;  %v8995_v21 = vadd.f32 %v3545_v16, %v3407_v7  ;;  %v3408_v37 = vadd.f32 %v3402_v22, %v8885_v57  ;;  %6894 = vmatprep.mubr.msk.bf16.mxu0 %vm464_vm0, %v8981_v39  ;;  %v4489_v57 = vld [vmem:[#allocation2 + $0x26c] sm:$0xff]  ;;  %v4488_v7 = vld [vmem:[#allocation2 + $0x254] sm:$0xff]  ;;  %v4531_v22 = vsel %vm464_vm0, %v8945_v36, 0  ;;  %v4640_v36 = vld [vmem:[#allocation2 + $0x362] sm:$0xff] }
 0x905   : > { %6912 = vmatprep.mubr.msk.bf16.mxu1 %vm464_vm0, %v8986_v58  ;;  %v3404_v54 = vpop.f32.mrf.mxu0  ;;  %v9020_v55 = vpack.c.bf16 %v4490_v0, %v4489_v57  ;;  %v4487_v16 = vld [vmem:[#allocation2 + $0x24c] sm:$0xff] }
 0x906   : > { %v3549_v8 = vpop.f32.mrf.mxu1  ;;  %v9002_v44 = vadd.f32 %v3547_v34, %v3408_v37  ;;  %v9030_v34 = vpack.c.bf16 %v4488_v7, %v4487_v16  ;;  %v4784_v37 = vld [vmem:[#allocation2 + $0x367] sm:$0xff]  ;;  %v4659_v54 = vpack.c.bf16 %v4641_v60, %v4640_v36  ;;  %v4829_v7 = vsel %vm464_vm0, %v8706_v48, 0 }
 0x907   : > { %v3405_v38 = vpop.f32.mrf.mxu0  ;;  %v4636_v48 = vld [vmem:[#allocation2 + $0x322] sm:$0xff] }
 0x908   : > { %v3550_v46 = vpop.f32.mrf.mxu1  ;;  %v4783_v38 = vld [vmem:[#allocation2 + $0x34f] sm:$0xff] }
 0x909   : > { %v4802_v57 = vpack.c.bf16 %v4783_v38, %v4782_v10 }
 0x90a   : > { %6881 = vmatpush3.bf16.xpose.msra.mxu0 %v7917_v47 }
 0x90b   : > { %6899 = vmatpush3.bf16.xpose.msra.mxu1 %v9006_v61  ;;  %7320 = vmatprep.subr.msk.bf16.mxu0 %vm464_vm0, %v7922_v49 }
 0x90c   : > { %7328 = vmatprep.subr.msk.bf16.mxu1 %vm464_vm0, %v9008_v33 }
 0x912   : > { %6883 = vmatpush3.bf16.xpose.msra.mxu0 %v7933_v63 }
 0x913   : > { %6901 = vmatpush3.bf16.xpose.msra.mxu1 %v9018_v14  ;;  %7321 = vmatprep.subr.msk.bf16.mxu0 %vm464_vm0, %v7938_v1 }
 0x914   : > { %7329 = vmatprep.subr.msk.bf16.mxu1 %vm464_vm0, %v9020_v55 }
 0x91a   : > { %6885 = vmatpush3.bf16.xpose.msra.mxu0 %v7949_v13 }
 0x91b   : > { %6903 = vmatpush3.bf16.xpose.msra.mxu1 %v4531_v22  ;;  %7322 = vmatprep.subr.msk.bf16.mxu0 %vm464_vm0, %v7954_v15  ;;  %v9071_v22 = vld [vmem:[%s9588_s11 + $0x18] sm:$0x1] }
 0x91c   : > { %7330 = vmatprep.subr.msk.bf16.mxu1 %vm464_vm0, %v9030_v34 }
 0x922   : > { %6887 = vmatpush3.bf16.xpose.msra.mxu0 %v7965_v27 }
 0x923   : > { %6905 = vmatpush3.bf16.xpose.msra.mxu1 %v4528_v18  ;;  %7323 = vmatprep.subr.msk.bf16.mxu0 %vm464_vm0, %v7970_v29  ;;  %v9076_v18 = vld [vmem:[%s9588_s11 + $0x19] sm:$0x1] }
 0x924   : > { %7331 = vmatprep.subr.msk.bf16.mxu1 %vm464_vm0, %v8838_v23 }
 0x92a   : > { %6889 = vmatpush3.bf16.xpose.msra.mxu0 %v7981_v41 }
 0x92b   : > { %6907 = vmatpush3.bf16.xpose.msra.mxu1 %v8852_v40  ;;  %7324 = vmatprep.subr.msk.bf16.mxu0 %vm464_vm0, %v7986_v45  ;;  %v4785_v40 = vld [vmem:[#allocation2 + $0x36f] sm:$0xff] }
 0x92c   : > { %7332 = vmatprep.subr.msk.bf16.mxu1 %vm464_vm0, %v8858_v52  ;;  %v4803_v8 = vpack.c.bf16 %v4785_v40, %v4784_v37  ;;  %v4637_v37 = vld [vmem:[#allocation2 + $0x32a] sm:$0xff] }
 0x92d   : > { %v4780_v40 = vld [vmem:[#allocation2 + $0x327] sm:$0xff] }
 0x932   : > { %6891 = vmatpush3.bf16.xpose.msra.mxu0 %v7997_v3 }
 0x933   : > { %6909 = vmatpush3.bf16.xpose.msra.mxu1 %v8890_v4  ;;  %7325 = vmatprep.subr.msk.bf16.mxu0 %vm464_vm0, %v8002_v5  ;;  %v4638_v4 = vld [vmem:[#allocation2 + $0x342] sm:$0xff] }
 0x934   : > { %7333 = vmatprep.subr.msk.bf16.mxu1 %vm464_vm0, %v8896_v12  ;;  %v4658_v46 = vpack.c.bf16 %v4639_v42, %v4638_v4 }
 0x93a   : > { %6893 = vmatpush3.bf16.xpose.msra.mxu0 %v8015_v31 }
 0x93b   : > { %6911 = vmatpush3.bf16.xpose.msra.mxu1 %v8906_v53  ;;  %7334 = vmatprep.subr.msk.bf16.mxu0 %vm464_vm0, %v4659_v54  ;;  %v4685_v53 = vsel %vm464_vm0, %v8915_v32, 0  ;;  %v4781_v54 = vld [vmem:[#allocation2 + $0x32f] sm:$0xff] }
 0x93c   : > { %7342 = vmatprep.subr.msk.bf16.mxu1 %vm464_vm0, %v4803_v8 }
 0x941   : > { %v3689_v0 = vpop.f32.mrf.mxu0  ;;  %6895 = vmatmul.mubr.msk.bf16.vlgmr.msra.gmra.mxu0 %vm464_vm0, %v8981_v39 }
 0x942   : > { %v3833_v16 = vpop.f32.mrf.mxu1  ;;  %6913 = vmatmul.mubr.msk.bf16.vlgmr.msra.gmra.mxu1 %vm464_vm0, %v8986_v58  ;;  %v3696_v39 = vadd.f32 %v3689_v0, %v8995_v21  ;;  %6915 = vmatpush3.bf16.xpose.msra.mxu0 %v4685_v53  ;;  %v4682_v53 = vsel %vm464_vm0, %v8929_v24, 0 }
 0x943   : > { %6933 = vmatpush3.bf16.xpose.msra.mxu1 %v4829_v7  ;;  %v3691_v58 = vpop.f32.mrf.mxu0  ;;  %7335 = vmatprep.subr.msk.bf16.mxu0 %vm464_vm0, %v4658_v46  ;;  %v4657_v46 = vpack.c.bf16 %v4637_v37, %v4636_v48  ;;  %v4826_v7 = vsel %vm464_vm0, %v8723_v28, 0  ;;  %v4765_v48 = vld [vmem:[#allocation2 + $0x22f] sm:$0xff]  ;;  %v4778_v28 = vld [vmem:[#allocation2 + $0x307] sm:$0xff] }
 0x944   : > { %v3835_v36 = vpop.f32.mrf.mxu1  ;;  %7343 = vmatprep.subr.msk.bf16.mxu1 %vm464_vm0, %v4802_v57  ;;  %v3840_v32 = vadd.f32 %v3833_v16, %v3696_v39  ;;  %v3697_v60 = vadd.f32 %v3691_v58, %v9002_v44  ;;  %6930 = vmatprep.mubr.msk.bf16.mxu0 %vm464_vm0, %v9071_v22  ;;  %v4801_v57 = vpack.c.bf16 %v4781_v54, %v4780_v40  ;;  %v2642_v44 = vmax.f32 %v8654_v25, 0.0  ;;  %v4764_v25 = vld [vmem:[#allocation2 + $0x227] sm:$0xff]  ;;  %v4779_v37 = vld [vmem:[#allocation2 + $0x30f] sm:$0xff] }
 0x945   : > { %6948 = vmatprep.mubr.msk.bf16.mxu1 %vm464_vm0, %v9076_v18  ;;  %v3693_v21 = vpop.f32.mrf.mxu0  ;;  %v2643_v39 = vmax.f32 %v8661_v51, 0.0  ;;  %v4793_v51 = vpack.c.bf16 %v4765_v48, %v4764_v25  ;;  %v4800_v54 = vpack.c.bf16 %v4779_v37, %v4778_v28  ;;  %v4631_v48 = vld [vmem:[#allocation2 + $0x2ca] sm:$0xff] }
 0x946   : > { %v3837_v8 = vpop.f32.mrf.mxu1  ;;  %v3842_v4 = vmax.f32 %v3840_v32, 0.0  ;;  %v3841_v42 = vadd.f32 %v3835_v36, %v3697_v60  ;;  %v4634_v32 = vld [vmem:[#allocation2 + $0x302] sm:$0xff]  ;;  %v4635_v60 = vld [vmem:[#allocation2 + $0x30a] sm:$0xff]  ;;  %v4679_v21 = vsel %vm464_vm0, %v8737_v30, 0  ;;  %v4676_v30 = vsel %vm464_vm0, %v8751_v19, 0 }
 0x947   : > { %v3694_v10 = vpop.f32.mrf.mxu0  ;;  %v4656_v40 = vpack.c.bf16 %v4635_v60, %v4634_v32  ;;  %v4823_v8 = vsel %vm464_vm0, %v4793_v51, 0  ;;  %v4774_v25 = vld [vmem:[#allocation2 + $0x2c7] sm:$0xff]  ;;  %v4775_v32 = vld [vmem:[#allocation2 + $0x2cf] sm:$0xff]  ;;  %v4673_v60 = vsel %vm464_vm0, %v8782_v17, 0  ;;  %v4654_v19 = vpack.c.bf16 %v4631_v48, %v8834_v26 }
 0x948   : > { %v3838_v38 = vpop.f32.mrf.mxu1  ;;  %v6245_v0 = vrot.slane %v3842_v4, 6  ;;  %v3843_v16 = vmax.f32 %v3841_v42, 0.0  ;;  %v4763_v4 = vld [vmem:[#allocation2 + $0x20f] sm:$0xff]  ;;  %v4762_v42 = vld [vmem:[#allocation2 + $0x207] sm:$0xff]  ;;  %v4798_v37 = vpack.c.bf16 %v4775_v32, %v4774_v25 }
 0x949   : > { %v4632_v10 = vld [vmem:[#allocation2 + $0x2e2] sm:$0xff]  ;;  %v4633_v38 = vld [vmem:[#allocation2 + $0x2ea] sm:$0xff] }
 0x94a   : > { %v9093_v58 = vsel %vm6261_vm3, %v2642_v44, %v6245_v0  ;;  %v6246_v36 = vrot.slane %v3843_v16, 6  ;;  %6917 = vmatpush3.bf16.xpose.msra.mxu0 %v4682_v53  ;;  %v4792_v44 = vpack.c.bf16 %v4763_v4, %v4762_v42  ;;  %v4655_v0 = vpack.c.bf16 %v4633_v38, %v4632_v10  ;;  %v4758_v51 = vld [vmem:[#allocation2 + $0x1c7] sm:$0xff]  ;;  %v4757_v26 = vld [vmem:[#allocation2 + $0x1af] sm:$0xff] }
 0x94b   : > { %6935 = vmatpush3.bf16.xpose.msra.mxu1 %v4826_v7  ;;  %7336 = vmatprep.subr.msk.bf16.mxu0 %vm464_vm0, %v4657_v46  ;;  %v4776_v46 = vld [vmem:[#allocation2 + $0x2e7] sm:$0xff]  ;;  %v4761_v7 = vld [vmem:[#allocation2 + $0x1ef] sm:$0xff] }
 0x94c   : > { %7344 = vmatprep.subr.msk.bf16.mxu1 %vm464_vm0, %v4801_v57  ;;  %v9098_v24 = vsel %vm6261_vm3, %v2643_v39, %v6246_v36  ;;  %v4777_v57 = vld [vmem:[#allocation2 + $0x2ef] sm:$0xff]  ;;  %v4820_v53 = vsel %vm464_vm0, %v4792_v44, 0  ;;  %v4760_v39 = vld [vmem:[#allocation2 + $0x1e7] sm:$0xff] }
 0x94d   : > { %v4799_v16 = vpack.c.bf16 %v4777_v57, %v4776_v46  ;;  %v4791_v36 = vpack.c.bf16 %v4761_v7, %v4760_v39  ;;  %v4772_v4 = vld [vmem:[#allocation2 + $0x2a7] sm:$0xff]  ;;  %v4771_v44 = vld [vmem:[#allocation2 + $0x28f] sm:$0xff] }
 0x94e   : > { %v4756_v38 = vld [vmem:[#allocation2 + $0x1a7] sm:$0xff]  ;;  %v4929_v39 = vld [vmem:[#allocation2 + $0x374] sm:$0xff] }
 0x94f   : > { %v4817_v28 = vsel %vm464_vm0, %v4791_v36, 0  ;;  %v4789_v46 = vpack.c.bf16 %v4757_v26, %v4756_v38  ;;  %v4627_v57 = vld [vmem:[#allocation2 + $0x28a] sm:$0xff]  ;;  %v4925_v38 = vld [vmem:[#allocation2 + $0x334] sm:$0xff] }
 0x950   : > { %v4928_v7 = vld [vmem:[#allocation2 + $0x36c] sm:$0xff] }
 0x951   : > { %v4947_v25 = vpack.c.bf16 %v4929_v39, %v4928_v7  ;;  %v4924_v26 = vld [vmem:[#allocation2 + $0x32c] sm:$0xff] }
 0x952   : > { %6919 = vmatpush3.bf16.xpose.msra.mxu0 %v4679_v21  ;;  %v4629_v21 = vld [vmem:[#allocation2 + $0x2aa] sm:$0xff] }
 0x953   : > { %6937 = vmatpush3.bf16.xpose.msra.mxu1 %v4823_v8  ;;  %7337 = vmatprep.subr.msk.bf16.mxu0 %vm464_vm0, %v4656_v40  ;;  %v4759_v40 = vld [vmem:[#allocation2 + $0x1cf] sm:$0xff]  ;;  %v4653_v17 = vpack.c.bf16 %v4629_v21, %v8845_v20 }
 0x954   : > { %7345 = vmatprep.subr.msk.bf16.mxu1 %vm464_vm0, %v4800_v54  ;;  %v4790_v54 = vpack.c.bf16 %v4759_v40, %v4758_v51  ;;  %v4773_v8 = vld [vmem:[#allocation2 + $0x2af] sm:$0xff]  ;;  %v5106_v51 = vld [vmem:[#allocation2 + $0xc7] sm:$0xff] }
 0x955   : > { %v4797_v10 = vpack.c.bf16 %v4773_v8, %v4772_v4  ;;  %v4755_v20 = vld [vmem:[#allocation2 + $0x18f] sm:$0xff]  ;;  %v9140_v4 = vld [vmem:[%s9588_s11 + $0x1a] sm:$0x1] }
 0x956   : > { %v4814_v42 = vsel %vm464_vm0, %v4790_v54, 0  ;;  %v5107_v40 = vld [vmem:[#allocation2 + $0xcf] sm:$0xff] }
 0x957   : > { %v4922_v39 = vld [vmem:[#allocation2 + $0x30c] sm:$0xff] }
 0x95a   : > { %6921 = vmatpush3.bf16.xpose.msra.mxu0 %v4676_v30  ;;  %v4652_v30 = vpack.c.bf16 %v4627_v57, %v8887_v2  ;;  %v5109_v2 = vld [vmem:[#allocation2 + $0xef] sm:$0xff] }
 0x95b   : > { %6939 = vmatpush3.bf16.xpose.msra.mxu1 %v4820_v53  ;;  %7338 = vmatprep.subr.msk.bf16.mxu0 %vm464_vm0, %v4655_v0  ;;  %v4770_v0 = vld [vmem:[#allocation2 + $0x287] sm:$0xff] }
 0x95c   : > { %7346 = vmatprep.subr.msk.bf16.mxu1 %vm464_vm0, %v4799_v16  ;;  %v4811_v16 = vsel %vm464_vm0, %v4789_v46, 0  ;;  %v4796_v53 = vpack.c.bf16 %v4771_v44, %v4770_v0 }
 0x962   : > { %6923 = vmatpush3.bf16.xpose.msra.mxu0 %v4673_v60  ;;  %v4926_v60 = vld [vmem:[#allocation2 + $0x34c] sm:$0xff] }
 0x963   : > { %6941 = vmatpush3.bf16.xpose.msra.mxu1 %v4817_v28  ;;  %7339 = vmatprep.subr.msk.bf16.mxu0 %vm464_vm0, %v4654_v19  ;;  %v4927_v28 = vld [vmem:[#allocation2 + $0x354] sm:$0xff] }
 0x964   : > { %7347 = vmatprep.subr.msk.bf16.mxu1 %vm464_vm0, %v4798_v37  ;;  %v4946_v37 = vpack.c.bf16 %v4927_v28, %v4926_v60  ;;  %v5103_v60 = vld [vmem:[#allocation2 + $0x8f] sm:$0xff]  ;;  %v4967_v28 = vsel %vm464_vm0, %v8838_v23, 0 }
 0x96a   : > { %6925 = vmatpush3.bf16.xpose.msra.mxu0 %v8856_v50  ;;  %v4754_v50 = vld [vmem:[#allocation2 + $0x187] sm:$0xff] }
 0x96b   : > { %6943 = vmatpush3.bf16.xpose.msra.mxu1 %v4814_v42  ;;  %7340 = vmatprep.subr.msk.bf16.mxu0 %vm464_vm0, %v4653_v17  ;;  %v4788_v48 = vpack.c.bf16 %v4755_v20, %v4754_v50  ;;  %v9145_v42 = vld [vmem:[%s9588_s11 + $0x1c] sm:$0x1]  ;;  %v5105_v20 = vld [vmem:[#allocation2 + $0xaf] sm:$0xff]  ;;  %v4970_v50 = vsel %vm464_vm0, %v9030_v34, 0 }
 0x96c   : > { %7348 = vmatprep.subr.msk.bf16.mxu1 %vm464_vm0, %v4797_v10 }
 0x96d   : > { %v4808_v32 = vsel %vm464_vm0, %v4788_v48, 0 }
 0x972   : > { %6927 = vmatpush3.bf16.xpose.msra.mxu0 %v8894_v59  ;;  %v5108_v59 = vld [vmem:[#allocation2 + $0xe7] sm:$0xff] }
 0x973   : > { %6945 = vmatpush3.bf16.xpose.msra.mxu1 %v4811_v16  ;;  %7341 = vmatprep.subr.msk.bf16.mxu0 %vm464_vm0, %v4652_v30  ;;  %v5135_v19 = vpack.c.bf16 %v5109_v2, %v5108_v59  ;;  %v5102_v59 = vld [vmem:[#allocation2 + $0x87] sm:$0xff] }
 0x974   : > { %7349 = vmatprep.subr.msk.bf16.mxu1 %vm464_vm0, %v4796_v53  ;;  %v5104_v53 = vld [vmem:[#allocation2 + $0xa7] sm:$0xff]  ;;  %v5132_v34 = vpack.c.bf16 %v5103_v60, %v5102_v59  ;;  %v5359_v59 = vld [vmem:[#allocation2 + $0x1f6] sm:$0xff] }
 0x975   : > { %v5133_v7 = vpack.c.bf16 %v5105_v20, %v5104_v53  ;;  %v5097_v53 = vld [vmem:[#allocation2 + $0x2f] sm:$0xff] }
 0x97a   : > { %6929 = vmatpush3.bf16.xpose.msra.mxu0 %v8910_v6  ;;  %v4973_v6 = vsel %vm464_vm0, %v9020_v55, 0  ;;  %v5134_v55 = vpack.c.bf16 %v5107_v40, %v5106_v51  ;;  %v5160_v51 = vsel %vm464_vm0, %v5132_v34, 0 }
 0x97b   : > { %6947 = vmatpush3.bf16.xpose.msra.mxu1 %v4808_v32  ;;  %7350 = vmatprep.subr.msk.bf16.mxu0 %vm464_vm0, %v4947_v25  ;;  %v4923_v25 = vld [vmem:[#allocation2 + $0x314] sm:$0xff]  ;;  %v5163_v32 = vsel %vm464_vm0, %v5133_v7, 0  ;;  %v5110_v7 = vld [vmem:[#allocation2 + $0x107] sm:$0xff] }
 0x97c   : > { %7358 = vmatprep.subr.msk.bf16.mxu1 %vm464_vm0, %v4791_v36  ;;  %v5169_v36 = vsel %vm464_vm0, %v5135_v19, 0  ;;  %v5166_v30 = vsel %vm464_vm0, %v5134_v55, 0  ;;  %v4944_v2 = vpack.c.bf16 %v4923_v25, %v4922_v39  ;;  %v4921_v19 = vld [vmem:[#allocation2 + $0x2f4] sm:$0xff]  ;;  %v5114_v55 = vld [vmem:[#allocation2 + $0x147] sm:$0xff] }
 0x97d   : > { %v5094_v39 = vld [vmem:[#allocation2 + $0x7] sm:$0xff]  ;;  %v5095_v25 = vld [vmem:[#allocation2 + $0xf] sm:$0xff] }
 0x981   : > { %v4030_v21 = vpop.f32.mrf.mxu0  ;;  %6931 = vmatmul.mubr.msk.bf16.vlgmr.msra.gmra.mxu0 %vm464_vm0, %v9071_v22 }
 0x982   : > { %v4122_v8 = vpop.f32.mrf.mxu1  ;;  %6949 = vmatmul.mubr.msk.bf16.vlgmr.msra.gmra.mxu1 %vm464_vm0, %v9076_v18  ;;  %6951 = vmatpush3.bf16.xpose.msra.mxu0 %v4973_v6  ;;  %v5101_v6 = vld [vmem:[#allocation2 + $0x6f] sm:$0xff] }
 0x983   : > { %v9147_v17 = vadd.f32 %v4122_v8, %v4030_v21  ;;  %6969 = vmatpush3.bf16.xpose.msra.mxu1 %v5169_v36  ;;  %v4032_v22 = vpop.f32.mrf.mxu0  ;;  %7351 = vmatprep.subr.msk.bf16.mxu0 %vm464_vm0, %v4946_v37  ;;  %v5117_v37 = vld [vmem:[#allocation2 + $0x16f] sm:$0xff]  ;;  %v5116_v21 = vld [vmem:[#allocation2 + $0x167] sm:$0xff]  ;;  %v4964_v36 = vsel %vm464_vm0, %v8858_v52, 0 }
 0x984   : > { %v4124_v18 = vpop.f32.mrf.mxu1  ;;  %7359 = vmatprep.subr.msk.bf16.mxu1 %vm464_vm0, %v4790_v54  ;;  %6966 = vmatprep.mubr.msk.bf16.mxu0 %vm464_vm0, %v9140_v4  ;;  %v4945_v54 = vpack.c.bf16 %v4925_v38, %v4924_v26  ;;  %v5100_v8 = vld [vmem:[#allocation2 + $0x67] sm:$0xff]  ;;  %v5139_v23 = vpack.c.bf16 %v5117_v37, %v5116_v21  ;;  %v5099_v38 = vld [vmem:[#allocation2 + $0x4f] sm:$0xff] }
 0x985   : > { %v9151_v10 = vadd.f32 %v4124_v18, %v4032_v22  ;;  %6984 = vmatprep.mubr.msk.bf16.mxu1 %vm464_vm0, %v9145_v42  ;;  %v4034_v57 = vpop.f32.mrf.mxu0  ;;  %v5115_v22 = vld [vmem:[#allocation2 + $0x14f] sm:$0xff]  ;;  %v5098_v26 = vld [vmem:[#allocation2 + $0x47] sm:$0xff] }
 0x986   : > { %v4126_v44 = vpop.f32.mrf.mxu1  ;;  %v4961_v57 = vsel %vm464_vm0, %v8896_v12, 0  ;;  %v5130_v52 = vpack.c.bf16 %v5099_v38, %v5098_v26  ;;  %v5343_v37 = vld [vmem:[#allocation2 + $0xf6] sm:$0xff]  ;;  %v5072_v21 = vld [vmem:[#allocation2 + $0x1c0] sm:$0xff] }
 0x987   : > { %v4035_v0 = vpop.f32.mrf.mxu0  ;;  %v5138_v44 = vpack.c.bf16 %v5115_v22, %v5114_v55  ;;  %v5341_v22 = vld [vmem:[#allocation2 + $0xd6] sm:$0xff] }
 0x988   : > { %v4127_v16 = vpop.f32.mrf.mxu1  ;;  %v5113_v0 = vld [vmem:[#allocation2 + $0x12f] sm:$0xff] }
 0x989   : > { %v5154_v16 = vsel %vm464_vm0, %v5130_v52, 0  ;;  %v9215_v52 = vld [vmem:[%s9588_s11 + $0x1b] sm:$0x1] }
 0x98a   : > { %6953 = vmatpush3.bf16.xpose.msra.mxu0 %v4970_v50 }
 0x98b   : > { %6971 = vmatpush3.bf16.xpose.msra.mxu1 %v5166_v30  ;;  %7352 = vmatprep.subr.msk.bf16.mxu0 %vm464_vm0, %v4945_v54  ;;  %v5112_v30 = vld [vmem:[#allocation2 + $0x127] sm:$0xff] }
 0x98c   : > { %7360 = vmatprep.subr.msk.bf16.mxu1 %vm464_vm0, %v4789_v46  ;;  %v4920_v46 = vld [vmem:[#allocation2 + $0x2ec] sm:$0xff]  ;;  %v5137_v20 = vpack.c.bf16 %v5113_v0, %v5112_v30 }
 0x98d   : > { %v4943_v40 = vpack.c.bf16 %v4921_v19, %v4920_v46  ;;  %v5096_v54 = vld [vmem:[#allocation2 + $0x27] sm:$0xff] }
 0x98e   : > { %v5129_v12 = vpack.c.bf16 %v5097_v53, %v5096_v54  ;;  %v5342_v19 = vld [vmem:[#allocation2 + $0xee] sm:$0xff] }
 0x990   : > { %v5151_v50 = vsel %vm464_vm0, %v5129_v12, 0 }
 0x992   : > { %6955 = vmatpush3.bf16.xpose.msra.mxu0 %v4967_v28  ;;  %v5074_v28 = vld [vmem:[#allocation2 + $0x1e0] sm:$0xff] }
 0x993   : > { %6973 = vmatpush3.bf16.xpose.msra.mxu1 %v5163_v32  ;;  %7353 = vmatprep.subr.msk.bf16.mxu0 %vm464_vm0, %v4944_v2  ;;  %v5358_v2 = vld [vmem:[#allocation2 + $0x1ee] sm:$0xff] }
 0x994   : > { %7361 = vmatprep.subr.msk.bf16.mxu1 %vm464_vm0, %v4788_v48  ;;  %v5131_v48 = vpack.c.bf16 %v5101_v6, %v5100_v8  ;;  %v9191_v46 = vpack.c.bf16 %v5359_v59, %v5358_v2  ;;  %v5073_v8 = vld [vmem:[#allocation2 + $0x1c8] sm:$0xff]  ;;  %v5054_v2 = vld [vmem:[#allocation2 + $0xa0] sm:$0xff] }
 0x995   : > { %v5356_v6 = vld [vmem:[#allocation2 + $0x1ce] sm:$0xff] }
 0x996   : > { %v5157_v18 = vsel %vm464_vm0, %v5131_v48, 0  ;;  %v5057_v48 = vld [vmem:[#allocation2 + $0xc8] sm:$0xff] }
 0x997   : > { %v5055_v59 = vld [vmem:[#allocation2 + $0xa8] sm:$0xff] }
 0x99a   : > { %6957 = vmatpush3.bf16.xpose.msra.mxu0 %v4964_v36  ;;  %v5357_v36 = vld [vmem:[#allocation2 + $0x1d6] sm:$0xff] }
 0x99b   : > { %6975 = vmatpush3.bf16.xpose.msra.mxu1 %v5160_v51  ;;  %7354 = vmatprep.subr.msk.bf16.mxu0 %vm464_vm0, %v4943_v40  ;;  %v5369_v40 = vpack.c.bf16 %v5343_v37, %v5342_v19  ;;  %v5083_v37 = vpack.c.bf16 %v5055_v59, %v5054_v2  ;;  %v5065_v2 = vld [vmem:[#allocation2 + $0x148] sm:$0xff] }
 0x99c   : > { %7362 = vmatprep.subr.msk.bf16.mxu1 %vm464_vm0, %v5139_v23  ;;  %v5056_v23 = vld [vmem:[#allocation2 + $0xc0] sm:$0xff]  ;;  %v5348_v59 = vld [vmem:[#allocation2 + $0x14e] sm:$0xff] }
 0x99d   : > { %v9206_v38 = vsel %vm464_vm0, %v5369_v40, 0  ;;  %v5084_v30 = vpack.c.bf16 %v5057_v48, %v5056_v23  ;;  %v5352_v40 = vld [vmem:[#allocation2 + $0x18e] sm:$0xff]  ;;  %v5052_v23 = vld [vmem:[#allocation2 + $0x80] sm:$0xff] }
 0x99e   : > { %v5053_v48 = vld [vmem:[#allocation2 + $0x88] sm:$0xff] }
 0x9a2   : > { %6959 = vmatpush3.bf16.xpose.msra.mxu0 %v4961_v57  ;;  %v9208_v57 = vpack.c.bf16 %v5073_v8, %v5072_v21  ;;  %v5353_v21 = vld [vmem:[#allocation2 + $0x196] sm:$0xff]  ;;  %v5255_v8 = vsel %vm464_vm0, %v5083_v37, 0 }
 0x9a3   : > { %6977 = vmatpush3.bf16.xpose.msra.mxu1 %v5157_v18  ;;  %7355 = vmatprep.subr.msk.bf16.mxu0 %vm464_vm0, %v8961_v62  ;;  %v5111_v62 = vld [vmem:[#allocation2 + $0x10f] sm:$0xff] }
 0x9a4   : > { %7363 = vmatprep.subr.msk.bf16.mxu1 %vm464_vm0, %v5138_v44  ;;  %v5136_v32 = vpack.c.bf16 %v5111_v62, %v5110_v7  ;;  %v9210_v44 = vpack.c.bf16 %v5357_v36, %v5356_v6  ;;  %v5354_v7 = vld [vmem:[#allocation2 + $0x1ae] sm:$0xff]  ;;  %v5068_v36 = vld [vmem:[#allocation2 + $0x180] sm:$0xff] }
 0x9aa   : > { %6961 = vmatpush3.bf16.xpose.msra.mxu0 %v8974_v56  ;;  %v5128_v56 = vpack.c.bf16 %v5095_v25, %v5094_v39  ;;  %v5355_v39 = vld [vmem:[#allocation2 + $0x1b6] sm:$0xff] }
 0x9ab   : > { %6979 = vmatpush3.bf16.xpose.msra.mxu1 %v5154_v16  ;;  %7356 = vmatprep.subr.msk.bf16.mxu0 %vm464_vm0, %v8976_v35  ;;  %v5075_v35 = vld [vmem:[#allocation2 + $0x1e8] sm:$0xff]  ;;  %v9242_v19 = vpack.c.bf16 %v5355_v39, %v5354_v7 }
 0x9ac   : > { %7364 = vmatprep.subr.msk.bf16.mxu1 %vm464_vm0, %v5137_v20  ;;  %v5148_v60 = vsel %vm464_vm0, %v5128_v56, 0  ;;  %v9189_v34 = vpack.c.bf16 %v5075_v35, %v5074_v28  ;;  %v5258_v56 = vsel %vm464_vm0, %v5084_v30, 0  ;;  %v5339_v28 = vld [vmem:[#allocation2 + $0xb6] sm:$0xff]  ;;  %v5350_v30 = vld [vmem:[#allocation2 + $0x16e] sm:$0xff] }
 0x9ad   : > { %v5051_v7 = vld [vmem:[#allocation2 + $0x68] sm:$0xff] }
 0x9ae   : > { %v5334_v39 = vld [vmem:[#allocation2 + $0x6e] sm:$0xff] }
 0x9b2   : > { %6963 = vmatpush3.bf16.xpose.msra.mxu0 %v9006_v61  ;;  %v5059_v61 = vld [vmem:[#allocation2 + $0xe8] sm:$0xff] }
 0x9b3   : > { %6981 = vmatpush3.bf16.xpose.msra.mxu1 %v5151_v50  ;;  %7357 = vmatprep.subr.msk.bf16.mxu0 %vm464_vm0, %v9008_v33  ;;  %v5058_v33 = vld [vmem:[#allocation2 + $0xe0] sm:$0xff]  ;;  %v5071_v50 = vld [vmem:[#allocation2 + $0x1a8] sm:$0xff] }
 0x9b4   : > { %7365 = vmatprep.subr.msk.bf16.mxu1 %vm464_vm0, %v5136_v32  ;;  %v5085_v51 = vpack.c.bf16 %v5059_v61, %v5058_v33 }
 0x9b6   : > { %v9203_v26 = vsel %vm464_vm0, %v5085_v51, 0  ;;  %v5069_v51 = vld [vmem:[#allocation2 + $0x188] sm:$0xff] }
 0x9ba   : > { %6965 = vmatpush3.bf16.xpose.msra.mxu0 %v9018_v14  ;;  %v5340_v14 = vld [vmem:[#allocation2 + $0xce] sm:$0xff] }
 0x9bb   : > { %6983 = vmatpush3.bf16.xpose.msra.mxu1 %v5148_v60  ;;  %7366 = vmatprep.subr.msk.bf16.mxu0 %vm464_vm0, %v9189_v34  ;;  %v5368_v54 = vpack.c.bf16 %v5341_v22, %v5340_v14  ;;  %v5338_v60 = vld [vmem:[#allocation2 + $0xae] sm:$0xff]  ;;  %v5337_v22 = vld [vmem:[#allocation2 + $0x96] sm:$0xff] }
 0x9bc   : > { %7374 = vmatprep.subr.msk.bf16.mxu1 %vm464_vm0, %v9191_v46  ;;  %v5367_v33 = vpack.c.bf16 %v5339_v28, %v5338_v60  ;;  %v5336_v14 = vld [vmem:[#allocation2 + $0x8e] sm:$0xff]  ;;  %v5349_v60 = vld [vmem:[#allocation2 + $0x156] sm:$0xff] }
 0x9bd   : > { %v5400_v35 = vsel %vm464_vm0, %v5368_v54, 0  ;;  %v5351_v54 = vld [vmem:[#allocation2 + $0x176] sm:$0xff] }
 0x9be   : > { %v5397_v6 = vsel %vm464_vm0, %v5367_v33, 0  ;;  %v5064_v33 = vld [vmem:[#allocation2 + $0x140] sm:$0xff] }
 0x9c1   : > { %v4264_v18 = vpop.f32.mrf.mxu0  ;;  %6967 = vmatmul.mubr.msk.bf16.vlgmr.msra.gmra.mxu0 %vm464_vm0, %v9140_v4  ;;  %v9220_v4 = vld [vmem:[%s9588_s11 + $0x1d] sm:$0x1] }
 0x9c2   : > { %v4408_v55 = vpop.f32.mrf.mxu1  ;;  %6985 = vmatmul.mubr.msk.bf16.vlgmr.msra.gmra.mxu1 %vm464_vm0, %v9145_v42  ;;  %v4271_v42 = vadd.f32 %v4264_v18, %v9147_v17  ;;  %6987 = vmatpush3.bf16.xpose.msra.mxu0 %v9203_v26  ;;  %v9250_v18 = vpack.c.bf16 %v5069_v51, %v5068_v36  ;;  %v5048_v51 = vld [vmem:[#allocation2 + $0x40] sm:$0xff]  ;;  %v9272_v36 = vpack.c.bf16 %v5349_v60, %v5348_v59 }
 0x9c3   : > { %7005 = vmatpush3.bf16.xpose.msra.mxu1 %v9206_v38  ;;  %v4266_v0 = vpop.f32.mrf.mxu0  ;;  %7367 = vmatprep.subr.msk.bf16.mxu0 %vm464_vm0, %v9208_v57 }
 0x9c4   : > { %v4410_v16 = vpop.f32.mrf.mxu1  ;;  %7375 = vmatprep.subr.msk.bf16.mxu1 %vm464_vm0, %v9210_v44  ;;  %v9229_v53 = vadd.f32 %v4408_v55, %v4271_v42  ;;  %v4272_v20 = vadd.f32 %v4266_v0, %v9151_v10  ;;  %7002 = vmatprep.mubr.msk.bf16.mxu0 %vm464_vm0, %v9215_v52  ;;  %v5070_v10 = vld [vmem:[#allocation2 + $0x1a0] sm:$0xff]  ;;  %v9252_v55 = vpack.c.bf16 %v5353_v21, %v5352_v40  ;;  %v5049_v40 = vld [vmem:[#allocation2 + $0x48] sm:$0xff] }
 0x9c5   : > { %7020 = vmatprep.mubr.msk.bf16.mxu1 %vm464_vm0, %v9220_v4  ;;  %v4268_v17 = vpop.f32.mrf.mxu0  ;;  %v9240_v61 = vpack.c.bf16 %v5071_v50, %v5070_v10  ;;  %v5082_v42 = vpack.c.bf16 %v5053_v48, %v5052_v23  ;;  %v5366_v0 = vpack.c.bf16 %v5337_v22, %v5336_v14  ;;  %v5050_v50 = vld [vmem:[#allocation2 + $0x60] sm:$0xff]  ;;  %v5332_v21 = vld [vmem:[#allocation2 + $0x4e] sm:$0xff]  ;;  %v5080_v23 = vpack.c.bf16 %v5049_v40, %v5048_v51  ;;  %v5329_v40 = vld [vmem:[#allocation2 + $0x16] sm:$0xff] }
 0x9c6   : > { %v4412_v12 = vpop.f32.mrf.mxu1  ;;  %v9236_v62 = vadd.f32 %v4410_v16, %v4272_v20  ;;  %v5067_v16 = vld [vmem:[#allocation2 + $0x168] sm:$0xff] }
 0x9c7   : > { %v4269_v25 = vpop.f32.mrf.mxu0  ;;  %v5252_v20 = vsel %vm464_vm0, %v5082_v42, 0  ;;  %v5394_v17 = vsel %vm464_vm0, %v5366_v0, 0  ;;  %v5066_v12 = vld [vmem:[#allocation2 + $0x160] sm:$0xff]  ;;  %v5063_v14 = vld [vmem:[#allocation2 + $0x128] sm:$0xff]  ;;  %v5347_v42 = vld [vmem:[#allocation2 + $0x136] sm:$0xff]  ;;  %v5246_v0 = vsel %vm464_vm0, %v5080_v23, 0 }
 0x9c8   : > { %v4413_v32 = vpop.f32.mrf.mxu1  ;;  %v5335_v25 = vld [vmem:[#allocation2 + $0x76] sm:$0xff]  ;;  %v5346_v22 = vld [vmem:[#allocation2 + $0x12e] sm:$0xff] }
 0x9c9   : > { %v9260_v32 = vpack.c.bf16 %v5067_v16, %v5066_v12  ;;  %v5365_v10 = vpack.c.bf16 %v5335_v25, %v5334_v39  ;;  %v5331_v12 = vld [vmem:[#allocation2 + $0x36] sm:$0xff]  ;;  %v5328_v51 = vld [vmem:[#allocation2 + $0xe] sm:$0xff] }
 0x9ca   : > { %6989 = vmatpush3.bf16.xpose.msra.mxu0 %v5258_v56  ;;  %v9262_v56 = vpack.c.bf16 %v5351_v54, %v5350_v30  ;;  %v5062_v30 = vld [vmem:[#allocation2 + $0x120] sm:$0xff] }
 0x9cb   : > { %7007 = vmatpush3.bf16.xpose.msra.mxu1 %v5400_v35  ;;  %7368 = vmatprep.subr.msk.bf16.mxu0 %vm464_vm0, %v9240_v61  ;;  %v5081_v35 = vpack.c.bf16 %v5051_v7, %v5050_v50  ;;  %v5391_v37 = vsel %vm464_vm0, %v5365_v10, 0  ;;  %v5046_v54 = vld [vmem:[#allocation2 + $0x20] sm:$0xff]  ;;  %v9280_v50 = vpack.c.bf16 %v5063_v14, %v5062_v30  ;;  %v9282_v7 = vpack.c.bf16 %v5347_v42, %v5346_v22  ;;  %v5344_v10 = vld [vmem:[#allocation2 + $0x10e] sm:$0xff] }
 0x9cc   : > { %7376 = vmatprep.subr.msk.bf16.mxu1 %vm464_vm0, %v9242_v19  ;;  %v5502_v14 = vld [vmem:[#allocation2 + $0x2c0] sm:$0xff]  ;;  %v5503_v22 = vld [vmem:[#allocation2 + $0x2c8] sm:$0xff] }
 0x9cd   : > { %v5249_v28 = vsel %vm464_vm0, %v5081_v35, 0  ;;  %v5061_v35 = vld [vmem:[#allocation2 + $0x108] sm:$0xff] }
 0x9ce   : > { %v5501_v30 = vld [vmem:[#allocation2 + $0x2a8] sm:$0xff] }
 0x9d2   : > { %6991 = vmatpush3.bf16.xpose.msra.mxu0 %v5255_v8  ;;  %v5333_v8 = vld [vmem:[#allocation2 + $0x56] sm:$0xff] }
 0x9d3   : > { %7009 = vmatpush3.bf16.xpose.msra.mxu1 %v5397_v6  ;;  %7369 = vmatprep.subr.msk.bf16.mxu0 %vm464_vm0, %v9250_v18  ;;  %v9270_v6 = vpack.c.bf16 %v5065_v2, %v5064_v33  ;;  %v5364_v48 = vpack.c.bf16 %v5333_v8, %v5332_v21  ;;  %v5345_v2 = vld [vmem:[#allocation2 + $0x116] sm:$0xff]  ;;  %v5045_v33 = vld [vmem:[#allocation2 + $0x8] sm:$0xff] }
 0x9d4   : > { %7377 = vmatprep.subr.msk.bf16.mxu1 %vm464_vm0, %v9252_v55  ;;  %v9292_v8 = vpack.c.bf16 %v5345_v2, %v5344_v10 }
 0x9d5   : > { %v5388_v16 = vsel %vm464_vm0, %v5364_v48, 0  ;;  %v5362_v48 = vpack.c.bf16 %v5329_v40, %v5328_v51  ;;  %v5496_v51 = vld [vmem:[#allocation2 + $0x260] sm:$0xff]  ;;  %v5541_v40 = vsel %vm464_vm0, %v9250_v18, 0 }
 0x9d6   : > { %v5492_v18 = vld [vmem:[#allocation2 + $0x220] sm:$0xff] }
 0x9da   : > { %6993 = vmatpush3.bf16.xpose.msra.mxu0 %v5252_v20  ;;  %v5047_v20 = vld [vmem:[#allocation2 + $0x28] sm:$0xff] }
 0x9db   : > { %7011 = vmatpush3.bf16.xpose.msra.mxu1 %v5394_v17  ;;  %7370 = vmatprep.subr.msk.bf16.mxu0 %vm464_vm0, %v9260_v32  ;;  %v5330_v17 = vld [vmem:[#allocation2 + $0x2e] sm:$0xff]  ;;  %v5079_v39 = vpack.c.bf16 %v5047_v20, %v5046_v54  ;;  %v5500_v54 = vld [vmem:[#allocation2 + $0x2a0] sm:$0xff] }
 0x9dc   : > { %7378 = vmatprep.subr.msk.bf16.mxu1 %vm464_vm0, %v9262_v56  ;;  %v5363_v25 = vpack.c.bf16 %v5331_v12, %v5330_v17  ;;  %v9312_v12 = vsel %vm464_vm0, %v9208_v57, 0 }
 0x9dd   : > { %v5243_v59 = vsel %vm464_vm0, %v5079_v39, 0  ;;  %v9314_v39 = vpack.c.bf16 %v5501_v30, %v5500_v54 }
 0x9de   : > { %v5385_v60 = vsel %vm464_vm0, %v5363_v25, 0  ;;  %v9324_v25 = vld [vmem:[%s9588_s11 + $0x1f] sm:$0x1] }
 0x9e2   : > { %6995 = vmatpush3.bf16.xpose.msra.mxu0 %v5249_v28  ;;  %v5060_v28 = vld [vmem:[#allocation2 + $0x100] sm:$0xff] }
 0x9e3   : > { %7013 = vmatpush3.bf16.xpose.msra.mxu1 %v5391_v37  ;;  %7371 = vmatprep.subr.msk.bf16.mxu0 %vm464_vm0, %v9270_v6  ;;  %v5044_v37 = vld [vmem:[#allocation2] sm:$0xff]  ;;  %v9290_v21 = vpack.c.bf16 %v5061_v35, %v5060_v28 }
 0x9e4   : > { %7379 = vmatprep.subr.msk.bf16.mxu1 %vm464_vm0, %v9272_v36  ;;  %v5078_v23 = vpack.c.bf16 %v5045_v33, %v5044_v37  ;;  %v5498_v37 = vld [vmem:[#allocation2 + $0x280] sm:$0xff] }
 0x9e6   : > { %v5240_v42 = vsel %vm464_vm0, %v5078_v23, 0 }
 0x9ea   : > { %6997 = vmatpush3.bf16.xpose.msra.mxu0 %v5246_v0  ;;  %v5382_v0 = vsel %vm464_vm0, %v5362_v48, 0 }
 0x9eb   : > { %7015 = vmatpush3.bf16.xpose.msra.mxu1 %v5388_v16  ;;  %7372 = vmatprep.subr.msk.bf16.mxu0 %vm464_vm0, %v9280_v50  ;;  %v9300_v16 = vpack.c.bf16 %v5503_v22, %v5502_v14 }
 0x9ec   : > { %7380 = vmatprep.subr.msk.bf16.mxu1 %vm464_vm0, %v9282_v7 }
 0x9f2   : > { %6999 = vmatpush3.bf16.xpose.msra.mxu0 %v5243_v59  ;;  %v5499_v59 = vld [vmem:[#allocation2 + $0x288] sm:$0xff] }
 0x9f3   : > { %7017 = vmatpush3.bf16.xpose.msra.mxu1 %v5385_v60  ;;  %7373 = vmatprep.subr.msk.bf16.mxu0 %vm464_vm0, %v9290_v21  ;;  %v9344_v33 = vpack.c.bf16 %v5499_v59, %v5498_v37 }
 0x9f4   : > { %7381 = vmatprep.subr.msk.bf16.mxu1 %vm464_vm0, %v9292_v8 }
 0x9fa   : > { %7001 = vmatpush3.bf16.xpose.msra.mxu0 %v5240_v42 }
 0x9fb   : > { %7019 = vmatpush3.bf16.xpose.msra.mxu1 %v5382_v0  ;;  %7382 = vmatprep.subr.msk.bf16.mxu0 %vm464_vm0, %v9300_v16 }
 0x9fc   : > { %7390 = vmatprep.subr.msk.bf16.mxu1 %vm464_vm0, %v8128_v9  ;;  %v9319_v9 = vld [vmem:[%s9588_s11 + $0x1e] sm:$0x1] }
 0xa01   : > { %v4456_v20 = vpop.f32.mrf.mxu0  ;;  %7003 = vmatmul.mubr.msk.bf16.vlgmr.msra.gmra.mxu0 %vm464_vm0, %v9215_v52 }
 0xa02   : > { %v4600_v17 = vpop.f32.mrf.mxu1  ;;  %7021 = vmatmul.mubr.msk.bf16.vlgmr.msra.gmra.mxu1 %vm464_vm0, %v9220_v4  ;;  %v4463_v52 = vadd.f32 %v4456_v20, %v9229_v53  ;;  %7023 = vmatpush3.bf16.xpose.msra.mxu0 %v9312_v12 }
 0xa03   : > { %7041 = vmatpush3.bf16.xpose.msra.mxu1 %v8143_v11  ;;  %v4458_v57 = vpop.f32.mrf.mxu0  ;;  %7383 = vmatprep.subr.msk.bf16.mxu0 %vm464_vm0, %v9314_v39 }
 0xa04   : > { %v4602_v4 = vpop.f32.mrf.mxu1  ;;  %7391 = vmatprep.subr.msk.bf16.mxu1 %vm464_vm0, %v7907_v43  ;;  %v9333_v35 = vadd.f32 %v4600_v17, %v4463_v52  ;;  %v4464_v10 = vadd.f32 %v4458_v57, %v9236_v62  ;;  %7038 = vmatprep.mubr.msk.bf16.mxu0 %vm464_vm0, %v9319_v9  ;;  %v5544_v43 = vsel %vm464_vm0, %v9240_v61, 0  ;;  %v5497_v62 = vld [vmem:[#allocation2 + $0x268] sm:$0xff]  ;;  %v5494_v61 = vld [vmem:[#allocation2 + $0x240] sm:$0xff] }
 0xa05   : > { %7056 = vmatprep.mubr.msk.bf16.mxu1 %vm464_vm0, %v9324_v25  ;;  %v4460_v53 = vpop.f32.mrf.mxu0  ;;  %v9353_v23 = vpack.c.bf16 %v5497_v62, %v5496_v51  ;;  %v9414_v52 = vld [vmem:[%s9588_s11 + $0x20] sm:$0x1]  ;;  %v5881_v51 = vsel %vm464_vm0, %v9344_v33, 0 }
 0xa06   : > { %v4604_v11 = vpop.f32.mrf.mxu1  ;;  %v9340_v2 = vadd.f32 %v4602_v4, %v4464_v10  ;;  %v5835_v10 = vld [vmem:[#allocation2 + $0x360] sm:$0xff]  ;;  %v5836_v53 = vld [vmem:[#allocation2 + $0x368] sm:$0xff] }
 0xa07   : > { %v4461_v60 = vpop.f32.mrf.mxu0  ;;  %v5856_v62 = vpack.c.bf16 %v5836_v53, %v5835_v10 }
 0xa08   : > { %v4605_v28 = vpop.f32.mrf.mxu1  ;;  %v5690_v60 = vld [vmem:[#allocation2 + $0x28e] sm:$0xff] }
 0xa09   : > { %v5691_v28 = vld [vmem:[#allocation2 + $0x296] sm:$0xff] }
 0xa0a   : > { %7025 = vmatpush3.bf16.xpose.msra.mxu0 %v5544_v43 }
 0xa0b   : > { %7043 = vmatpush3.bf16.xpose.msra.mxu1 %v7917_v47  ;;  %7384 = vmatprep.subr.msk.bf16.mxu0 %vm464_vm0, %v9344_v33  ;;  %v5495_v47 = vld [vmem:[#allocation2 + $0x248] sm:$0xff]  ;;  %v5878_v33 = vsel %vm464_vm0, %v9353_v23, 0 }
 0xa0c   : > { %7392 = vmatprep.subr.msk.bf16.mxu1 %vm464_vm0, %v7922_v49  ;;  %v5538_v49 = vsel %vm464_vm0, %v9260_v32, 0  ;;  %v9362_v48 = vpack.c.bf16 %v5495_v47, %v5494_v61  ;;  %v5490_v32 = vld [vmem:[#allocation2 + $0x200] sm:$0xff]  ;;  %v5834_v61 = vld [vmem:[#allocation2 + $0x348] sm:$0xff] }
 0xa0d   : > { %v5833_v47 = vld [vmem:[#allocation2 + $0x340] sm:$0xff] }
 0xa12   : > { %7027 = vmatpush3.bf16.xpose.msra.mxu0 %v5541_v40  ;;  %v9438_v40 = vpack.c.bf16 %v5691_v28, %v5690_v60 }
 0xa13   : > { %7045 = vmatpush3.bf16.xpose.msra.mxu1 %v7933_v63  ;;  %7385 = vmatprep.subr.msk.bf16.mxu0 %vm464_vm0, %v9353_v23  ;;  %v5493_v63 = vld [vmem:[#allocation2 + $0x228] sm:$0xff]  ;;  %v5875_v23 = vsel %vm464_vm0, %v9362_v48, 0 }
 0xa14   : > { %7393 = vmatprep.subr.msk.bf16.mxu1 %vm464_vm0, %v7938_v1  ;;  %v5535_v1 = vsel %vm464_vm0, %v9270_v6, 0  ;;  %v9371_v14 = vpack.c.bf16 %v5493_v63, %v5492_v18  ;;  %v5694_v6 = vld [vmem:[#allocation2 + $0x2ce] sm:$0xff]  ;;  %v5689_v63 = vld [vmem:[#allocation2 + $0x276] sm:$0xff]  ;;  %v5855_v18 = vpack.c.bf16 %v5834_v61, %v5833_v47 }
 0xa1a   : > { %7029 = vmatpush3.bf16.xpose.msra.mxu0 %v5538_v49  ;;  %v5688_v49 = vld [vmem:[#allocation2 + $0x26e] sm:$0xff] }
 0xa1b   : > { %7047 = vmatpush3.bf16.xpose.msra.mxu1 %v7949_v13  ;;  %7386 = vmatprep.subr.msk.bf16.mxu0 %vm464_vm0, %v9362_v48  ;;  %v5491_v13 = vld [vmem:[#allocation2 + $0x208] sm:$0xff]  ;;  %v5872_v48 = vsel %vm464_vm0, %v9371_v14, 0 }
 0xa1c   : > { %7394 = vmatprep.subr.msk.bf16.mxu1 %vm464_vm0, %v7954_v15  ;;  %v5532_v15 = vsel %vm464_vm0, %v9280_v50, 0  ;;  %v9380_v22 = vpack.c.bf16 %v5491_v13, %v5490_v32  ;;  %v5695_v50 = vld [vmem:[#allocation2 + $0x2d6] sm:$0xff]  ;;  %v5831_v13 = vld [vmem:[#allocation2 + $0x320] sm:$0xff]  ;;  %v5832_v32 = vld [vmem:[#allocation2 + $0x328] sm:$0xff] }
 0xa1d   : > { %v9394_v0 = vpack.c.bf16 %v5695_v50, %v5694_v6  ;;  %v5829_v6 = vld [vmem:[#allocation2 + $0x300] sm:$0xff]  ;;  %v5830_v50 = vld [vmem:[#allocation2 + $0x308] sm:$0xff] }
 0xa22   : > { %7031 = vmatpush3.bf16.xpose.msra.mxu0 %v5535_v1  ;;  %v9447_v1 = vpack.c.bf16 %v5689_v63, %v5688_v49  ;;  %v5979_v49 = vld [vmem:[#allocation2 + $0x367] sm:$0xff] }
 0xa23   : > { %7049 = vmatpush3.bf16.xpose.msra.mxu1 %v7965_v27  ;;  %7387 = vmatprep.subr.msk.bf16.mxu0 %vm464_vm0, %v9371_v14  ;;  %v5529_v27 = vsel %vm464_vm0, %v9290_v21, 0  ;;  %v5692_v21 = vld [vmem:[#allocation2 + $0x2ae] sm:$0xff]  ;;  %v5869_v14 = vsel %vm464_vm0, %v9380_v22, 0 }
 0xa24   : > { %7395 = vmatprep.subr.msk.bf16.mxu1 %vm464_vm0, %v7970_v29  ;;  %v5839_v29 = vld [vmem:[#allocation2 + $0x3a0] sm:$0xff] }
 0xa2a   : > { %7033 = vmatpush3.bf16.xpose.msra.mxu0 %v5532_v15  ;;  %v5686_v15 = vld [vmem:[#allocation2 + $0x24e] sm:$0xff] }
 0xa2b   : > { %7051 = vmatpush3.bf16.xpose.msra.mxu1 %v7981_v41  ;;  %7388 = vmatprep.subr.msk.bf16.mxu0 %vm464_vm0, %v9380_v22  ;;  %v5840_v41 = vld [vmem:[#allocation2 + $0x3a8] sm:$0xff] }
 0xa2c   : > { %7396 = vmatprep.subr.msk.bf16.mxu1 %vm464_vm0, %v7986_v45  ;;  %v5858_v42 = vpack.c.bf16 %v5840_v41, %v5839_v29  ;;  %v5837_v45 = vld [vmem:[#allocation2 + $0x380] sm:$0xff]  ;;  %v5854_v29 = vpack.c.bf16 %v5832_v32, %v5831_v13  ;;  %v5984_v22 = vld [vmem:[#allocation2 + $0x3af] sm:$0xff] }
 0xa2d   : > { %v6124_v13 = vld [vmem:[#allocation2 + $0x376] sm:$0xff] }
 0xa32   : > { %7035 = vmatpush3.bf16.xpose.msra.mxu0 %v5529_v27  ;;  %v5687_v27 = vld [vmem:[#allocation2 + $0x256] sm:$0xff] }
 0xa33   : > { %7053 = vmatpush3.bf16.xpose.msra.mxu1 %v7997_v3  ;;  %7389 = vmatprep.subr.msk.bf16.mxu0 %vm464_vm0, %v9189_v34  ;;  %v5838_v3 = vld [vmem:[#allocation2 + $0x388] sm:$0xff]  ;;  %v9456_v41 = vpack.c.bf16 %v5687_v27, %v5686_v15 }
 0xa34   : > { %7397 = vmatprep.subr.msk.bf16.mxu1 %vm464_vm0, %v8002_v5  ;;  %v5693_v5 = vld [vmem:[#allocation2 + $0x2b6] sm:$0xff]  ;;  %v5857_v30 = vpack.c.bf16 %v5838_v3, %v5837_v45  ;;  %v5853_v3 = vpack.c.bf16 %v5830_v50, %v5829_v6 }
 0xa35   : > { %v9409_v17 = vpack.c.bf16 %v5693_v5, %v5692_v21  ;;  %v5685_v45 = vld [vmem:[#allocation2 + $0x236] sm:$0xff]  ;;  %v5827_v5 = vld [vmem:[#allocation2 + $0x2e0] sm:$0xff] }
 0xa3a   : > { %7037 = vmatpush3.bf16.xpose.msra.mxu0 %v9203_v26  ;;  %v5884_v26 = vsel %vm464_vm0, %v9314_v39, 0 }
 0xa3b   : > { %7055 = vmatpush3.bf16.xpose.msra.mxu1 %v8015_v31  ;;  %7398 = vmatprep.subr.msk.bf16.mxu0 %vm464_vm0, %v9394_v0  ;;  %v5739_v31 = vsel %vm464_vm0, %v9210_v44, 0 }
 0xa3c   : > { %7406 = vmatprep.subr.msk.bf16.mxu1 %vm464_vm0, %v5858_v42  ;;  %v5684_v42 = vld [vmem:[#allocation2 + $0x22e] sm:$0xff] }
 0xa3d   : > { %v9465_v21 = vpack.c.bf16 %v5685_v45, %v5684_v42 }
 0xa41   : > { %v4745_v54 = vpop.f32.mrf.mxu0  ;;  %7039 = vmatmul.mubr.msk.bf16.vlgmr.msra.gmra.mxu0 %vm464_vm0, %v9319_v9  ;;  %v9419_v9 = vld [vmem:[%s9588_s11 + $0x21] sm:$0x1] }
 0xa42   : > { %v4889_v20 = vpop.f32.mrf.mxu1  ;;  %7057 = vmatmul.mubr.msk.bf16.vlgmr.msra.gmra.mxu1 %vm464_vm0, %v9324_v25  ;;  %v4752_v25 = vadd.f32 %v4745_v54, %v9333_v35  ;;  %7059 = vmatpush3.bf16.xpose.msra.mxu0 %v5739_v31  ;;  %v5682_v54 = vld [vmem:[#allocation2 + $0x20e] sm:$0xff] }
 0xa43   : > { %7077 = vmatpush3.bf16.xpose.msra.mxu1 %v5884_v26  ;;  %v4747_v44 = vpop.f32.mrf.mxu0  ;;  %7399 = vmatprep.subr.msk.bf16.mxu0 %vm464_vm0, %v9409_v17 }
 0xa44   : > { %v4891_v57 = vpop.f32.mrf.mxu1  ;;  %7407 = vmatprep.subr.msk.bf16.mxu1 %vm464_vm0, %v5857_v30  ;;  %v9425_v39 = vadd.f32 %v4889_v20, %v4752_v25  ;;  %v4753_v4 = vadd.f32 %v4747_v44, %v9340_v2  ;;  %7074 = vmatprep.mubr.msk.bf16.mxu0 %vm464_vm0, %v9414_v52  ;;  %v5736_v2 = vsel %vm464_vm0, %v9242_v19, 0  ;;  %v5733_v19 = vsel %vm464_vm0, %v9252_v55, 0  ;;  %v5828_v30 = vld [vmem:[#allocation2 + $0x2e8] sm:$0xff]  ;;  %v5683_v20 = vld [vmem:[#allocation2 + $0x216] sm:$0xff] }
 0xa45   : > { %7092 = vmatprep.mubr.msk.bf16.mxu1 %vm464_vm0, %v9419_v9  ;;  %v4749_v35 = vpop.f32.mrf.mxu0  ;;  %v5730_v55 = vsel %vm464_vm0, %v9262_v56, 0  ;;  %v5727_v56 = vsel %vm464_vm0, %v9272_v36, 0  ;;  %v5852_v31 = vpack.c.bf16 %v5828_v30, %v5827_v5  ;;  %v5724_v36 = vsel %vm464_vm0, %v9282_v7, 0  ;;  %v5983_v7 = vld [vmem:[#allocation2 + $0x3a7] sm:$0xff] }
 0xa46   : > { %v4893_v11 = vpop.f32.mrf.mxu1  ;;  %v9432_v59 = vadd.f32 %v4891_v57, %v4753_v4  ;;  %v9474_v26 = vpack.c.bf16 %v5683_v20, %v5682_v54  ;;  %v5721_v25 = vsel %vm464_vm0, %v9292_v8, 0  ;;  %v5866_v44 = vsel %vm464_vm0, %v9189_v34, 0  ;;  %v6127_v57 = vld [vmem:[#allocation2 + $0x3ae] sm:$0xff]  ;;  %v6128_v4 = vld [vmem:[#allocation2 + $0x3b6] sm:$0xff] }
 0xa47   : > { %v4750_v37 = vpop.f32.mrf.mxu0  ;;  %v6002_v10 = vpack.c.bf16 %v5984_v22, %v5983_v7  ;;  %v6146_v53 = vpack.c.bf16 %v6128_v4, %v6127_v57  ;;  %v5968_v8 = vld [vmem:[#allocation2 + $0x2af] sm:$0xff]  ;;  %v5967_v34 = vld [vmem:[#allocation2 + $0x2a7] sm:$0xff] }
 0xa48   : > { %v4894_v43 = vpop.f32.mrf.mxu1  ;;  %v5982_v35 = vld [vmem:[#allocation2 + $0x38f] sm:$0xff]  ;;  %v5994_v60 = vpack.c.bf16 %v5968_v8, %v5967_v34  ;;  %v5963_v5 = vld [vmem:[#allocation2 + $0x267] sm:$0xff] }
 0xa49   : > { %v6125_v11 = vld [vmem:[#allocation2 + $0x38e] sm:$0xff]  ;;  %v6122_v20 = vld [vmem:[#allocation2 + $0x356] sm:$0xff] }
 0xa4a   : > { %7061 = vmatpush3.bf16.xpose.msra.mxu0 %v5736_v2  ;;  %v9503_v2 = vld [vmem:[%s9588_s11 + $0x22] sm:$0x1]  ;;  %v5977_v30 = vld [vmem:[#allocation2 + $0x347] sm:$0xff]  ;;  %v5976_v22 = vld [vmem:[#allocation2 + $0x32f] sm:$0xff] }
 0xa4b   : > { %7079 = vmatpush3.bf16.xpose.msra.mxu1 %v5881_v51  ;;  %7400 = vmatprep.subr.msk.bf16.mxu0 %vm464_vm0, %v9438_v40  ;;  %v9508_v51 = vld [vmem:[%s9588_s11 + $0x23] sm:$0x1]  ;;  %v6121_v54 = vld [vmem:[#allocation2 + $0x34e] sm:$0xff]  ;;  %v6120_v4 = vld [vmem:[#allocation2 + $0x336] sm:$0xff] }
 0xa4c   : > { %7408 = vmatprep.subr.msk.bf16.mxu1 %vm464_vm0, %v5856_v62  ;;  %v5975_v7 = vld [vmem:[#allocation2 + $0x327] sm:$0xff] }
 0xa4d   : > { %v6119_v57 = vld [vmem:[#allocation2 + $0x32e] sm:$0xff] }
 0xa4e   : > { %v6142_v8 = vpack.c.bf16 %v6120_v4, %v6119_v57 }
 0xa52   : > { %7063 = vmatpush3.bf16.xpose.msra.mxu0 %v5733_v19  ;;  %v5980_v19 = vld [vmem:[#allocation2 + $0x36f] sm:$0xff] }
 0xa53   : > { %7081 = vmatpush3.bf16.xpose.msra.mxu1 %v5878_v33  ;;  %7401 = vmatprep.subr.msk.bf16.mxu0 %vm464_vm0, %v9447_v1  ;;  %v6123_v33 = vld [vmem:[#allocation2 + $0x36e] sm:$0xff]  ;;  %v6000_v6 = vpack.c.bf16 %v5980_v19, %v5979_v49 }
 0xa54   : > { %7409 = vmatprep.subr.msk.bf16.mxu1 %vm464_vm0, %v5855_v18  ;;  %v6144_v50 = vpack.c.bf16 %v6124_v13, %v6123_v33  ;;  %v6115_v49 = vld [vmem:[#allocation2 + $0x2ee] sm:$0xff] }
 0xa5a   : > { %7065 = vmatpush3.bf16.xpose.msra.mxu0 %v5730_v55 }
 0xa5b   : > { %7083 = vmatpush3.bf16.xpose.msra.mxu1 %v5875_v23  ;;  %7402 = vmatprep.subr.msk.bf16.mxu0 %vm464_vm0, %v9456_v41 }
 0xa5c   : > { %7410 = vmatprep.subr.msk.bf16.mxu1 %vm464_vm0, %v5854_v29 }
 0xa62   : > { %7067 = vmatpush3.bf16.xpose.msra.mxu0 %v5727_v56 }
 0xa63   : > { %7085 = vmatpush3.bf16.xpose.msra.mxu1 %v5872_v48  ;;  %7403 = vmatprep.subr.msk.bf16.mxu0 %vm464_vm0, %v9465_v21  ;;  %v5964_v48 = vld [vmem:[#allocation2 + $0x26f] sm:$0xff] }
 0xa64   : > { %7411 = vmatprep.subr.msk.bf16.mxu1 %vm464_vm0, %v5853_v3  ;;  %v6169_v3 = vsel %vm464_vm0, %v9438_v40, 0 }
 0xa6a   : > { %7069 = vmatpush3.bf16.xpose.msra.mxu0 %v5724_v36 }
 0xa6b   : > { %7087 = vmatpush3.bf16.xpose.msra.mxu1 %v5869_v14  ;;  %7404 = vmatprep.subr.msk.bf16.mxu0 %vm464_vm0, %v9474_v26  ;;  %v6143_v14 = vpack.c.bf16 %v6122_v20, %v6121_v54 }
 0xa6c   : > { %7412 = vmatprep.subr.msk.bf16.mxu1 %vm464_vm0, %v5852_v31  ;;  %v5992_v31 = vpack.c.bf16 %v5964_v48, %v5963_v5  ;;  %v6097_v48 = vld [vmem:[#allocation2 + $0x1ce] sm:$0xff]  ;;  %v6098_v5 = vld [vmem:[#allocation2 + $0x1d6] sm:$0xff] }
 0xa6e   : > { %v6022_v40 = vsel %vm464_vm0, %v5992_v31, 0 }
 0xa72   : > { %7071 = vmatpush3.bf16.xpose.msra.mxu0 %v5721_v25  ;;  %v5962_v25 = vld [vmem:[#allocation2 + $0x24f] sm:$0xff] }
 0xa73   : > { %7089 = vmatpush3.bf16.xpose.msra.mxu1 %v5866_v44  ;;  %7405 = vmatprep.subr.msk.bf16.mxu0 %vm464_vm0, %v9191_v46  ;;  %v5981_v46 = vld [vmem:[#allocation2 + $0x387] sm:$0xff] }
 0xa74   : > { %7413 = vmatprep.subr.msk.bf16.mxu1 %vm464_vm0, %v9300_v16  ;;  %v6126_v16 = vld [vmem:[#allocation2 + $0x396] sm:$0xff]  ;;  %v6001_v28 = vpack.c.bf16 %v5982_v35, %v5981_v46  ;;  %v5961_v44 = vld [vmem:[#allocation2 + $0x247] sm:$0xff] }
 0xa75   : > { %v6145_v37 = vpack.c.bf16 %v6126_v16, %v6125_v11  ;;  %v5960_v46 = vld [vmem:[#allocation2 + $0x22f] sm:$0xff]  ;;  %v5959_v35 = vld [vmem:[#allocation2 + $0x227] sm:$0xff] }
 0xa76   : > { %v5973_v11 = vld [vmem:[#allocation2 + $0x307] sm:$0xff]  ;;  %v5974_v16 = vld [vmem:[#allocation2 + $0x30f] sm:$0xff] }
 0xa7a   : > { %7073 = vmatpush3.bf16.xpose.msra.mxu0 %v9206_v38  ;;  %v6028_v38 = vsel %vm464_vm0, %v5994_v60, 0  ;;  %v6117_v60 = vld [vmem:[#allocation2 + $0x30e] sm:$0xff] }
 0xa7b   : > { %7091 = vmatpush3.bf16.xpose.msra.mxu1 %v9312_v12  ;;  %7414 = vmatprep.subr.msk.bf16.mxu0 %vm464_vm0, %v6002_v10  ;;  %v6172_v12 = vsel %vm464_vm0, %v9409_v17, 0  ;;  %v5965_v17 = vld [vmem:[#allocation2 + $0x287] sm:$0xff]  ;;  %v5991_v10 = vpack.c.bf16 %v5962_v25, %v5961_v44 }
 0xa7c   : > { %7422 = vmatprep.subr.msk.bf16.mxu1 %vm464_vm0, %v6146_v53  ;;  %v5998_v53 = vpack.c.bf16 %v5976_v22, %v5975_v7 }
 0xa7d   : > { %v6019_v34 = vsel %vm464_vm0, %v5991_v10, 0 }
 0xa81   : > { %v5033_v43 = vpop.f32.mrf.mxu0  ;;  %7075 = vmatmul.mubr.msk.bf16.vlgmr.msra.gmra.mxu0 %vm464_vm0, %v9414_v52 }
 0xa82   : > { %v9491_v62 = vpop.f32.mrf.mxu1  ;;  %7093 = vmatmul.mubr.msk.bf16.vlgmr.msra.gmra.mxu1 %vm464_vm0, %v9419_v9  ;;  %v5040_v52 = vadd.f32 %v5033_v43, %v9425_v39  ;;  %7095 = vmatpush3.bf16.xpose.msra.mxu0 %v6028_v38  ;;  %v5966_v9 = vld [vmem:[#allocation2 + $0x28f] sm:$0xff]  ;;  %v5997_v43 = vpack.c.bf16 %v5974_v16, %v5973_v11 }
 0xa83   : > { %7113 = vmatpush3.bf16.xpose.msra.mxu1 %v6172_v12  ;;  %v5035_v47 = vpop.f32.mrf.mxu0  ;;  %7415 = vmatprep.subr.msk.bf16.mxu0 %vm464_vm0, %v6001_v28  ;;  %v5993_v15 = vpack.c.bf16 %v5966_v9, %v5965_v17  ;;  %v6118_v28 = vld [vmem:[#allocation2 + $0x316] sm:$0xff]  ;;  %v5957_v9 = vld [vmem:[#allocation2 + $0x207] sm:$0xff] }
 0xa84   : > { %v9511_v61 = vpop.f32.mrf.mxu1  ;;  %7423 = vmatprep.subr.msk.bf16.mxu1 %vm464_vm0, %v6145_v37  ;;  %v5042_v63 = vmax.f32 %v5040_v52, 0.0  ;;  %v5041_v18 = vadd.f32 %v5035_v47, %v9432_v59  ;;  %7110 = vmatprep.mubr.msk.bf16.mxu0 %vm464_vm0, %v9503_v2  ;;  %v5990_v37 = vpack.c.bf16 %v5960_v46, %v5959_v35  ;;  %v6141_v38 = vpack.c.bf16 %v6118_v28, %v6117_v60  ;;  %v5958_v52 = vld [vmem:[#allocation2 + $0x20f] sm:$0xff]  ;;  %v5971_v47 = vld [vmem:[#allocation2 + $0x2e7] sm:$0xff] }
 0xa85   : > { %7128 = vmatprep.mubr.msk.bf16.mxu1 %vm464_vm0, %v9508_v51  ;;  %v5037_v39 = vpop.f32.mrf.mxu0  ;;  %v6025_v45 = vsel %vm464_vm0, %v5993_v15, 0  ;;  %v5972_v17 = vld [vmem:[#allocation2 + $0x2ef] sm:$0xff] }
 0xa86   : > { %v5233_v32 = vpop.f32.mrf.mxu1  ;;  %v6251_v27 = vrot.slane %v5042_v63, 4  ;;  %v5043_v29 = vmax.f32 %v5041_v18, 0.0  ;;  %v6016_v12 = vsel %vm464_vm0, %v5990_v37, 0  ;;  %v6116_v63 = vld [vmem:[#allocation2 + $0x2f6] sm:$0xff]  ;;  %v5989_v18 = vpack.c.bf16 %v5958_v52, %v5957_v9 }
 0xa87   : > { %v5038_v55 = vpop.f32.mrf.mxu0  ;;  %v5996_v19 = vpack.c.bf16 %v5972_v17, %v5971_v47  ;;  %v6140_v33 = vpack.c.bf16 %v6116_v63, %v6115_v49  ;;  %v5956_v39 = vld [vmem:[#allocation2 + $0x1ef] sm:$0xff] }
 0xa88   : > { %v5234_v23 = vpop.f32.mrf.mxu1  ;;  %v9521_v59 = vsel %vm6264_vm4, %v9093_v58, %v6251_v27  ;;  %v6252_v42 = vrot.slane %v5043_v29, 4  ;;  %v5978_v58 = vld [vmem:[#allocation2 + $0x34f] sm:$0xff]  ;;  %v6013_v13 = vsel %vm464_vm0, %v5989_v18, 0  ;;  %v5955_v27 = vld [vmem:[#allocation2 + $0x1e7] sm:$0xff] }
 0xa89   : > { %v5999_v36 = vpack.c.bf16 %v5978_v58, %v5977_v30  ;;  %v6099_v32 = vld [vmem:[#allocation2 + $0x1ee] sm:$0xff]  ;;  %v6100_v15 = vld [vmem:[#allocation2 + $0x1f6] sm:$0xff]  ;;  %v5988_v29 = vpack.c.bf16 %v5956_v39, %v5955_v27  ;;  %v6131_v58 = vpack.c.bf16 %v6098_v5, %v6097_v48 }
 0xa8a   : > { %v9527_v56 = vsel %vm6264_vm4, %v9098_v24, %v6252_v42  ;;  %7097 = vmatpush3.bf16.xpose.msra.mxu0 %v6025_v45  ;;  %v6166_v24 = vsel %vm464_vm0, %v9447_v1, 0  ;;  %v6163_v1 = vsel %vm464_vm0, %v9456_v41, 0  ;;  %v6160_v41 = vsel %vm464_vm0, %v9465_v21, 0  ;;  %v5969_v23 = vld [vmem:[#allocation2 + $0x2c7] sm:$0xff] }
 0xa8b   : > { %7115 = vmatpush3.bf16.xpose.msra.mxu1 %v6169_v3  ;;  %7416 = vmatprep.subr.msk.bf16.mxu0 %vm464_vm0, %v6000_v6  ;;  %v6157_v21 = vsel %vm464_vm0, %v9474_v26, 0  ;;  %v6132_v55 = vpack.c.bf16 %v6100_v15, %v6099_v32  ;;  %v5970_v6 = vld [vmem:[#allocation2 + $0x2cf] sm:$0xff]  ;;  %v5953_v26 = vld [vmem:[#allocation2 + $0x1c7] sm:$0xff]  ;;  %v6151_v20 = vsel %vm464_vm0, %v6131_v58, 0 }
 0xa8c   : > { %7424 = vmatprep.subr.msk.bf16.mxu1 %vm464_vm0, %v6144_v50  ;;  %v6010_v50 = vsel %vm464_vm0, %v5988_v29, 0  ;;  %v5995_v45 = vpack.c.bf16 %v5970_v6, %v5969_v23  ;;  %v5954_v3 = vld [vmem:[#allocation2 + $0x1cf] sm:$0xff] }
 0xa8d   : > { %v6154_v42 = vsel %vm464_vm0, %v6132_v55, 0  ;;  %v5987_v30 = vpack.c.bf16 %v5954_v3, %v5953_v26 }
 0xa8f   : > { %v6007_v54 = vsel %vm464_vm0, %v5987_v30, 0 }
 0xa92   : > { %7099 = vmatpush3.bf16.xpose.msra.mxu0 %v6022_v40 }
 0xa93   : > { %7117 = vmatpush3.bf16.xpose.msra.mxu1 %v6166_v24  ;;  %7417 = vmatprep.subr.msk.bf16.mxu0 %vm464_vm0, %v5999_v36 }
 0xa94   : > { %7425 = vmatprep.subr.msk.bf16.mxu1 %vm464_vm0, %v6143_v14 }
 0xa9a   : > { %7101 = vmatpush3.bf16.xpose.msra.mxu0 %v6019_v34 }
 0xa9b   : > { %7119 = vmatpush3.bf16.xpose.msra.mxu1 %v6163_v1  ;;  %7418 = vmatprep.subr.msk.bf16.mxu0 %vm464_vm0, %v5998_v53 }
 0xa9c   : > { %7426 = vmatprep.subr.msk.bf16.mxu1 %vm464_vm0, %v6142_v8 }
 0xaa2   : > { %7103 = vmatpush3.bf16.xpose.msra.mxu0 %v6016_v12 }
 0xaa3   : > { %7121 = vmatpush3.bf16.xpose.msra.mxu1 %v6160_v41  ;;  %7419 = vmatprep.subr.msk.bf16.mxu0 %vm464_vm0, %v5997_v43 }
 0xaa4   : > { %7427 = vmatprep.subr.msk.bf16.mxu1 %vm464_vm0, %v6141_v38 }
 0xaaa   : > { %7105 = vmatpush3.bf16.xpose.msra.mxu0 %v6013_v13 }
 0xaab   : > { %7123 = vmatpush3.bf16.xpose.msra.mxu1 %v6157_v21  ;;  %7420 = vmatprep.subr.msk.bf16.mxu0 %vm464_vm0, %v5996_v19 }
 0xaac   : > { %7428 = vmatprep.subr.msk.bf16.mxu1 %vm464_vm0, %v6140_v33 }
 0xab2   : > { %7107 = vmatpush3.bf16.xpose.msra.mxu0 %v6010_v50 }
 0xab3   : > { %7125 = vmatpush3.bf16.xpose.msra.mxu1 %v6154_v42  ;;  %7421 = vmatprep.subr.msk.bf16.mxu0 %vm464_vm0, %v5995_v45 }
 0xab4   : > { %7429 = vmatprep.subr.msk.bf16.mxu1 %vm464_vm0, %v9394_v0 }
 0xaba   : > { %7109 = vmatpush3.bf16.xpose.msra.mxu0 %v6007_v54 }
 0xabb   : > { %7127 = vmatpush3.bf16.xpose.msra.mxu1 %v6151_v20 }
 0xac1   : > { %v5321_v31 = vpop.f32.mrf.mxu0  ;;  %7111 = vmatmul.mubr.msk.bf16.vlgmr.msra.gmra.mxu0 %vm464_vm0, %v9503_v2 }
 0xac2   : > { %v5463_v36 = vpop.f32.mrf.mxu1  ;;  %7129 = vmatmul.mubr.msk.bf16.vlgmr.msra.gmra.mxu1 %vm464_vm0, %v9508_v51  ;;  %v5322_v14 = vadd.f32 %v5321_v31, %v9491_v62 }
 0xac3   : > { %v5323_v40 = vpop.f32.mrf.mxu0 }
 0xac4   : > { %v5465_v0 = vpop.f32.mrf.mxu1  ;;  %v5470_v24 = vadd.f32 %v5463_v36, %v5322_v14  ;;  %v5324_v25 = vadd.f32 %v5323_v40, %v9511_v61 }
 0xac5   : > { %v5325_v44 = vpop.f32.mrf.mxu0 }
 0xac6   : > { %v5467_v7 = vpop.f32.mrf.mxu1  ;;  %v5471_v22 = vadd.f32 %v5465_v0, %v5324_v25 }
 0xac7   : > { %v5326_v57 = vpop.f32.mrf.mxu0 }
 0xac8   : > { %v5468_v4 = vpop.f32.mrf.mxu1 }
 0xb01   : > { %v5607_v10 = vpop.f32.mrf.mxu0 }
 0xb02   : > { %v5655_v53 = vpop.f32.mrf.mxu1  ;;  %v5614_v8 = vadd.f32 %v5607_v10, %v5470_v24 }
 0xb03   : > { %v5609_v34 = vpop.f32.mrf.mxu0 }
 0xb04   : > { %v5657_v2 = vpop.f32.mrf.mxu1  ;;  %v5662_v1 = vadd.f32 %v5655_v53, %v5614_v8  ;;  %v5615_v46 = vadd.f32 %v5609_v34, %v5471_v22 }
 0xb05   : > { %v5611_v51 = vpop.f32.mrf.mxu0 }
 0xb06   : > { %v5659_v35 = vpop.f32.mrf.mxu1  ;;  %v5663_v62 = vadd.f32 %v5657_v2, %v5615_v46 }
 0xb07   : > { %v5612_v11 = vpop.f32.mrf.mxu0 }
 0xb08   : > { %v5660_v16 = vpop.f32.mrf.mxu1 }
 0xb41   : > { %v5799_v60 = vpop.f32.mrf.mxu0 }
 0xb42   : > { %v5944_v28 = vpop.f32.mrf.mxu1  ;;  %v5806_v52 = vadd.f32 %v5799_v60, %v5662_v1 }
 0xb43   : > { %v5801_v61 = vpop.f32.mrf.mxu0 }
 0xb44   : > { %v5946_v37 = vpop.f32.mrf.mxu1  ;;  %v5807_v9 = vadd.f32 %v5801_v61, %v5663_v62  ;;  %v5951_v47 = vadd.f32 %v5944_v28, %v5806_v52 }
 0xb45   : > { %v5803_v43 = vpop.f32.mrf.mxu0 }
 0xb46   : > { %v5948_v38 = vpop.f32.mrf.mxu1  ;;  %v5952_v63 = vadd.f32 %v5946_v37, %v5807_v9 }
 0xb47   : > { %v5804_v12 = vpop.f32.mrf.mxu0 }
 0xb48   : > { %v5949_v41 = vpop.f32.mrf.mxu1 }
 0xb81   : > { %v6088_v17 = vpop.f32.mrf.mxu0 }
 0xb82   : > { %v6232_v49 = vpop.f32.mrf.mxu1  ;;  %v6095_v18 = vadd.f32 %v6088_v17, %v5951_v47 }
 0xb83   : > { %v6090_v19 = vpop.f32.mrf.mxu0 }
 0xb84   : > { %v6234_v33 = vpop.f32.mrf.mxu1  ;;  %v6239_v13 = vadd.f32 %v6232_v49, %v6095_v18  ;;  %v6096_v21 = vadd.f32 %v6090_v19, %v5952_v63 }
 0xb85   : > { %v6092_v39 = vpop.f32.mrf.mxu0 }
 0xb86   : > { %v6236_v32 = vpop.f32.mrf.mxu1  ;;  %v6241_v15 = vmax.f32 %v6239_v13, 0.0  ;;  %v6240_v27 = vadd.f32 %v6234_v33, %v6096_v21 }
 0xb87   : > { %v6093_v29 = vpop.f32.mrf.mxu0 }
 0xb88   : > { %v6237_v55 = vpop.f32.mrf.mxu1  ;;  %v6257_v23 = vrot.slane %v6241_v15, 2  ;;  %v6242_v6 = vmax.f32 %v6240_v27, 0.0 }
 0xb8a   : > { %v6268_v50 = vsel %vm6267_vm5, %v9521_v59, %v6257_v23  ;;  %v6258_v42 = vrot.slane %v6242_v6, 2 }
 0xb8b   : > { %6270 = vst [vmem:[%s448_s26] sm:$0xff] %v6268_v50  ;;  %v6272_v45 = vmul.f32 0.5, %v6268_v50 }
 0xb8c   : > { %v6269_v26 = vsel %vm6267_vm5, %v9527_v56, %v6258_v42 }
 0xb8d   : > { %6271 = vst [vmem:[%s448_s26 + $0x8] sm:$0xff] %v6269_v26  ;;  %v6273_v3 = vmul.f32 0.5, %v6269_v26  ;;  %7442 = vtanh.f32 %v6272_v45 }
 0xb8f   : > { %7444 = vtanh.f32 %v6273_v3 }
 0xb9a   : > { %v7443_v48 = vpop.eup %7442 }
 0xb9b   : > { %v6276_v5 = vadd.f32 1.0, %v7443_v48 }
 0xb9c   : > { %v7445_v30 = vpop.eup %7444 }
 0xb9d   : > { %v6277_v58 = vadd.f32 1.0, %v7445_v30  ;;  %v6278_v54 = vmul.f32 0.5, %v6276_v5 }
 0xb9f   : > { %v6279_v20 = vmul.f32 0.5, %v6277_v58 }
 0xba1   : > { %v6280_v31 = vadd.f32 %v6279_v20, %v6278_v54 }
 0xba3   : > { %6281 = vadd.xlane.f32.xlu0 %v6280_v31 }
 0xc2c   : > { %v6282_v36 = vpop.xlane.xlu0 %6281 }
 0xc2d   : > { %7446 = vrcp.f32 %v6282_v36 }
 0xc3a   : > { %v7447_v59 = vpop.eup %7446 }
 0xc3b   : > { %v6284_v56 = vmul.f32 %v7447_v59, %v6278_v54  ;;  %v6285_v14 = vmul.f32 %v7447_v59, %v6279_v20 }
 0xc3d   : > { %6286 = vst [vmem:[%s453_s29] sm:$0xff] %v6284_v56  ;;  %6287 = vst [vmem:[%s453_s29 + $0x8] sm:$0xff] %v6285_v14 }
 0xc3e PF: > { %s24_s25 = sadd.s32 1, %s7454_s25  }
 0xc3f   : > { %p21_p4 = scmp.ge.s32.totalorder %s24_s25, 4  }
 0xc41   :  { %23 = sbr.rel (!%p21_p4) target bundleno = 1 (0x1), region = 153 }

</bundles_post_ra>
